<compile_context>
chip_gen: v6e
topology: v6e:2x2x1
jax: 0.10.0
libtpu: 0.0.40
codegen_flags: <defaults>
</compile_context>

<pallas_src>
import functools
import itertools

import numpy as np

import jax
import jax.numpy as jnp
from jax.experimental import pallas as pl
from jax.experimental.pallas import tpu as pltpu


# ----------------------------- in-kernel shift helpers -----------------------------------------
def _flat_get(x, delta):
    """y[..., k] = x[..., (k + delta) % n] along the flattened spatial axis.

    Wrapped positions are always overwritten by the caller's border fix, so the wrap
    values are never observed.
    """
    n = x.shape[-1]
    d = delta % n
    if d == 0:
        return x
    return jnp.concatenate([x[..., d:], x[..., :d]], axis=-1)


def _shift_axis_once(x, d_flat, at_edge, mode):
    """Single-step shift along one spatial axis (flattened form) with border handling."""
    main = _flat_get(x, d_flat)
    if mode == "zero":
        fix = jnp.zeros_like(x)
    elif mode == "replicate":
        fix = x
    elif mode == "reflect":  # pad width 1 (matches the 3x3 stats kernel)
        fix = _flat_get(x, -d_flat)
    else:
        raise ValueError(mode)
    return jnp.where(at_edge, fix, main)


def _shift2d(x, dh, dw, mode, col, row, H, W):
    """y[c, i*W+j] = x[c, pad(i+dh)*W + pad(j+dw)] for small static (dh, dw)."""
    y = x
    if dw != 0:
        step = 1 if dw > 0 else -1
        for _ in range(abs(dw)):  # replicate composes exactly; reflect/zero only ever use |d|<=1
            at_edge = (col == (W - 1)) if step > 0 else (col == 0)
            y = _shift_axis_once(y, step, at_edge, mode)
    if dh != 0:
        step = 1 if dh > 0 else -1
        for _ in range(abs(dh)):
            at_edge = (row == (H - 1)) if step > 0 else (row == 0)
            y = _shift_axis_once(y, step * W, at_edge, mode)
    return y


# ----------------------------------- fused kernel ----------------------------------------------
def _glr_kernel(pos_ref, w_ref, x_ref, ew_ref, o_ref, *, C, H, W, edge_deltas):
    HW = H * W
    pos = pos_ref[...]                      # (2, HW) int32: [col, row]
    col = pos[0:1, :]
    row = pos[1:2, :]
    x = x_ref[0].astype(jnp.float32)        # (C, HW)   one (batch, graph) sample
    ew = ew_ref[0].astype(jnp.float32)      # (E, HW)
    w_all = w_ref[...].astype(jnp.float32)  # (3, C, 9): plane k = 3x3 taps of out-channel 3c+k

    # ---- stats_conv: grouped 3x3 conv, reflect padding ----
    taps = []
    for a in range(3):
        for b in range(3):
            taps.append(_shift2d(x, a - 1, b - 1, "reflect", col, row, H, W))
    s = []
    for k in range(3):
        wk = w_all[k]                       # (C, 9)
        acc = jnp.zeros((C, HW), jnp.float32)
        for t in range(9):
            acc = acc + wk[:, t:t + 1] * taps[t]
        s.append(acc)                       # s[k][c] == conv output channel 3c+k

    # ---- op_L_norm: u = s - sum_e w_e * neighbor_e(s)   (replicate-padded neighbors) ----
    u = []
    for k in range(3):
        wx = jnp.zeros((C, HW), jnp.float32)
        for e, (dh, dw) in enumerate(edge_deltas):
            wx = wx + ew[e:e + 1, :] * _shift2d(s[k], dh, dw, "replicate", col, row, H, W)
        u.append(s[k] - wx)

    # ---- stats_conv_transpose: grouped conv_transpose2d, padding=1 (zero padding) ----
    out = jnp.zeros((C, HW), jnp.float32)
    for k in range(3):
        wk = w_all[k]                       # (C, 9)
        for a in range(3):
            for b in range(3):
                sh = _shift2d(u[k], 1 - a, 1 - b, "zero", col, row, H, W)
                out = out + wk[:, 3 * a + b:3 * a + b + 1] * sh

    o_ref[0] = out.astype(o_ref.dtype)


# -------------------------------------- wrapper -------------------------------------------------
def _edge_deltas_from_window(connection_window):
    ws = connection_window.shape[0]
    m = np.arange(ws) - ws // 2
    deltas = np.array(list(itertools.product(m, m)), dtype=np.int32)
    deltas = deltas[np.asarray(connection_window).reshape(-1) == 1]
    return tuple((int(dh), int(dw)) for dh, dw in deltas)


def glr_fast_forward(patchs, edge_weights, node_degree, stats_kernel, connection_window):
    """Pallas equivalent of GLRFast.forward(patchs, edge_weights, node_degree).

    patchs:       (B, n_graphs, C, H, W)
    edge_weights: (B, n_graphs, n_edges, H, W)
    node_degree:  (B, n_graphs, H, W)   -- accepted for signature parity; unused by forward
    stats_kernel: (3*C, 1, 3, 3)        -- learnable grouped-conv kernel
    connection_window: (ws, ws) 0/1 numpy array (static, as in the module __init__)
    """
    del node_degree  # unused by the PyTorch forward; intentionally not passed to the kernel
    B, G, C, H, W = patchs.shape
    E = edge_weights.shape[2]
    HW = H * W
    edge_deltas = _edge_deltas_from_window(connection_window)
    assert len(edge_deltas) == E, "edge_weights E-axis must match connection_window"
    # NOTE: the module's conv_transpose .view(..., h_size, h_size) implies H == W.

    # (3C,1,3,3) -> (3, C, 9): plane k holds the row-major 3x3 taps of output channel 3c+k.
    w3 = jnp.transpose(stats_kernel[:, 0].reshape(C, 3, 3, 3), (1, 0, 2, 3)).reshape(3, C, 9)
    w3 = w3.astype(jnp.float32)

    # Precomputed (col, row) table for border masks of the flattened spatial axis.
    pos = jnp.asarray(
        np.stack([np.tile(np.arange(W, dtype=np.int32), H),
                  np.repeat(np.arange(H, dtype=np.int32), W)], axis=0))  # (2, HW)

    x2 = patchs.reshape(B * G, C, HW)       # free views of the NCHW memory (no transposes)
    ew2 = edge_weights.reshape(B * G, E, HW)

    kernel = functools.partial(_glr_kernel, C=C, H=H, W=W, edge_deltas=edge_deltas)
    out2 = pl.pallas_call(
        kernel,
        out_shape=jax.ShapeDtypeStruct((B * G, C, HW), patchs.dtype),
        grid_spec=pltpu.PrefetchScalarGridSpec(
            num_scalar_prefetch=0,
            grid=(B * G,),                                   # one (batch, graph) sample / step
            in_specs=[
                pl.BlockSpec((2, HW), lambda n: (0, 0)),       # col/row table (resident)
                pl.BlockSpec((3, C, 9), lambda n: (0, 0, 0)),  # stats kernel (resident)
                pl.BlockSpec((1, C, HW), lambda n: (n, 0, 0)),  # patchs sample
                pl.BlockSpec((1, E, HW), lambda n: (n, 0, 0)),  # edge weights sample
            ],
            out_specs=pl.BlockSpec((1, C, HW), lambda n: (n, 0, 0)),
        ),
        compiler_params=pltpu.CompilerParams(
            dimension_semantics=("parallel",),   # independent samples -> v7x megacore sharding
        ),
    )(pos, w3, x2, ew2)
    # TODO(synk): for very large H*W, add a second grid axis tiling the spatial dim (with a
    # 1-pixel halo) so per-step VMEM stays bounded; unnecessary at these sizes.
    return out2.reshape(B, G, C, H, W)


# -------------------------- pure-JAX reference (for verification) ------------------------------
def _reference_forward(patchs, edge_weights, stats_kernel, edge_deltas):
    B, G, C, H, W = patchs.shape
    E = edge_weights.shape[2]
    x = patchs.reshape(B * G, C, H, W).astype(jnp.float32)
    k2d = stats_kernel[:, 0].astype(jnp.float32)            # (3C, 3, 3)

    # stats_conv (grouped, reflect pad 1)
    xp = jnp.pad(x, ((0, 0), (0, 0), (1, 1), (1, 1)), mode="reflect")
    s = []
    for o in range(3 * C):
        c = o // 3
        acc = jnp.zeros((B * G, H, W), jnp.float32)
        for a in range(3):
            for b in range(3):
                acc = acc + k2d[o, a, b] * xp[:, c, a:a + H, b:b + W]
        s.append(acc)
    s = jnp.stack(s, axis=1)                                 # (BG, 3C, H, W)

    # op_L_norm (replicate-padded neighbors, weighted sum over edges)
    padH = max(abs(dh) for dh, _ in edge_deltas)
    padW = max(abs(dw) for _, dw in edge_deltas)
    sp = jnp.pad(s, ((0, 0), (0, 0), (padH, padH), (padW, padW)), mode="edge")
    ew = edge_weights.reshape(B * G, E, H, W).astype(jnp.float32)
    wx = jnp.zeros_like(s)
    for e, (dh, dw) in enumerate(edge_deltas):
        nb = sp[:, :, padH + dh:padH + dh + H, padW + dw:padW + dw + W]
        wx = wx + nb * ew[:, e][:, None, :, :]
    u = s - wx

    # stats_conv_transpose (grouped, zero padding=1)
    up = jnp.pad(u, ((0, 0), (0, 0), (1, 1), (1, 1)))
    outs = []
    for c in range(C):
        acc = jnp.zeros((B * G, H, W), jnp.float32)
        for k in range(3):
            o = 3 * c + k
            for a in range(3):
                for b in range(3):
                    acc = acc + k2d[o, a, b] * up[:, o, 2 - a:2 - a + H, 2 - b:2 - b + W]
        outs.append(acc)
    y = jnp.stack(outs, axis=1)                              # (BG, C, H, W)
    return y.reshape(B, G, C, H, W)


def _init_stats_kernel(n_channels):
    avg = np.array([[0., 0., 0.], [0., 1., 0.], [0., 0., 0.]], np.float32)
    d_x = 0.5 * np.array([[0., 0., 0.], [0., -1., 1.], [0., 0., 0.]], np.float32)
    d_y = 0.5 * np.array([[0., 0., 0.], [0., -1., 0.], [0., 1., 0.]], np.float32)
    ker = []
    for _ in range(n_channels):
        ker += [avg[None, None], d_x[None, None], d_y[None, None]]
    return np.concatenate(ker, axis=0)                       # (3C, 1, 3, 3)


if __name__ == "__main__":
    key = jax.random.PRNGKey(0)
    B, G, C, H, W = 2, 2, 4, 16, 16                          # batch, n_graphs, n_channels, H, W
    connection_window = np.ones((3, 3), dtype=np.int64)      # full 8-neighborhood + self edge
    E = int((connection_window == 1).sum())

    k1, k2, k3 = jax.random.split(key, 3)
    patchs = jax.random.normal(k1, (B, G, C, H, W), dtype=jnp.float32)
    edge_weights = jax.random.uniform(k2, (B, G, E, H, W), dtype=jnp.float32)
    node_degree = jnp.sum(edge_weights, axis=2)              # unused by forward (parity only)

    # module init (avg / delta_x / delta_y per channel) + small perturbation so the
    # learnable stats_kernel path is genuinely exercised
    stats_kernel = jnp.asarray(_init_stats_kernel(C)) + 0.05 * jax.random.normal(
        k3, (3 * C, 1, 3, 3), dtype=jnp.float32)

    out = glr_fast_forward(patchs, edge_weights, node_degree, stats_kernel, connection_window)
    out = jax.block_until_ready(out)

    ref = _reference_forward(patchs, edge_weights, stats_kernel,
                             _edge_deltas_from_window(connection_window))
    err = float(jnp.max(jnp.abs(out - ref)))
    if out.shape == (B, G, C, H, W) and err < 2e-3:
        print("KERNEL_OK")
    else:
        print(f"MISMATCH: max abs err {err}, shape {out.shape}")
</pallas_src>

<mosaic_0001>
module attributes {stable_mosaic.version = 11 : i64} {
  func.func @_glr_kernel(%arg0: i32, %arg1: memref<2x256xi32, #tpu.memory_space<vmem>>, %arg2: memref<3x4x9xf32, #tpu.memory_space<vmem>>, %arg3: memref<1x4x256xf32, #tpu.memory_space<vmem>>, %arg4: memref<1x9x256xf32, #tpu.memory_space<vmem>>, %arg5: memref<1x4x256xf32, #tpu.memory_space<vmem>>) attributes {dimension_semantics = [#tpu.dimension_semantics<parallel>], iteration_bounds = array<i64: 4>, scalar_prefetch = 0 : i64, scratch_operands = 0 : i64, tpu.core_type = #tpu.core_type<tc>, window_params = [{pipeline_mode = #tpu.pipeline_mode<synchronous>, transform_indices = @transform_0, window_bounds = array<i64: 2, 256>}, {pipeline_mode = #tpu.pipeline_mode<synchronous>, transform_indices = @transform_1, window_bounds = array<i64: 3, 4, 9>}, {transform_indices = @transform_2, window_bounds = array<i64: 1, 4, 256>}, {transform_indices = @transform_3, window_bounds = array<i64: 1, 9, 256>}, {transform_indices = @transform_4, window_bounds = array<i64: 1, 4, 256>}]} {
    %c0 = arith.constant 0 : index
    %c0_0 = arith.constant 0 : index
    %0 = vector.load %arg1[%c0, %c0_0] : memref<2x256xi32, #tpu.memory_space<vmem>>, vector<2x256xi32>
    %1 = vector.extract_strided_slice %0 {offsets = [0, 0], sizes = [1, 256], strides = [1, 1]} : vector<2x256xi32> to vector<1x256xi32>
    %2 = vector.extract_strided_slice %0 {offsets = [1, 0], sizes = [1, 256], strides = [1, 1]} : vector<2x256xi32> to vector<1x256xi32>
    %c0_1 = arith.constant 0 : index
    %c0_2 = arith.constant 0 : index
    %c0_3 = arith.constant 0 : index
    %3 = vector.load %arg3[%c0_1, %c0_2, %c0_3] : memref<1x4x256xf32, #tpu.memory_space<vmem>>, vector<1x4x256xf32>
    %4 = vector.shape_cast %3 : vector<1x4x256xf32> to vector<4x256xf32>
    %c0_4 = arith.constant 0 : index
    %c0_5 = arith.constant 0 : index
    %c0_6 = arith.constant 0 : index
    %5 = vector.load %arg4[%c0_4, %c0_5, %c0_6] : memref<1x9x256xf32, #tpu.memory_space<vmem>>, vector<1x9x256xf32>
    %6 = vector.shape_cast %5 : vector<1x9x256xf32> to vector<9x256xf32>
    %c0_7 = arith.constant 0 : index
    %c0_8 = arith.constant 0 : index
    %c0_9 = arith.constant 0 : index
    %7 = vector.load %arg2[%c0_7, %c0_8, %c0_9] : memref<3x4x9xf32, #tpu.memory_space<vmem>>, vector<3x4x9xf32>
    %c0_i32 = arith.constant 0 : i32
    %8 = vector.broadcast %c0_i32 : i32 to vector<1x256xi32>
    %9 = arith.cmpi eq, %1, %8 : vector<1x256xi32>
    %10 = vector.extract_strided_slice %4 {offsets = [0, 255], sizes = [4, 1], strides = [1, 1]} : vector<4x256xf32> to vector<4x1xf32>
    %11 = vector.extract_strided_slice %4 {offsets = [0, 0], sizes = [4, 255], strides = [1, 1]} : vector<4x256xf32> to vector<4x255xf32>
    %12 = tpu.concatenate %10, %11 in 1 : vector<4x1xf32>, vector<4x255xf32> -> vector<4x256xf32>
    %13 = vector.extract_strided_slice %4 {offsets = [0, 1], sizes = [4, 255], strides = [1, 1]} : vector<4x256xf32> to vector<4x255xf32>
    %14 = vector.extract_strided_slice %4 {offsets = [0, 0], sizes = [4, 1], strides = [1, 1]} : vector<4x256xf32> to vector<4x1xf32>
    %15 = tpu.concatenate %13, %14 in 1 : vector<4x255xf32>, vector<4x1xf32> -> vector<4x256xf32>
    %16 = vector.shape_cast %9 : vector<1x256xi1> to vector<1x256xi1>
    %17 = vector.broadcast %16 : vector<1x256xi1> to vector<4x256xi1>
    %18 = arith.select %17, %15, %12 : vector<4x256xi1>, vector<4x256xf32>
    %c0_i32_10 = arith.constant 0 : i32
    %19 = vector.broadcast %c0_i32_10 : i32 to vector<1x256xi32>
    %20 = arith.cmpi eq, %2, %19 : vector<1x256xi32>
    %21 = vector.extract_strided_slice %18 {offsets = [0, 240], sizes = [4, 16], strides = [1, 1]} : vector<4x256xf32> to vector<4x16xf32>
    %22 = vector.extract_strided_slice %18 {offsets = [0, 0], sizes = [4, 240], strides = [1, 1]} : vector<4x256xf32> to vector<4x240xf32>
    %23 = tpu.concatenate %21, %22 in 1 : vector<4x16xf32>, vector<4x240xf32> -> vector<4x256xf32>
    %24 = vector.extract_strided_slice %18 {offsets = [0, 16], sizes = [4, 240], strides = [1, 1]} : vector<4x256xf32> to vector<4x240xf32>
    %25 = vector.extract_strided_slice %18 {offsets = [0, 0], sizes = [4, 16], strides = [1, 1]} : vector<4x256xf32> to vector<4x16xf32>
    %26 = tpu.concatenate %24, %25 in 1 : vector<4x240xf32>, vector<4x16xf32> -> vector<4x256xf32>
    %27 = vector.shape_cast %20 : vector<1x256xi1> to vector<1x256xi1>
    %28 = vector.broadcast %27 : vector<1x256xi1> to vector<4x256xi1>
    %29 = arith.select %28, %26, %23 : vector<4x256xi1>, vector<4x256xf32>
    %c0_i32_11 = arith.constant 0 : i32
    %30 = vector.broadcast %c0_i32_11 : i32 to vector<1x256xi32>
    %31 = arith.cmpi eq, %2, %30 : vector<1x256xi32>
    %32 = vector.extract_strided_slice %4 {offsets = [0, 240], sizes = [4, 16], strides = [1, 1]} : vector<4x256xf32> to vector<4x16xf32>
    %33 = vector.extract_strided_slice %4 {offsets = [0, 0], sizes = [4, 240], strides = [1, 1]} : vector<4x256xf32> to vector<4x240xf32>
    %34 = tpu.concatenate %32, %33 in 1 : vector<4x16xf32>, vector<4x240xf32> -> vector<4x256xf32>
    %35 = vector.extract_strided_slice %4 {offsets = [0, 16], sizes = [4, 240], strides = [1, 1]} : vector<4x256xf32> to vector<4x240xf32>
    %36 = vector.extract_strided_slice %4 {offsets = [0, 0], sizes = [4, 16], strides = [1, 1]} : vector<4x256xf32> to vector<4x16xf32>
    %37 = tpu.concatenate %35, %36 in 1 : vector<4x240xf32>, vector<4x16xf32> -> vector<4x256xf32>
    %38 = vector.shape_cast %31 : vector<1x256xi1> to vector<1x256xi1>
    %39 = vector.broadcast %38 : vector<1x256xi1> to vector<4x256xi1>
    %40 = arith.select %39, %37, %34 : vector<4x256xi1>, vector<4x256xf32>
    %c15_i32 = arith.constant 15 : i32
    %41 = vector.broadcast %c15_i32 : i32 to vector<1x256xi32>
    %42 = arith.cmpi eq, %1, %41 : vector<1x256xi32>
    %43 = vector.extract_strided_slice %4 {offsets = [0, 1], sizes = [4, 255], strides = [1, 1]} : vector<4x256xf32> to vector<4x255xf32>
    %44 = vector.extract_strided_slice %4 {offsets = [0, 0], sizes = [4, 1], strides = [1, 1]} : vector<4x256xf32> to vector<4x1xf32>
    %45 = tpu.concatenate %43, %44 in 1 : vector<4x255xf32>, vector<4x1xf32> -> vector<4x256xf32>
    %46 = vector.extract_strided_slice %4 {offsets = [0, 255], sizes = [4, 1], strides = [1, 1]} : vector<4x256xf32> to vector<4x1xf32>
    %47 = vector.extract_strided_slice %4 {offsets = [0, 0], sizes = [4, 255], strides = [1, 1]} : vector<4x256xf32> to vector<4x255xf32>
    %48 = tpu.concatenate %46, %47 in 1 : vector<4x1xf32>, vector<4x255xf32> -> vector<4x256xf32>
    %49 = vector.shape_cast %42 : vector<1x256xi1> to vector<1x256xi1>
    %50 = vector.broadcast %49 : vector<1x256xi1> to vector<4x256xi1>
    %51 = arith.select %50, %48, %45 : vector<4x256xi1>, vector<4x256xf32>
    %c0_i32_12 = arith.constant 0 : i32
    %52 = vector.broadcast %c0_i32_12 : i32 to vector<1x256xi32>
    %53 = arith.cmpi eq, %2, %52 : vector<1x256xi32>
    %54 = vector.extract_strided_slice %51 {offsets = [0, 240], sizes = [4, 16], strides = [1, 1]} : vector<4x256xf32> to vector<4x16xf32>
    %55 = vector.extract_strided_slice %51 {offsets = [0, 0], sizes = [4, 240], strides = [1, 1]} : vector<4x256xf32> to vector<4x240xf32>
    %56 = tpu.concatenate %54, %55 in 1 : vector<4x16xf32>, vector<4x240xf32> -> vector<4x256xf32>
    %57 = vector.extract_strided_slice %51 {offsets = [0, 16], sizes = [4, 240], strides = [1, 1]} : vector<4x256xf32> to vector<4x240xf32>
    %58 = vector.extract_strided_slice %51 {offsets = [0, 0], sizes = [4, 16], strides = [1, 1]} : vector<4x256xf32> to vector<4x16xf32>
    %59 = tpu.concatenate %57, %58 in 1 : vector<4x240xf32>, vector<4x16xf32> -> vector<4x256xf32>
    %60 = vector.shape_cast %53 : vector<1x256xi1> to vector<1x256xi1>
    %61 = vector.broadcast %60 : vector<1x256xi1> to vector<4x256xi1>
    %62 = arith.select %61, %59, %56 : vector<4x256xi1>, vector<4x256xf32>
    %c0_i32_13 = arith.constant 0 : i32
    %63 = vector.broadcast %c0_i32_13 : i32 to vector<1x256xi32>
    %64 = arith.cmpi eq, %1, %63 : vector<1x256xi32>
    %65 = vector.extract_strided_slice %4 {offsets = [0, 255], sizes = [4, 1], strides = [1, 1]} : vector<4x256xf32> to vector<4x1xf32>
    %66 = vector.extract_strided_slice %4 {offsets = [0, 0], sizes = [4, 255], strides = [1, 1]} : vector<4x256xf32> to vector<4x255xf32>
    %67 = tpu.concatenate %65, %66 in 1 : vector<4x1xf32>, vector<4x255xf32> -> vector<4x256xf32>
    %68 = vector.extract_strided_slice %4 {offsets = [0, 1], sizes = [4, 255], strides = [1, 1]} : vector<4x256xf32> to vector<4x255xf32>
    %69 = vector.extract_strided_slice %4 {offsets = [0, 0], sizes = [4, 1], strides = [1, 1]} : vector<4x256xf32> to vector<4x1xf32>
    %70 = tpu.concatenate %68, %69 in 1 : vector<4x255xf32>, vector<4x1xf32> -> vector<4x256xf32>
    %71 = vector.shape_cast %64 : vector<1x256xi1> to vector<1x256xi1>
    %72 = vector.broadcast %71 : vector<1x256xi1> to vector<4x256xi1>
    %73 = arith.select %72, %70, %67 : vector<4x256xi1>, vector<4x256xf32>
    %c15_i32_14 = arith.constant 15 : i32
    %74 = vector.broadcast %c15_i32_14 : i32 to vector<1x256xi32>
    %75 = arith.cmpi eq, %1, %74 : vector<1x256xi32>
    %76 = vector.extract_strided_slice %4 {offsets = [0, 1], sizes = [4, 255], strides = [1, 1]} : vector<4x256xf32> to vector<4x255xf32>
    %77 = vector.extract_strided_slice %4 {offsets = [0, 0], sizes = [4, 1], strides = [1, 1]} : vector<4x256xf32> to vector<4x1xf32>
    %78 = tpu.concatenate %76, %77 in 1 : vector<4x255xf32>, vector<4x1xf32> -> vector<4x256xf32>
    %79 = vector.extract_strided_slice %4 {offsets = [0, 255], sizes = [4, 1], strides = [1, 1]} : vector<4x256xf32> to vector<4x1xf32>
    %80 = vector.extract_strided_slice %4 {offsets = [0, 0], sizes = [4, 255], strides = [1, 1]} : vector<4x256xf32> to vector<4x255xf32>
    %81 = tpu.concatenate %79, %80 in 1 : vector<4x1xf32>, vector<4x255xf32> -> vector<4x256xf32>
    %82 = vector.shape_cast %75 : vector<1x256xi1> to vector<1x256xi1>
    %83 = vector.broadcast %82 : vector<1x256xi1> to vector<4x256xi1>
    %84 = arith.select %83, %81, %78 : vector<4x256xi1>, vector<4x256xf32>
    %c0_i32_15 = arith.constant 0 : i32
    %85 = vector.broadcast %c0_i32_15 : i32 to vector<1x256xi32>
    %86 = arith.cmpi eq, %1, %85 : vector<1x256xi32>
    %87 = vector.extract_strided_slice %4 {offsets = [0, 255], sizes = [4, 1], strides = [1, 1]} : vector<4x256xf32> to vector<4x1xf32>
    %88 = vector.extract_strided_slice %4 {offsets = [0, 0], sizes = [4, 255], strides = [1, 1]} : vector<4x256xf32> to vector<4x255xf32>
    %89 = tpu.concatenate %87, %88 in 1 : vector<4x1xf32>, vector<4x255xf32> -> vector<4x256xf32>
    %90 = vector.extract_strided_slice %4 {offsets = [0, 1], sizes = [4, 255], strides = [1, 1]} : vector<4x256xf32> to vector<4x255xf32>
    %91 = vector.extract_strided_slice %4 {offsets = [0, 0], sizes = [4, 1], strides = [1, 1]} : vector<4x256xf32> to vector<4x1xf32>
    %92 = tpu.concatenate %90, %91 in 1 : vector<4x255xf32>, vector<4x1xf32> -> vector<4x256xf32>
    %93 = vector.shape_cast %86 : vector<1x256xi1> to vector<1x256xi1>
    %94 = vector.broadcast %93 : vector<1x256xi1> to vector<4x256xi1>
    %95 = arith.select %94, %92, %89 : vector<4x256xi1>, vector<4x256xf32>
    %c15_i32_16 = arith.constant 15 : i32
    %96 = vector.broadcast %c15_i32_16 : i32 to vector<1x256xi32>
    %97 = arith.cmpi eq, %2, %96 : vector<1x256xi32>
    %98 = vector.extract_strided_slice %95 {offsets = [0, 16], sizes = [4, 240], strides = [1, 1]} : vector<4x256xf32> to vector<4x240xf32>
    %99 = vector.extract_strided_slice %95 {offsets = [0, 0], sizes = [4, 16], strides = [1, 1]} : vector<4x256xf32> to vector<4x16xf32>
    %100 = tpu.concatenate %98, %99 in 1 : vector<4x240xf32>, vector<4x16xf32> -> vector<4x256xf32>
    %101 = vector.extract_strided_slice %95 {offsets = [0, 240], sizes = [4, 16], strides = [1, 1]} : vector<4x256xf32> to vector<4x16xf32>
    %102 = vector.extract_strided_slice %95 {offsets = [0, 0], sizes = [4, 240], strides = [1, 1]} : vector<4x256xf32> to vector<4x240xf32>
    %103 = tpu.concatenate %101, %102 in 1 : vector<4x16xf32>, vector<4x240xf32> -> vector<4x256xf32>
    %104 = vector.shape_cast %97 : vector<1x256xi1> to vector<1x256xi1>
    %105 = vector.broadcast %104 : vector<1x256xi1> to vector<4x256xi1>
    %106 = arith.select %105, %103, %100 : vector<4x256xi1>, vector<4x256xf32>
    %c15_i32_17 = arith.constant 15 : i32
    %107 = vector.broadcast %c15_i32_17 : i32 to vector<1x256xi32>
    %108 = arith.cmpi eq, %2, %107 : vector<1x256xi32>
    %109 = vector.extract_strided_slice %4 {offsets = [0, 16], sizes = [4, 240], strides = [1, 1]} : vector<4x256xf32> to vector<4x240xf32>
    %110 = vector.extract_strided_slice %4 {offsets = [0, 0], sizes = [4, 16], strides = [1, 1]} : vector<4x256xf32> to vector<4x16xf32>
    %111 = tpu.concatenate %109, %110 in 1 : vector<4x240xf32>, vector<4x16xf32> -> vector<4x256xf32>
    %112 = vector.extract_strided_slice %4 {offsets = [0, 240], sizes = [4, 16], strides = [1, 1]} : vector<4x256xf32> to vector<4x16xf32>
    %113 = vector.extract_strided_slice %4 {offsets = [0, 0], sizes = [4, 240], strides = [1, 1]} : vector<4x256xf32> to vector<4x240xf32>
    %114 = tpu.concatenate %112, %113 in 1 : vector<4x16xf32>, vector<4x240xf32> -> vector<4x256xf32>
    %115 = vector.shape_cast %108 : vector<1x256xi1> to vector<1x256xi1>
    %116 = vector.broadcast %115 : vector<1x256xi1> to vector<4x256xi1>
    %117 = arith.select %116, %114, %111 : vector<4x256xi1>, vector<4x256xf32>
    %c15_i32_18 = arith.constant 15 : i32
    %118 = vector.broadcast %c15_i32_18 : i32 to vector<1x256xi32>
    %119 = arith.cmpi eq, %1, %118 : vector<1x256xi32>
    %120 = vector.extract_strided_slice %4 {offsets = [0, 1], sizes = [4, 255], strides = [1, 1]} : vector<4x256xf32> to vector<4x255xf32>
    %121 = vector.extract_strided_slice %4 {offsets = [0, 0], sizes = [4, 1], strides = [1, 1]} : vector<4x256xf32> to vector<4x1xf32>
    %122 = tpu.concatenate %120, %121 in 1 : vector<4x255xf32>, vector<4x1xf32> -> vector<4x256xf32>
    %123 = vector.extract_strided_slice %4 {offsets = [0, 255], sizes = [4, 1], strides = [1, 1]} : vector<4x256xf32> to vector<4x1xf32>
    %124 = vector.extract_strided_slice %4 {offsets = [0, 0], sizes = [4, 255], strides = [1, 1]} : vector<4x256xf32> to vector<4x255xf32>
    %125 = tpu.concatenate %123, %124 in 1 : vector<4x1xf32>, vector<4x255xf32> -> vector<4x256xf32>
    %126 = vector.shape_cast %119 : vector<1x256xi1> to vector<1x256xi1>
    %127 = vector.broadcast %126 : vector<1x256xi1> to vector<4x256xi1>
    %128 = arith.select %127, %125, %122 : vector<4x256xi1>, vector<4x256xf32>
    %c15_i32_19 = arith.constant 15 : i32
    %129 = vector.broadcast %c15_i32_19 : i32 to vector<1x256xi32>
    %130 = arith.cmpi eq, %2, %129 : vector<1x256xi32>
    %131 = vector.extract_strided_slice %128 {offsets = [0, 16], sizes = [4, 240], strides = [1, 1]} : vector<4x256xf32> to vector<4x240xf32>
    %132 = vector.extract_strided_slice %128 {offsets = [0, 0], sizes = [4, 16], strides = [1, 1]} : vector<4x256xf32> to vector<4x16xf32>
    %133 = tpu.concatenate %131, %132 in 1 : vector<4x240xf32>, vector<4x16xf32> -> vector<4x256xf32>
    %134 = vector.extract_strided_slice %128 {offsets = [0, 240], sizes = [4, 16], strides = [1, 1]} : vector<4x256xf32> to vector<4x16xf32>
    %135 = vector.extract_strided_slice %128 {offsets = [0, 0], sizes = [4, 240], strides = [1, 1]} : vector<4x256xf32> to vector<4x240xf32>
    %136 = tpu.concatenate %134, %135 in 1 : vector<4x16xf32>, vector<4x240xf32> -> vector<4x256xf32>
    %137 = vector.shape_cast %130 : vector<1x256xi1> to vector<1x256xi1>
    %138 = vector.broadcast %137 : vector<1x256xi1> to vector<4x256xi1>
    %139 = arith.select %138, %136, %133 : vector<4x256xi1>, vector<4x256xf32>
    %140 = vector.extract_strided_slice %7 {offsets = [0, 0, 0], sizes = [1, 4, 9], strides = [1, 1, 1]} : vector<3x4x9xf32> to vector<1x4x9xf32>
    %141 = vector.shape_cast %140 : vector<1x4x9xf32> to vector<4x9xf32>
    %cst = arith.constant 0.000000e+00 : f32
    %142 = vector.broadcast %cst : f32 to vector<4x256xf32>
    %143 = vector.extract_strided_slice %141 {offsets = [0, 0], sizes = [4, 1], strides = [1, 1]} : vector<4x9xf32> to vector<4x1xf32>
    %144 = vector.broadcast %143 : vector<4x1xf32> to vector<4x256xf32>
    %145 = arith.mulf %144, %29 : vector<4x256xf32>
    %146 = arith.addf %142, %145 : vector<4x256xf32>
    %147 = vector.extract_strided_slice %141 {offsets = [0, 1], sizes = [4, 1], strides = [1, 1]} : vector<4x9xf32> to vector<4x1xf32>
    %148 = vector.broadcast %147 : vector<4x1xf32> to vector<4x256xf32>
    %149 = arith.mulf %148, %40 : vector<4x256xf32>
    %150 = arith.addf %146, %149 : vector<4x256xf32>
    %151 = vector.extract_strided_slice %141 {offsets = [0, 2], sizes = [4, 1], strides = [1, 1]} : vector<4x9xf32> to vector<4x1xf32>
    %152 = vector.broadcast %151 : vector<4x1xf32> to vector<4x256xf32>
    %153 = arith.mulf %152, %62 : vector<4x256xf32>
    %154 = arith.addf %150, %153 : vector<4x256xf32>
    %155 = vector.extract_strided_slice %141 {offsets = [0, 3], sizes = [4, 1], strides = [1, 1]} : vector<4x9xf32> to vector<4x1xf32>
    %156 = vector.broadcast %155 : vector<4x1xf32> to vector<4x256xf32>
    %157 = arith.mulf %156, %73 : vector<4x256xf32>
    %158 = arith.addf %154, %157 : vector<4x256xf32>
    %159 = vector.extract_strided_slice %141 {offsets = [0, 4], sizes = [4, 1], strides = [1, 1]} : vector<4x9xf32> to vector<4x1xf32>
    %160 = vector.broadcast %159 : vector<4x1xf32> to vector<4x256xf32>
    %161 = arith.mulf %160, %4 : vector<4x256xf32>
    %162 = arith.addf %158, %161 : vector<4x256xf32>
    %163 = vector.extract_strided_slice %141 {offsets = [0, 5], sizes = [4, 1], strides = [1, 1]} : vector<4x9xf32> to vector<4x1xf32>
    %164 = vector.broadcast %163 : vector<4x1xf32> to vector<4x256xf32>
    %165 = arith.mulf %164, %84 : vector<4x256xf32>
    %166 = arith.addf %162, %165 : vector<4x256xf32>
    %167 = vector.extract_strided_slice %141 {offsets = [0, 6], sizes = [4, 1], strides = [1, 1]} : vector<4x9xf32> to vector<4x1xf32>
    %168 = vector.broadcast %167 : vector<4x1xf32> to vector<4x256xf32>
    %169 = arith.mulf %168, %106 : vector<4x256xf32>
    %170 = arith.addf %166, %169 : vector<4x256xf32>
    %171 = vector.extract_strided_slice %141 {offsets = [0, 7], sizes = [4, 1], strides = [1, 1]} : vector<4x9xf32> to vector<4x1xf32>
    %172 = vector.broadcast %171 : vector<4x1xf32> to vector<4x256xf32>
    %173 = arith.mulf %172, %117 : vector<4x256xf32>
    %174 = arith.addf %170, %173 : vector<4x256xf32>
    %175 = vector.extract_strided_slice %141 {offsets = [0, 8], sizes = [4, 1], strides = [1, 1]} : vector<4x9xf32> to vector<4x1xf32>
    %176 = vector.broadcast %175 : vector<4x1xf32> to vector<4x256xf32>
    %177 = arith.mulf %176, %139 : vector<4x256xf32>
    %178 = arith.addf %174, %177 : vector<4x256xf32>
    %179 = vector.extract_strided_slice %7 {offsets = [1, 0, 0], sizes = [1, 4, 9], strides = [1, 1, 1]} : vector<3x4x9xf32> to vector<1x4x9xf32>
    %180 = vector.shape_cast %179 : vector<1x4x9xf32> to vector<4x9xf32>
    %cst_20 = arith.constant 0.000000e+00 : f32
    %181 = vector.broadcast %cst_20 : f32 to vector<4x256xf32>
    %182 = vector.extract_strided_slice %180 {offsets = [0, 0], sizes = [4, 1], strides = [1, 1]} : vector<4x9xf32> to vector<4x1xf32>
    %183 = vector.broadcast %182 : vector<4x1xf32> to vector<4x256xf32>
    %184 = arith.mulf %183, %29 : vector<4x256xf32>
    %185 = arith.addf %181, %184 : vector<4x256xf32>
    %186 = vector.extract_strided_slice %180 {offsets = [0, 1], sizes = [4, 1], strides = [1, 1]} : vector<4x9xf32> to vector<4x1xf32>
    %187 = vector.broadcast %186 : vector<4x1xf32> to vector<4x256xf32>
    %188 = arith.mulf %187, %40 : vector<4x256xf32>
    %189 = arith.addf %185, %188 : vector<4x256xf32>
    %190 = vector.extract_strided_slice %180 {offsets = [0, 2], sizes = [4, 1], strides = [1, 1]} : vector<4x9xf32> to vector<4x1xf32>
    %191 = vector.broadcast %190 : vector<4x1xf32> to vector<4x256xf32>
    %192 = arith.mulf %191, %62 : vector<4x256xf32>
    %193 = arith.addf %189, %192 : vector<4x256xf32>
    %194 = vector.extract_strided_slice %180 {offsets = [0, 3], sizes = [4, 1], strides = [1, 1]} : vector<4x9xf32> to vector<4x1xf32>
    %195 = vector.broadcast %194 : vector<4x1xf32> to vector<4x256xf32>
    %196 = arith.mulf %195, %73 : vector<4x256xf32>
    %197 = arith.addf %193, %196 : vector<4x256xf32>
    %198 = vector.extract_strided_slice %180 {offsets = [0, 4], sizes = [4, 1], strides = [1, 1]} : vector<4x9xf32> to vector<4x1xf32>
    %199 = vector.broadcast %198 : vector<4x1xf32> to vector<4x256xf32>
    %200 = arith.mulf %199, %4 : vector<4x256xf32>
    %201 = arith.addf %197, %200 : vector<4x256xf32>
    %202 = vector.extract_strided_slice %180 {offsets = [0, 5], sizes = [4, 1], strides = [1, 1]} : vector<4x9xf32> to vector<4x1xf32>
    %203 = vector.broadcast %202 : vector<4x1xf32> to vector<4x256xf32>
    %204 = arith.mulf %203, %84 : vector<4x256xf32>
    %205 = arith.addf %201, %204 : vector<4x256xf32>
    %206 = vector.extract_strided_slice %180 {offsets = [0, 6], sizes = [4, 1], strides = [1, 1]} : vector<4x9xf32> to vector<4x1xf32>
    %207 = vector.broadcast %206 : vector<4x1xf32> to vector<4x256xf32>
    %208 = arith.mulf %207, %106 : vector<4x256xf32>
    %209 = arith.addf %205, %208 : vector<4x256xf32>
    %210 = vector.extract_strided_slice %180 {offsets = [0, 7], sizes = [4, 1], strides = [1, 1]} : vector<4x9xf32> to vector<4x1xf32>
    %211 = vector.broadcast %210 : vector<4x1xf32> to vector<4x256xf32>
    %212 = arith.mulf %211, %117 : vector<4x256xf32>
    %213 = arith.addf %209, %212 : vector<4x256xf32>
    %214 = vector.extract_strided_slice %180 {offsets = [0, 8], sizes = [4, 1], strides = [1, 1]} : vector<4x9xf32> to vector<4x1xf32>
    %215 = vector.broadcast %214 : vector<4x1xf32> to vector<4x256xf32>
    %216 = arith.mulf %215, %139 : vector<4x256xf32>
    %217 = arith.addf %213, %216 : vector<4x256xf32>
    %218 = vector.extract_strided_slice %7 {offsets = [2, 0, 0], sizes = [1, 4, 9], strides = [1, 1, 1]} : vector<3x4x9xf32> to vector<1x4x9xf32>
    %219 = vector.shape_cast %218 : vector<1x4x9xf32> to vector<4x9xf32>
    %cst_21 = arith.constant 0.000000e+00 : f32
    %220 = vector.broadcast %cst_21 : f32 to vector<4x256xf32>
    %221 = vector.extract_strided_slice %219 {offsets = [0, 0], sizes = [4, 1], strides = [1, 1]} : vector<4x9xf32> to vector<4x1xf32>
    %222 = vector.broadcast %221 : vector<4x1xf32> to vector<4x256xf32>
    %223 = arith.mulf %222, %29 : vector<4x256xf32>
    %224 = arith.addf %220, %223 : vector<4x256xf32>
    %225 = vector.extract_strided_slice %219 {offsets = [0, 1], sizes = [4, 1], strides = [1, 1]} : vector<4x9xf32> to vector<4x1xf32>
    %226 = vector.broadcast %225 : vector<4x1xf32> to vector<4x256xf32>
    %227 = arith.mulf %226, %40 : vector<4x256xf32>
    %228 = arith.addf %224, %227 : vector<4x256xf32>
    %229 = vector.extract_strided_slice %219 {offsets = [0, 2], sizes = [4, 1], strides = [1, 1]} : vector<4x9xf32> to vector<4x1xf32>
    %230 = vector.broadcast %229 : vector<4x1xf32> to vector<4x256xf32>
    %231 = arith.mulf %230, %62 : vector<4x256xf32>
    %232 = arith.addf %228, %231 : vector<4x256xf32>
    %233 = vector.extract_strided_slice %219 {offsets = [0, 3], sizes = [4, 1], strides = [1, 1]} : vector<4x9xf32> to vector<4x1xf32>
    %234 = vector.broadcast %233 : vector<4x1xf32> to vector<4x256xf32>
    %235 = arith.mulf %234, %73 : vector<4x256xf32>
    %236 = arith.addf %232, %235 : vector<4x256xf32>
    %237 = vector.extract_strided_slice %219 {offsets = [0, 4], sizes = [4, 1], strides = [1, 1]} : vector<4x9xf32> to vector<4x1xf32>
    %238 = vector.broadcast %237 : vector<4x1xf32> to vector<4x256xf32>
    %239 = arith.mulf %238, %4 : vector<4x256xf32>
    %240 = arith.addf %236, %239 : vector<4x256xf32>
    %241 = vector.extract_strided_slice %219 {offsets = [0, 5], sizes = [4, 1], strides = [1, 1]} : vector<4x9xf32> to vector<4x1xf32>
    %242 = vector.broadcast %241 : vector<4x1xf32> to vector<4x256xf32>
    %243 = arith.mulf %242, %84 : vector<4x256xf32>
    %244 = arith.addf %240, %243 : vector<4x256xf32>
    %245 = vector.extract_strided_slice %219 {offsets = [0, 6], sizes = [4, 1], strides = [1, 1]} : vector<4x9xf32> to vector<4x1xf32>
    %246 = vector.broadcast %245 : vector<4x1xf32> to vector<4x256xf32>
    %247 = arith.mulf %246, %106 : vector<4x256xf32>
    %248 = arith.addf %244, %247 : vector<4x256xf32>
    %249 = vector.extract_strided_slice %219 {offsets = [0, 7], sizes = [4, 1], strides = [1, 1]} : vector<4x9xf32> to vector<4x1xf32>
    %250 = vector.broadcast %249 : vector<4x1xf32> to vector<4x256xf32>
    %251 = arith.mulf %250, %117 : vector<4x256xf32>
    %252 = arith.addf %248, %251 : vector<4x256xf32>
    %253 = vector.extract_strided_slice %219 {offsets = [0, 8], sizes = [4, 1], strides = [1, 1]} : vector<4x9xf32> to vector<4x1xf32>
    %254 = vector.broadcast %253 : vector<4x1xf32> to vector<4x256xf32>
    %255 = arith.mulf %254, %139 : vector<4x256xf32>
    %256 = arith.addf %252, %255 : vector<4x256xf32>
    %cst_22 = arith.constant 0.000000e+00 : f32
    %257 = vector.broadcast %cst_22 : f32 to vector<4x256xf32>
    %258 = vector.extract_strided_slice %6 {offsets = [0, 0], sizes = [1, 256], strides = [1, 1]} : vector<9x256xf32> to vector<1x256xf32>
    %c0_i32_23 = arith.constant 0 : i32
    %259 = vector.broadcast %c0_i32_23 : i32 to vector<1x256xi32>
    %260 = arith.cmpi eq, %1, %259 : vector<1x256xi32>
    %261 = vector.extract_strided_slice %178 {offsets = [0, 255], sizes = [4, 1], strides = [1, 1]} : vector<4x256xf32> to vector<4x1xf32>
    %262 = vector.extract_strided_slice %178 {offsets = [0, 0], sizes = [4, 255], strides = [1, 1]} : vector<4x256xf32> to vector<4x255xf32>
    %263 = tpu.concatenate %261, %262 in 1 : vector<4x1xf32>, vector<4x255xf32> -> vector<4x256xf32>
    %264 = vector.shape_cast %260 : vector<1x256xi1> to vector<1x256xi1>
    %265 = vector.broadcast %264 : vector<1x256xi1> to vector<4x256xi1>
    %266 = arith.select %265, %178, %263 : vector<4x256xi1>, vector<4x256xf32>
    %c0_i32_24 = arith.constant 0 : i32
    %267 = vector.broadcast %c0_i32_24 : i32 to vector<1x256xi32>
    %268 = arith.cmpi eq, %2, %267 : vector<1x256xi32>
    %269 = vector.extract_strided_slice %266 {offsets = [0, 240], sizes = [4, 16], strides = [1, 1]} : vector<4x256xf32> to vector<4x16xf32>
    %270 = vector.extract_strided_slice %266 {offsets = [0, 0], sizes = [4, 240], strides = [1, 1]} : vector<4x256xf32> to vector<4x240xf32>
    %271 = tpu.concatenate %269, %270 in 1 : vector<4x16xf32>, vector<4x240xf32> -> vector<4x256xf32>
    %272 = vector.shape_cast %268 : vector<1x256xi1> to vector<1x256xi1>
    %273 = vector.broadcast %272 : vector<1x256xi1> to vector<4x256xi1>
    %274 = arith.select %273, %266, %271 : vector<4x256xi1>, vector<4x256xf32>
    %275 = vector.broadcast %258 : vector<1x256xf32> to vector<4x256xf32>
    %276 = arith.mulf %275, %274 : vector<4x256xf32>
    %277 = arith.addf %257, %276 : vector<4x256xf32>
    %278 = vector.extract_strided_slice %6 {offsets = [1, 0], sizes = [1, 256], strides = [1, 1]} : vector<9x256xf32> to vector<1x256xf32>
    %c0_i32_25 = arith.constant 0 : i32
    %279 = vector.broadcast %c0_i32_25 : i32 to vector<1x256xi32>
    %280 = arith.cmpi eq, %2, %279 : vector<1x256xi32>
    %281 = vector.extract_strided_slice %178 {offsets = [0, 240], sizes = [4, 16], strides = [1, 1]} : vector<4x256xf32> to vector<4x16xf32>
    %282 = vector.extract_strided_slice %178 {offsets = [0, 0], sizes = [4, 240], strides = [1, 1]} : vector<4x256xf32> to vector<4x240xf32>
    %283 = tpu.concatenate %281, %282 in 1 : vector<4x16xf32>, vector<4x240xf32> -> vector<4x256xf32>
    %284 = vector.shape_cast %280 : vector<1x256xi1> to vector<1x256xi1>
    %285 = vector.broadcast %284 : vector<1x256xi1> to vector<4x256xi1>
    %286 = arith.select %285, %178, %283 : vector<4x256xi1>, vector<4x256xf32>
    %287 = vector.broadcast %278 : vector<1x256xf32> to vector<4x256xf32>
    %288 = arith.mulf %287, %286 : vector<4x256xf32>
    %289 = arith.addf %277, %288 : vector<4x256xf32>
    %290 = vector.extract_strided_slice %6 {offsets = [2, 0], sizes = [1, 256], strides = [1, 1]} : vector<9x256xf32> to vector<1x256xf32>
    %c15_i32_26 = arith.constant 15 : i32
    %291 = vector.broadcast %c15_i32_26 : i32 to vector<1x256xi32>
    %292 = arith.cmpi eq, %1, %291 : vector<1x256xi32>
    %293 = vector.extract_strided_slice %178 {offsets = [0, 1], sizes = [4, 255], strides = [1, 1]} : vector<4x256xf32> to vector<4x255xf32>
    %294 = vector.extract_strided_slice %178 {offsets = [0, 0], sizes = [4, 1], strides = [1, 1]} : vector<4x256xf32> to vector<4x1xf32>
    %295 = tpu.concatenate %293, %294 in 1 : vector<4x255xf32>, vector<4x1xf32> -> vector<4x256xf32>
    %296 = vector.shape_cast %292 : vector<1x256xi1> to vector<1x256xi1>
    %297 = vector.broadcast %296 : vector<1x256xi1> to vector<4x256xi1>
    %298 = arith.select %297, %178, %295 : vector<4x256xi1>, vector<4x256xf32>
    %c0_i32_27 = arith.constant 0 : i32
    %299 = vector.broadcast %c0_i32_27 : i32 to vector<1x256xi32>
    %300 = arith.cmpi eq, %2, %299 : vector<1x256xi32>
    %301 = vector.extract_strided_slice %298 {offsets = [0, 240], sizes = [4, 16], strides = [1, 1]} : vector<4x256xf32> to vector<4x16xf32>
    %302 = vector.extract_strided_slice %298 {offsets = [0, 0], sizes = [4, 240], strides = [1, 1]} : vector<4x256xf32> to vector<4x240xf32>
    %303 = tpu.concatenate %301, %302 in 1 : vector<4x16xf32>, vector<4x240xf32> -> vector<4x256xf32>
    %304 = vector.shape_cast %300 : vector<1x256xi1> to vector<1x256xi1>
    %305 = vector.broadcast %304 : vector<1x256xi1> to vector<4x256xi1>
    %306 = arith.select %305, %298, %303 : vector<4x256xi1>, vector<4x256xf32>
    %307 = vector.broadcast %290 : vector<1x256xf32> to vector<4x256xf32>
    %308 = arith.mulf %307, %306 : vector<4x256xf32>
    %309 = arith.addf %289, %308 : vector<4x256xf32>
    %310 = vector.extract_strided_slice %6 {offsets = [3, 0], sizes = [1, 256], strides = [1, 1]} : vector<9x256xf32> to vector<1x256xf32>
    %c0_i32_28 = arith.constant 0 : i32
    %311 = vector.broadcast %c0_i32_28 : i32 to vector<1x256xi32>
    %312 = arith.cmpi eq, %1, %311 : vector<1x256xi32>
    %313 = vector.extract_strided_slice %178 {offsets = [0, 255], sizes = [4, 1], strides = [1, 1]} : vector<4x256xf32> to vector<4x1xf32>
    %314 = vector.extract_strided_slice %178 {offsets = [0, 0], sizes = [4, 255], strides = [1, 1]} : vector<4x256xf32> to vector<4x255xf32>
    %315 = tpu.concatenate %313, %314 in 1 : vector<4x1xf32>, vector<4x255xf32> -> vector<4x256xf32>
    %316 = vector.shape_cast %312 : vector<1x256xi1> to vector<1x256xi1>
    %317 = vector.broadcast %316 : vector<1x256xi1> to vector<4x256xi1>
    %318 = arith.select %317, %178, %315 : vector<4x256xi1>, vector<4x256xf32>
    %319 = vector.broadcast %310 : vector<1x256xf32> to vector<4x256xf32>
    %320 = arith.mulf %319, %318 : vector<4x256xf32>
    %321 = arith.addf %309, %320 : vector<4x256xf32>
    %322 = vector.extract_strided_slice %6 {offsets = [4, 0], sizes = [1, 256], strides = [1, 1]} : vector<9x256xf32> to vector<1x256xf32>
    %323 = vector.broadcast %322 : vector<1x256xf32> to vector<4x256xf32>
    %324 = arith.mulf %323, %178 : vector<4x256xf32>
    %325 = arith.addf %321, %324 : vector<4x256xf32>
    %326 = vector.extract_strided_slice %6 {offsets = [5, 0], sizes = [1, 256], strides = [1, 1]} : vector<9x256xf32> to vector<1x256xf32>
    %c15_i32_29 = arith.constant 15 : i32
    %327 = vector.broadcast %c15_i32_29 : i32 to vector<1x256xi32>
    %328 = arith.cmpi eq, %1, %327 : vector<1x256xi32>
    %329 = vector.extract_strided_slice %178 {offsets = [0, 1], sizes = [4, 255], strides = [1, 1]} : vector<4x256xf32> to vector<4x255xf32>
    %330 = vector.extract_strided_slice %178 {offsets = [0, 0], sizes = [4, 1], strides = [1, 1]} : vector<4x256xf32> to vector<4x1xf32>
    %331 = tpu.concatenate %329, %330 in 1 : vector<4x255xf32>, vector<4x1xf32> -> vector<4x256xf32>
    %332 = vector.shape_cast %328 : vector<1x256xi1> to vector<1x256xi1>
    %333 = vector.broadcast %332 : vector<1x256xi1> to vector<4x256xi1>
    %334 = arith.select %333, %178, %331 : vector<4x256xi1>, vector<4x256xf32>
    %335 = vector.broadcast %326 : vector<1x256xf32> to vector<4x256xf32>
    %336 = arith.mulf %335, %334 : vector<4x256xf32>
    %337 = arith.addf %325, %336 : vector<4x256xf32>
    %338 = vector.extract_strided_slice %6 {offsets = [6, 0], sizes = [1, 256], strides = [1, 1]} : vector<9x256xf32> to vector<1x256xf32>
    %c0_i32_30 = arith.constant 0 : i32
    %339 = vector.broadcast %c0_i32_30 : i32 to vector<1x256xi32>
    %340 = arith.cmpi eq, %1, %339 : vector<1x256xi32>
    %341 = vector.extract_strided_slice %178 {offsets = [0, 255], sizes = [4, 1], strides = [1, 1]} : vector<4x256xf32> to vector<4x1xf32>
    %342 = vector.extract_strided_slice %178 {offsets = [0, 0], sizes = [4, 255], strides = [1, 1]} : vector<4x256xf32> to vector<4x255xf32>
    %343 = tpu.concatenate %341, %342 in 1 : vector<4x1xf32>, vector<4x255xf32> -> vector<4x256xf32>
    %344 = vector.shape_cast %340 : vector<1x256xi1> to vector<1x256xi1>
    %345 = vector.broadcast %344 : vector<1x256xi1> to vector<4x256xi1>
    %346 = arith.select %345, %178, %343 : vector<4x256xi1>, vector<4x256xf32>
    %c15_i32_31 = arith.constant 15 : i32
    %347 = vector.broadcast %c15_i32_31 : i32 to vector<1x256xi32>
    %348 = arith.cmpi eq, %2, %347 : vector<1x256xi32>
    %349 = vector.extract_strided_slice %346 {offsets = [0, 16], sizes = [4, 240], strides = [1, 1]} : vector<4x256xf32> to vector<4x240xf32>
    %350 = vector.extract_strided_slice %346 {offsets = [0, 0], sizes = [4, 16], strides = [1, 1]} : vector<4x256xf32> to vector<4x16xf32>
    %351 = tpu.concatenate %349, %350 in 1 : vector<4x240xf32>, vector<4x16xf32> -> vector<4x256xf32>
    %352 = vector.shape_cast %348 : vector<1x256xi1> to vector<1x256xi1>
    %353 = vector.broadcast %352 : vector<1x256xi1> to vector<4x256xi1>
    %354 = arith.select %353, %346, %351 : vector<4x256xi1>, vector<4x256xf32>
    %355 = vector.broadcast %338 : vector<1x256xf32> to vector<4x256xf32>
    %356 = arith.mulf %355, %354 : vector<4x256xf32>
    %357 = arith.addf %337, %356 : vector<4x256xf32>
    %358 = vector.extract_strided_slice %6 {offsets = [7, 0], sizes = [1, 256], strides = [1, 1]} : vector<9x256xf32> to vector<1x256xf32>
    %c15_i32_32 = arith.constant 15 : i32
    %359 = vector.broadcast %c15_i32_32 : i32 to vector<1x256xi32>
    %360 = arith.cmpi eq, %2, %359 : vector<1x256xi32>
    %361 = vector.extract_strided_slice %178 {offsets = [0, 16], sizes = [4, 240], strides = [1, 1]} : vector<4x256xf32> to vector<4x240xf32>
    %362 = vector.extract_strided_slice %178 {offsets = [0, 0], sizes = [4, 16], strides = [1, 1]} : vector<4x256xf32> to vector<4x16xf32>
    %363 = tpu.concatenate %361, %362 in 1 : vector<4x240xf32>, vector<4x16xf32> -> vector<4x256xf32>
    %364 = vector.shape_cast %360 : vector<1x256xi1> to vector<1x256xi1>
    %365 = vector.broadcast %364 : vector<1x256xi1> to vector<4x256xi1>
    %366 = arith.select %365, %178, %363 : vector<4x256xi1>, vector<4x256xf32>
    %367 = vector.broadcast %358 : vector<1x256xf32> to vector<4x256xf32>
    %368 = arith.mulf %367, %366 : vector<4x256xf32>
    %369 = arith.addf %357, %368 : vector<4x256xf32>
    %370 = vector.extract_strided_slice %6 {offsets = [8, 0], sizes = [1, 256], strides = [1, 1]} : vector<9x256xf32> to vector<1x256xf32>
    %c15_i32_33 = arith.constant 15 : i32
    %371 = vector.broadcast %c15_i32_33 : i32 to vector<1x256xi32>
    %372 = arith.cmpi eq, %1, %371 : vector<1x256xi32>
    %373 = vector.extract_strided_slice %178 {offsets = [0, 1], sizes = [4, 255], strides = [1, 1]} : vector<4x256xf32> to vector<4x255xf32>
    %374 = vector.extract_strided_slice %178 {offsets = [0, 0], sizes = [4, 1], strides = [1, 1]} : vector<4x256xf32> to vector<4x1xf32>
    %375 = tpu.concatenate %373, %374 in 1 : vector<4x255xf32>, vector<4x1xf32> -> vector<4x256xf32>
    %376 = vector.shape_cast %372 : vector<1x256xi1> to vector<1x256xi1>
    %377 = vector.broadcast %376 : vector<1x256xi1> to vector<4x256xi1>
    %378 = arith.select %377, %178, %375 : vector<4x256xi1>, vector<4x256xf32>
    %c15_i32_34 = arith.constant 15 : i32
    %379 = vector.broadcast %c15_i32_34 : i32 to vector<1x256xi32>
    %380 = arith.cmpi eq, %2, %379 : vector<1x256xi32>
    %381 = vector.extract_strided_slice %378 {offsets = [0, 16], sizes = [4, 240], strides = [1, 1]} : vector<4x256xf32> to vector<4x240xf32>
    %382 = vector.extract_strided_slice %378 {offsets = [0, 0], sizes = [4, 16], strides = [1, 1]} : vector<4x256xf32> to vector<4x16xf32>
    %383 = tpu.concatenate %381, %382 in 1 : vector<4x240xf32>, vector<4x16xf32> -> vector<4x256xf32>
    %384 = vector.shape_cast %380 : vector<1x256xi1> to vector<1x256xi1>
    %385 = vector.broadcast %384 : vector<1x256xi1> to vector<4x256xi1>
    %386 = arith.select %385, %378, %383 : vector<4x256xi1>, vector<4x256xf32>
    %387 = vector.broadcast %370 : vector<1x256xf32> to vector<4x256xf32>
    %388 = arith.mulf %387, %386 : vector<4x256xf32>
    %389 = arith.addf %369, %388 : vector<4x256xf32>
    %390 = arith.subf %178, %389 : vector<4x256xf32>
    %cst_35 = arith.constant 0.000000e+00 : f32
    %391 = vector.broadcast %cst_35 : f32 to vector<4x256xf32>
    %392 = vector.extract_strided_slice %6 {offsets = [0, 0], sizes = [1, 256], strides = [1, 1]} : vector<9x256xf32> to vector<1x256xf32>
    %c0_i32_36 = arith.constant 0 : i32
    %393 = vector.broadcast %c0_i32_36 : i32 to vector<1x256xi32>
    %394 = arith.cmpi eq, %1, %393 : vector<1x256xi32>
    %395 = vector.extract_strided_slice %217 {offsets = [0, 255], sizes = [4, 1], strides = [1, 1]} : vector<4x256xf32> to vector<4x1xf32>
    %396 = vector.extract_strided_slice %217 {offsets = [0, 0], sizes = [4, 255], strides = [1, 1]} : vector<4x256xf32> to vector<4x255xf32>
    %397 = tpu.concatenate %395, %396 in 1 : vector<4x1xf32>, vector<4x255xf32> -> vector<4x256xf32>
    %398 = vector.shape_cast %394 : vector<1x256xi1> to vector<1x256xi1>
    %399 = vector.broadcast %398 : vector<1x256xi1> to vector<4x256xi1>
    %400 = arith.select %399, %217, %397 : vector<4x256xi1>, vector<4x256xf32>
    %c0_i32_37 = arith.constant 0 : i32
    %401 = vector.broadcast %c0_i32_37 : i32 to vector<1x256xi32>
    %402 = arith.cmpi eq, %2, %401 : vector<1x256xi32>
    %403 = vector.extract_strided_slice %400 {offsets = [0, 240], sizes = [4, 16], strides = [1, 1]} : vector<4x256xf32> to vector<4x16xf32>
    %404 = vector.extract_strided_slice %400 {offsets = [0, 0], sizes = [4, 240], strides = [1, 1]} : vector<4x256xf32> to vector<4x240xf32>
    %405 = tpu.concatenate %403, %404 in 1 : vector<4x16xf32>, vector<4x240xf32> -> vector<4x256xf32>
    %406 = vector.shape_cast %402 : vector<1x256xi1> to vector<1x256xi1>
    %407 = vector.broadcast %406 : vector<1x256xi1> to vector<4x256xi1>
    %408 = arith.select %407, %400, %405 : vector<4x256xi1>, vector<4x256xf32>
    %409 = vector.broadcast %392 : vector<1x256xf32> to vector<4x256xf32>
    %410 = arith.mulf %409, %408 : vector<4x256xf32>
    %411 = arith.addf %391, %410 : vector<4x256xf32>
    %412 = vector.extract_strided_slice %6 {offsets = [1, 0], sizes = [1, 256], strides = [1, 1]} : vector<9x256xf32> to vector<1x256xf32>
    %c0_i32_38 = arith.constant 0 : i32
    %413 = vector.broadcast %c0_i32_38 : i32 to vector<1x256xi32>
    %414 = arith.cmpi eq, %2, %413 : vector<1x256xi32>
    %415 = vector.extract_strided_slice %217 {offsets = [0, 240], sizes = [4, 16], strides = [1, 1]} : vector<4x256xf32> to vector<4x16xf32>
    %416 = vector.extract_strided_slice %217 {offsets = [0, 0], sizes = [4, 240], strides = [1, 1]} : vector<4x256xf32> to vector<4x240xf32>
    %417 = tpu.concatenate %415, %416 in 1 : vector<4x16xf32>, vector<4x240xf32> -> vector<4x256xf32>
    %418 = vector.shape_cast %414 : vector<1x256xi1> to vector<1x256xi1>
    %419 = vector.broadcast %418 : vector<1x256xi1> to vector<4x256xi1>
    %420 = arith.select %419, %217, %417 : vector<4x256xi1>, vector<4x256xf32>
    %421 = vector.broadcast %412 : vector<1x256xf32> to vector<4x256xf32>
    %422 = arith.mulf %421, %420 : vector<4x256xf32>
    %423 = arith.addf %411, %422 : vector<4x256xf32>
    %424 = vector.extract_strided_slice %6 {offsets = [2, 0], sizes = [1, 256], strides = [1, 1]} : vector<9x256xf32> to vector<1x256xf32>
    %c15_i32_39 = arith.constant 15 : i32
    %425 = vector.broadcast %c15_i32_39 : i32 to vector<1x256xi32>
    %426 = arith.cmpi eq, %1, %425 : vector<1x256xi32>
    %427 = vector.extract_strided_slice %217 {offsets = [0, 1], sizes = [4, 255], strides = [1, 1]} : vector<4x256xf32> to vector<4x255xf32>
    %428 = vector.extract_strided_slice %217 {offsets = [0, 0], sizes = [4, 1], strides = [1, 1]} : vector<4x256xf32> to vector<4x1xf32>
    %429 = tpu.concatenate %427, %428 in 1 : vector<4x255xf32>, vector<4x1xf32> -> vector<4x256xf32>
    %430 = vector.shape_cast %426 : vector<1x256xi1> to vector<1x256xi1>
    %431 = vector.broadcast %430 : vector<1x256xi1> to vector<4x256xi1>
    %432 = arith.select %431, %217, %429 : vector<4x256xi1>, vector<4x256xf32>
    %c0_i32_40 = arith.constant 0 : i32
    %433 = vector.broadcast %c0_i32_40 : i32 to vector<1x256xi32>
    %434 = arith.cmpi eq, %2, %433 : vector<1x256xi32>
    %435 = vector.extract_strided_slice %432 {offsets = [0, 240], sizes = [4, 16], strides = [1, 1]} : vector<4x256xf32> to vector<4x16xf32>
    %436 = vector.extract_strided_slice %432 {offsets = [0, 0], sizes = [4, 240], strides = [1, 1]} : vector<4x256xf32> to vector<4x240xf32>
    %437 = tpu.concatenate %435, %436 in 1 : vector<4x16xf32>, vector<4x240xf32> -> vector<4x256xf32>
    %438 = vector.shape_cast %434 : vector<1x256xi1> to vector<1x256xi1>
    %439 = vector.broadcast %438 : vector<1x256xi1> to vector<4x256xi1>
    %440 = arith.select %439, %432, %437 : vector<4x256xi1>, vector<4x256xf32>
    %441 = vector.broadcast %424 : vector<1x256xf32> to vector<4x256xf32>
    %442 = arith.mulf %441, %440 : vector<4x256xf32>
    %443 = arith.addf %423, %442 : vector<4x256xf32>
    %444 = vector.extract_strided_slice %6 {offsets = [3, 0], sizes = [1, 256], strides = [1, 1]} : vector<9x256xf32> to vector<1x256xf32>
    %c0_i32_41 = arith.constant 0 : i32
    %445 = vector.broadcast %c0_i32_41 : i32 to vector<1x256xi32>
    %446 = arith.cmpi eq, %1, %445 : vector<1x256xi32>
    %447 = vector.extract_strided_slice %217 {offsets = [0, 255], sizes = [4, 1], strides = [1, 1]} : vector<4x256xf32> to vector<4x1xf32>
    %448 = vector.extract_strided_slice %217 {offsets = [0, 0], sizes = [4, 255], strides = [1, 1]} : vector<4x256xf32> to vector<4x255xf32>
    %449 = tpu.concatenate %447, %448 in 1 : vector<4x1xf32>, vector<4x255xf32> -> vector<4x256xf32>
    %450 = vector.shape_cast %446 : vector<1x256xi1> to vector<1x256xi1>
    %451 = vector.broadcast %450 : vector<1x256xi1> to vector<4x256xi1>
    %452 = arith.select %451, %217, %449 : vector<4x256xi1>, vector<4x256xf32>
    %453 = vector.broadcast %444 : vector<1x256xf32> to vector<4x256xf32>
    %454 = arith.mulf %453, %452 : vector<4x256xf32>
    %455 = arith.addf %443, %454 : vector<4x256xf32>
    %456 = vector.extract_strided_slice %6 {offsets = [4, 0], sizes = [1, 256], strides = [1, 1]} : vector<9x256xf32> to vector<1x256xf32>
    %457 = vector.broadcast %456 : vector<1x256xf32> to vector<4x256xf32>
    %458 = arith.mulf %457, %217 : vector<4x256xf32>
    %459 = arith.addf %455, %458 : vector<4x256xf32>
    %460 = vector.extract_strided_slice %6 {offsets = [5, 0], sizes = [1, 256], strides = [1, 1]} : vector<9x256xf32> to vector<1x256xf32>
    %c15_i32_42 = arith.constant 15 : i32
    %461 = vector.broadcast %c15_i32_42 : i32 to vector<1x256xi32>
    %462 = arith.cmpi eq, %1, %461 : vector<1x256xi32>
    %463 = vector.extract_strided_slice %217 {offsets = [0, 1], sizes = [4, 255], strides = [1, 1]} : vector<4x256xf32> to vector<4x255xf32>
    %464 = vector.extract_strided_slice %217 {offsets = [0, 0], sizes = [4, 1], strides = [1, 1]} : vector<4x256xf32> to vector<4x1xf32>
    %465 = tpu.concatenate %463, %464 in 1 : vector<4x255xf32>, vector<4x1xf32> -> vector<4x256xf32>
    %466 = vector.shape_cast %462 : vector<1x256xi1> to vector<1x256xi1>
    %467 = vector.broadcast %466 : vector<1x256xi1> to vector<4x256xi1>
    %468 = arith.select %467, %217, %465 : vector<4x256xi1>, vector<4x256xf32>
    %469 = vector.broadcast %460 : vector<1x256xf32> to vector<4x256xf32>
    %470 = arith.mulf %469, %468 : vector<4x256xf32>
    %471 = arith.addf %459, %470 : vector<4x256xf32>
    %472 = vector.extract_strided_slice %6 {offsets = [6, 0], sizes = [1, 256], strides = [1, 1]} : vector<9x256xf32> to vector<1x256xf32>
    %c0_i32_43 = arith.constant 0 : i32
    %473 = vector.broadcast %c0_i32_43 : i32 to vector<1x256xi32>
    %474 = arith.cmpi eq, %1, %473 : vector<1x256xi32>
    %475 = vector.extract_strided_slice %217 {offsets = [0, 255], sizes = [4, 1], strides = [1, 1]} : vector<4x256xf32> to vector<4x1xf32>
    %476 = vector.extract_strided_slice %217 {offsets = [0, 0], sizes = [4, 255], strides = [1, 1]} : vector<4x256xf32> to vector<4x255xf32>
    %477 = tpu.concatenate %475, %476 in 1 : vector<4x1xf32>, vector<4x255xf32> -> vector<4x256xf32>
    %478 = vector.shape_cast %474 : vector<1x256xi1> to vector<1x256xi1>
    %479 = vector.broadcast %478 : vector<1x256xi1> to vector<4x256xi1>
    %480 = arith.select %479, %217, %477 : vector<4x256xi1>, vector<4x256xf32>
    %c15_i32_44 = arith.constant 15 : i32
    %481 = vector.broadcast %c15_i32_44 : i32 to vector<1x256xi32>
    %482 = arith.cmpi eq, %2, %481 : vector<1x256xi32>
    %483 = vector.extract_strided_slice %480 {offsets = [0, 16], sizes = [4, 240], strides = [1, 1]} : vector<4x256xf32> to vector<4x240xf32>
    %484 = vector.extract_strided_slice %480 {offsets = [0, 0], sizes = [4, 16], strides = [1, 1]} : vector<4x256xf32> to vector<4x16xf32>
    %485 = tpu.concatenate %483, %484 in 1 : vector<4x240xf32>, vector<4x16xf32> -> vector<4x256xf32>
    %486 = vector.shape_cast %482 : vector<1x256xi1> to vector<1x256xi1>
    %487 = vector.broadcast %486 : vector<1x256xi1> to vector<4x256xi1>
    %488 = arith.select %487, %480, %485 : vector<4x256xi1>, vector<4x256xf32>
    %489 = vector.broadcast %472 : vector<1x256xf32> to vector<4x256xf32>
    %490 = arith.mulf %489, %488 : vector<4x256xf32>
    %491 = arith.addf %471, %490 : vector<4x256xf32>
    %492 = vector.extract_strided_slice %6 {offsets = [7, 0], sizes = [1, 256], strides = [1, 1]} : vector<9x256xf32> to vector<1x256xf32>
    %c15_i32_45 = arith.constant 15 : i32
    %493 = vector.broadcast %c15_i32_45 : i32 to vector<1x256xi32>
    %494 = arith.cmpi eq, %2, %493 : vector<1x256xi32>
    %495 = vector.extract_strided_slice %217 {offsets = [0, 16], sizes = [4, 240], strides = [1, 1]} : vector<4x256xf32> to vector<4x240xf32>
    %496 = vector.extract_strided_slice %217 {offsets = [0, 0], sizes = [4, 16], strides = [1, 1]} : vector<4x256xf32> to vector<4x16xf32>
    %497 = tpu.concatenate %495, %496 in 1 : vector<4x240xf32>, vector<4x16xf32> -> vector<4x256xf32>
    %498 = vector.shape_cast %494 : vector<1x256xi1> to vector<1x256xi1>
    %499 = vector.broadcast %498 : vector<1x256xi1> to vector<4x256xi1>
    %500 = arith.select %499, %217, %497 : vector<4x256xi1>, vector<4x256xf32>
    %501 = vector.broadcast %492 : vector<1x256xf32> to vector<4x256xf32>
    %502 = arith.mulf %501, %500 : vector<4x256xf32>
    %503 = arith.addf %491, %502 : vector<4x256xf32>
    %504 = vector.extract_strided_slice %6 {offsets = [8, 0], sizes = [1, 256], strides = [1, 1]} : vector<9x256xf32> to vector<1x256xf32>
    %c15_i32_46 = arith.constant 15 : i32
    %505 = vector.broadcast %c15_i32_46 : i32 to vector<1x256xi32>
    %506 = arith.cmpi eq, %1, %505 : vector<1x256xi32>
    %507 = vector.extract_strided_slice %217 {offsets = [0, 1], sizes = [4, 255], strides = [1, 1]} : vector<4x256xf32> to vector<4x255xf32>
    %508 = vector.extract_strided_slice %217 {offsets = [0, 0], sizes = [4, 1], strides = [1, 1]} : vector<4x256xf32> to vector<4x1xf32>
    %509 = tpu.concatenate %507, %508 in 1 : vector<4x255xf32>, vector<4x1xf32> -> vector<4x256xf32>
    %510 = vector.shape_cast %506 : vector<1x256xi1> to vector<1x256xi1>
    %511 = vector.broadcast %510 : vector<1x256xi1> to vector<4x256xi1>
    %512 = arith.select %511, %217, %509 : vector<4x256xi1>, vector<4x256xf32>
    %c15_i32_47 = arith.constant 15 : i32
    %513 = vector.broadcast %c15_i32_47 : i32 to vector<1x256xi32>
    %514 = arith.cmpi eq, %2, %513 : vector<1x256xi32>
    %515 = vector.extract_strided_slice %512 {offsets = [0, 16], sizes = [4, 240], strides = [1, 1]} : vector<4x256xf32> to vector<4x240xf32>
    %516 = vector.extract_strided_slice %512 {offsets = [0, 0], sizes = [4, 16], strides = [1, 1]} : vector<4x256xf32> to vector<4x16xf32>
    %517 = tpu.concatenate %515, %516 in 1 : vector<4x240xf32>, vector<4x16xf32> -> vector<4x256xf32>
    %518 = vector.shape_cast %514 : vector<1x256xi1> to vector<1x256xi1>
    %519 = vector.broadcast %518 : vector<1x256xi1> to vector<4x256xi1>
    %520 = arith.select %519, %512, %517 : vector<4x256xi1>, vector<4x256xf32>
    %521 = vector.broadcast %504 : vector<1x256xf32> to vector<4x256xf32>
    %522 = arith.mulf %521, %520 : vector<4x256xf32>
    %523 = arith.addf %503, %522 : vector<4x256xf32>
    %524 = arith.subf %217, %523 : vector<4x256xf32>
    %cst_48 = arith.constant 0.000000e+00 : f32
    %525 = vector.broadcast %cst_48 : f32 to vector<4x256xf32>
    %526 = vector.extract_strided_slice %6 {offsets = [0, 0], sizes = [1, 256], strides = [1, 1]} : vector<9x256xf32> to vector<1x256xf32>
    %c0_i32_49 = arith.constant 0 : i32
    %527 = vector.broadcast %c0_i32_49 : i32 to vector<1x256xi32>
    %528 = arith.cmpi eq, %1, %527 : vector<1x256xi32>
    %529 = vector.extract_strided_slice %256 {offsets = [0, 255], sizes = [4, 1], strides = [1, 1]} : vector<4x256xf32> to vector<4x1xf32>
    %530 = vector.extract_strided_slice %256 {offsets = [0, 0], sizes = [4, 255], strides = [1, 1]} : vector<4x256xf32> to vector<4x255xf32>
    %531 = tpu.concatenate %529, %530 in 1 : vector<4x1xf32>, vector<4x255xf32> -> vector<4x256xf32>
    %532 = vector.shape_cast %528 : vector<1x256xi1> to vector<1x256xi1>
    %533 = vector.broadcast %532 : vector<1x256xi1> to vector<4x256xi1>
    %534 = arith.select %533, %256, %531 : vector<4x256xi1>, vector<4x256xf32>
    %c0_i32_50 = arith.constant 0 : i32
    %535 = vector.broadcast %c0_i32_50 : i32 to vector<1x256xi32>
    %536 = arith.cmpi eq, %2, %535 : vector<1x256xi32>
    %537 = vector.extract_strided_slice %534 {offsets = [0, 240], sizes = [4, 16], strides = [1, 1]} : vector<4x256xf32> to vector<4x16xf32>
    %538 = vector.extract_strided_slice %534 {offsets = [0, 0], sizes = [4, 240], strides = [1, 1]} : vector<4x256xf32> to vector<4x240xf32>
    %539 = tpu.concatenate %537, %538 in 1 : vector<4x16xf32>, vector<4x240xf32> -> vector<4x256xf32>
    %540 = vector.shape_cast %536 : vector<1x256xi1> to vector<1x256xi1>
    %541 = vector.broadcast %540 : vector<1x256xi1> to vector<4x256xi1>
    %542 = arith.select %541, %534, %539 : vector<4x256xi1>, vector<4x256xf32>
    %543 = vector.broadcast %526 : vector<1x256xf32> to vector<4x256xf32>
    %544 = arith.mulf %543, %542 : vector<4x256xf32>
    %545 = arith.addf %525, %544 : vector<4x256xf32>
    %546 = vector.extract_strided_slice %6 {offsets = [1, 0], sizes = [1, 256], strides = [1, 1]} : vector<9x256xf32> to vector<1x256xf32>
    %c0_i32_51 = arith.constant 0 : i32
    %547 = vector.broadcast %c0_i32_51 : i32 to vector<1x256xi32>
    %548 = arith.cmpi eq, %2, %547 : vector<1x256xi32>
    %549 = vector.extract_strided_slice %256 {offsets = [0, 240], sizes = [4, 16], strides = [1, 1]} : vector<4x256xf32> to vector<4x16xf32>
    %550 = vector.extract_strided_slice %256 {offsets = [0, 0], sizes = [4, 240], strides = [1, 1]} : vector<4x256xf32> to vector<4x240xf32>
    %551 = tpu.concatenate %549, %550 in 1 : vector<4x16xf32>, vector<4x240xf32> -> vector<4x256xf32>
    %552 = vector.shape_cast %548 : vector<1x256xi1> to vector<1x256xi1>
    %553 = vector.broadcast %552 : vector<1x256xi1> to vector<4x256xi1>
    %554 = arith.select %553, %256, %551 : vector<4x256xi1>, vector<4x256xf32>
    %555 = vector.broadcast %546 : vector<1x256xf32> to vector<4x256xf32>
    %556 = arith.mulf %555, %554 : vector<4x256xf32>
    %557 = arith.addf %545, %556 : vector<4x256xf32>
    %558 = vector.extract_strided_slice %6 {offsets = [2, 0], sizes = [1, 256], strides = [1, 1]} : vector<9x256xf32> to vector<1x256xf32>
    %c15_i32_52 = arith.constant 15 : i32
    %559 = vector.broadcast %c15_i32_52 : i32 to vector<1x256xi32>
    %560 = arith.cmpi eq, %1, %559 : vector<1x256xi32>
    %561 = vector.extract_strided_slice %256 {offsets = [0, 1], sizes = [4, 255], strides = [1, 1]} : vector<4x256xf32> to vector<4x255xf32>
    %562 = vector.extract_strided_slice %256 {offsets = [0, 0], sizes = [4, 1], strides = [1, 1]} : vector<4x256xf32> to vector<4x1xf32>
    %563 = tpu.concatenate %561, %562 in 1 : vector<4x255xf32>, vector<4x1xf32> -> vector<4x256xf32>
    %564 = vector.shape_cast %560 : vector<1x256xi1> to vector<1x256xi1>
    %565 = vector.broadcast %564 : vector<1x256xi1> to vector<4x256xi1>
    %566 = arith.select %565, %256, %563 : vector<4x256xi1>, vector<4x256xf32>
    %c0_i32_53 = arith.constant 0 : i32
    %567 = vector.broadcast %c0_i32_53 : i32 to vector<1x256xi32>
    %568 = arith.cmpi eq, %2, %567 : vector<1x256xi32>
    %569 = vector.extract_strided_slice %566 {offsets = [0, 240], sizes = [4, 16], strides = [1, 1]} : vector<4x256xf32> to vector<4x16xf32>
    %570 = vector.extract_strided_slice %566 {offsets = [0, 0], sizes = [4, 240], strides = [1, 1]} : vector<4x256xf32> to vector<4x240xf32>
    %571 = tpu.concatenate %569, %570 in 1 : vector<4x16xf32>, vector<4x240xf32> -> vector<4x256xf32>
    %572 = vector.shape_cast %568 : vector<1x256xi1> to vector<1x256xi1>
    %573 = vector.broadcast %572 : vector<1x256xi1> to vector<4x256xi1>
    %574 = arith.select %573, %566, %571 : vector<4x256xi1>, vector<4x256xf32>
    %575 = vector.broadcast %558 : vector<1x256xf32> to vector<4x256xf32>
    %576 = arith.mulf %575, %574 : vector<4x256xf32>
    %577 = arith.addf %557, %576 : vector<4x256xf32>
    %578 = vector.extract_strided_slice %6 {offsets = [3, 0], sizes = [1, 256], strides = [1, 1]} : vector<9x256xf32> to vector<1x256xf32>
    %c0_i32_54 = arith.constant 0 : i32
    %579 = vector.broadcast %c0_i32_54 : i32 to vector<1x256xi32>
    %580 = arith.cmpi eq, %1, %579 : vector<1x256xi32>
    %581 = vector.extract_strided_slice %256 {offsets = [0, 255], sizes = [4, 1], strides = [1, 1]} : vector<4x256xf32> to vector<4x1xf32>
    %582 = vector.extract_strided_slice %256 {offsets = [0, 0], sizes = [4, 255], strides = [1, 1]} : vector<4x256xf32> to vector<4x255xf32>
    %583 = tpu.concatenate %581, %582 in 1 : vector<4x1xf32>, vector<4x255xf32> -> vector<4x256xf32>
    %584 = vector.shape_cast %580 : vector<1x256xi1> to vector<1x256xi1>
    %585 = vector.broadcast %584 : vector<1x256xi1> to vector<4x256xi1>
    %586 = arith.select %585, %256, %583 : vector<4x256xi1>, vector<4x256xf32>
    %587 = vector.broadcast %578 : vector<1x256xf32> to vector<4x256xf32>
    %588 = arith.mulf %587, %586 : vector<4x256xf32>
    %589 = arith.addf %577, %588 : vector<4x256xf32>
    %590 = vector.extract_strided_slice %6 {offsets = [4, 0], sizes = [1, 256], strides = [1, 1]} : vector<9x256xf32> to vector<1x256xf32>
    %591 = vector.broadcast %590 : vector<1x256xf32> to vector<4x256xf32>
    %592 = arith.mulf %591, %256 : vector<4x256xf32>
    %593 = arith.addf %589, %592 : vector<4x256xf32>
    %594 = vector.extract_strided_slice %6 {offsets = [5, 0], sizes = [1, 256], strides = [1, 1]} : vector<9x256xf32> to vector<1x256xf32>
    %c15_i32_55 = arith.constant 15 : i32
    %595 = vector.broadcast %c15_i32_55 : i32 to vector<1x256xi32>
    %596 = arith.cmpi eq, %1, %595 : vector<1x256xi32>
    %597 = vector.extract_strided_slice %256 {offsets = [0, 1], sizes = [4, 255], strides = [1, 1]} : vector<4x256xf32> to vector<4x255xf32>
    %598 = vector.extract_strided_slice %256 {offsets = [0, 0], sizes = [4, 1], strides = [1, 1]} : vector<4x256xf32> to vector<4x1xf32>
    %599 = tpu.concatenate %597, %598 in 1 : vector<4x255xf32>, vector<4x1xf32> -> vector<4x256xf32>
    %600 = vector.shape_cast %596 : vector<1x256xi1> to vector<1x256xi1>
    %601 = vector.broadcast %600 : vector<1x256xi1> to vector<4x256xi1>
    %602 = arith.select %601, %256, %599 : vector<4x256xi1>, vector<4x256xf32>
    %603 = vector.broadcast %594 : vector<1x256xf32> to vector<4x256xf32>
    %604 = arith.mulf %603, %602 : vector<4x256xf32>
    %605 = arith.addf %593, %604 : vector<4x256xf32>
    %606 = vector.extract_strided_slice %6 {offsets = [6, 0], sizes = [1, 256], strides = [1, 1]} : vector<9x256xf32> to vector<1x256xf32>
    %c0_i32_56 = arith.constant 0 : i32
    %607 = vector.broadcast %c0_i32_56 : i32 to vector<1x256xi32>
    %608 = arith.cmpi eq, %1, %607 : vector<1x256xi32>
    %609 = vector.extract_strided_slice %256 {offsets = [0, 255], sizes = [4, 1], strides = [1, 1]} : vector<4x256xf32> to vector<4x1xf32>
    %610 = vector.extract_strided_slice %256 {offsets = [0, 0], sizes = [4, 255], strides = [1, 1]} : vector<4x256xf32> to vector<4x255xf32>
    %611 = tpu.concatenate %609, %610 in 1 : vector<4x1xf32>, vector<4x255xf32> -> vector<4x256xf32>
    %612 = vector.shape_cast %608 : vector<1x256xi1> to vector<1x256xi1>
    %613 = vector.broadcast %612 : vector<1x256xi1> to vector<4x256xi1>
    %614 = arith.select %613, %256, %611 : vector<4x256xi1>, vector<4x256xf32>
    %c15_i32_57 = arith.constant 15 : i32
    %615 = vector.broadcast %c15_i32_57 : i32 to vector<1x256xi32>
    %616 = arith.cmpi eq, %2, %615 : vector<1x256xi32>
    %617 = vector.extract_strided_slice %614 {offsets = [0, 16], sizes = [4, 240], strides = [1, 1]} : vector<4x256xf32> to vector<4x240xf32>
    %618 = vector.extract_strided_slice %614 {offsets = [0, 0], sizes = [4, 16], strides = [1, 1]} : vector<4x256xf32> to vector<4x16xf32>
    %619 = tpu.concatenate %617, %618 in 1 : vector<4x240xf32>, vector<4x16xf32> -> vector<4x256xf32>
    %620 = vector.shape_cast %616 : vector<1x256xi1> to vector<1x256xi1>
    %621 = vector.broadcast %620 : vector<1x256xi1> to vector<4x256xi1>
    %622 = arith.select %621, %614, %619 : vector<4x256xi1>, vector<4x256xf32>
    %623 = vector.broadcast %606 : vector<1x256xf32> to vector<4x256xf32>
    %624 = arith.mulf %623, %622 : vector<4x256xf32>
    %625 = arith.addf %605, %624 : vector<4x256xf32>
    %626 = vector.extract_strided_slice %6 {offsets = [7, 0], sizes = [1, 256], strides = [1, 1]} : vector<9x256xf32> to vector<1x256xf32>
    %c15_i32_58 = arith.constant 15 : i32
    %627 = vector.broadcast %c15_i32_58 : i32 to vector<1x256xi32>
    %628 = arith.cmpi eq, %2, %627 : vector<1x256xi32>
    %629 = vector.extract_strided_slice %256 {offsets = [0, 16], sizes = [4, 240], strides = [1, 1]} : vector<4x256xf32> to vector<4x240xf32>
    %630 = vector.extract_strided_slice %256 {offsets = [0, 0], sizes = [4, 16], strides = [1, 1]} : vector<4x256xf32> to vector<4x16xf32>
    %631 = tpu.concatenate %629, %630 in 1 : vector<4x240xf32>, vector<4x16xf32> -> vector<4x256xf32>
    %632 = vector.shape_cast %628 : vector<1x256xi1> to vector<1x256xi1>
    %633 = vector.broadcast %632 : vector<1x256xi1> to vector<4x256xi1>
    %634 = arith.select %633, %256, %631 : vector<4x256xi1>, vector<4x256xf32>
    %635 = vector.broadcast %626 : vector<1x256xf32> to vector<4x256xf32>
    %636 = arith.mulf %635, %634 : vector<4x256xf32>
    %637 = arith.addf %625, %636 : vector<4x256xf32>
    %638 = vector.extract_strided_slice %6 {offsets = [8, 0], sizes = [1, 256], strides = [1, 1]} : vector<9x256xf32> to vector<1x256xf32>
    %c15_i32_59 = arith.constant 15 : i32
    %639 = vector.broadcast %c15_i32_59 : i32 to vector<1x256xi32>
    %640 = arith.cmpi eq, %1, %639 : vector<1x256xi32>
    %641 = vector.extract_strided_slice %256 {offsets = [0, 1], sizes = [4, 255], strides = [1, 1]} : vector<4x256xf32> to vector<4x255xf32>
    %642 = vector.extract_strided_slice %256 {offsets = [0, 0], sizes = [4, 1], strides = [1, 1]} : vector<4x256xf32> to vector<4x1xf32>
    %643 = tpu.concatenate %641, %642 in 1 : vector<4x255xf32>, vector<4x1xf32> -> vector<4x256xf32>
    %644 = vector.shape_cast %640 : vector<1x256xi1> to vector<1x256xi1>
    %645 = vector.broadcast %644 : vector<1x256xi1> to vector<4x256xi1>
    %646 = arith.select %645, %256, %643 : vector<4x256xi1>, vector<4x256xf32>
    %c15_i32_60 = arith.constant 15 : i32
    %647 = vector.broadcast %c15_i32_60 : i32 to vector<1x256xi32>
    %648 = arith.cmpi eq, %2, %647 : vector<1x256xi32>
    %649 = vector.extract_strided_slice %646 {offsets = [0, 16], sizes = [4, 240], strides = [1, 1]} : vector<4x256xf32> to vector<4x240xf32>
    %650 = vector.extract_strided_slice %646 {offsets = [0, 0], sizes = [4, 16], strides = [1, 1]} : vector<4x256xf32> to vector<4x16xf32>
    %651 = tpu.concatenate %649, %650 in 1 : vector<4x240xf32>, vector<4x16xf32> -> vector<4x256xf32>
    %652 = vector.shape_cast %648 : vector<1x256xi1> to vector<1x256xi1>
    %653 = vector.broadcast %652 : vector<1x256xi1> to vector<4x256xi1>
    %654 = arith.select %653, %646, %651 : vector<4x256xi1>, vector<4x256xf32>
    %655 = vector.broadcast %638 : vector<1x256xf32> to vector<4x256xf32>
    %656 = arith.mulf %655, %654 : vector<4x256xf32>
    %657 = arith.addf %637, %656 : vector<4x256xf32>
    %658 = arith.subf %256, %657 : vector<4x256xf32>
    %cst_61 = arith.constant 0.000000e+00 : f32
    %659 = vector.broadcast %cst_61 : f32 to vector<4x256xf32>
    %660 = vector.extract_strided_slice %7 {offsets = [0, 0, 0], sizes = [1, 4, 9], strides = [1, 1, 1]} : vector<3x4x9xf32> to vector<1x4x9xf32>
    %661 = vector.shape_cast %660 : vector<1x4x9xf32> to vector<4x9xf32>
    %c15_i32_62 = arith.constant 15 : i32
    %662 = vector.broadcast %c15_i32_62 : i32 to vector<1x256xi32>
    %663 = arith.cmpi eq, %1, %662 : vector<1x256xi32>
    %664 = vector.extract_strided_slice %390 {offsets = [0, 1], sizes = [4, 255], strides = [1, 1]} : vector<4x256xf32> to vector<4x255xf32>
    %665 = vector.extract_strided_slice %390 {offsets = [0, 0], sizes = [4, 1], strides = [1, 1]} : vector<4x256xf32> to vector<4x1xf32>
    %666 = tpu.concatenate %664, %665 in 1 : vector<4x255xf32>, vector<4x1xf32> -> vector<4x256xf32>
    %cst_63 = arith.constant 0.000000e+00 : f32
    %667 = vector.broadcast %cst_63 : f32 to vector<4x256xf32>
    %668 = vector.shape_cast %663 : vector<1x256xi1> to vector<1x256xi1>
    %669 = vector.broadcast %668 : vector<1x256xi1> to vector<4x256xi1>
    %670 = arith.select %669, %667, %666 : vector<4x256xi1>, vector<4x256xf32>
    %c15_i32_64 = arith.constant 15 : i32
    %671 = vector.broadcast %c15_i32_64 : i32 to vector<1x256xi32>
    %672 = arith.cmpi eq, %2, %671 : vector<1x256xi32>
    %673 = vector.extract_strided_slice %670 {offsets = [0, 16], sizes = [4, 240], strides = [1, 1]} : vector<4x256xf32> to vector<4x240xf32>
    %674 = vector.extract_strided_slice %670 {offsets = [0, 0], sizes = [4, 16], strides = [1, 1]} : vector<4x256xf32> to vector<4x16xf32>
    %675 = tpu.concatenate %673, %674 in 1 : vector<4x240xf32>, vector<4x16xf32> -> vector<4x256xf32>
    %cst_65 = arith.constant 0.000000e+00 : f32
    %676 = vector.broadcast %cst_65 : f32 to vector<4x256xf32>
    %677 = vector.shape_cast %672 : vector<1x256xi1> to vector<1x256xi1>
    %678 = vector.broadcast %677 : vector<1x256xi1> to vector<4x256xi1>
    %679 = arith.select %678, %676, %675 : vector<4x256xi1>, vector<4x256xf32>
    %680 = vector.extract_strided_slice %661 {offsets = [0, 0], sizes = [4, 1], strides = [1, 1]} : vector<4x9xf32> to vector<4x1xf32>
    %681 = vector.broadcast %680 : vector<4x1xf32> to vector<4x256xf32>
    %682 = arith.mulf %681, %679 : vector<4x256xf32>
    %683 = arith.addf %659, %682 : vector<4x256xf32>
    %c15_i32_66 = arith.constant 15 : i32
    %684 = vector.broadcast %c15_i32_66 : i32 to vector<1x256xi32>
    %685 = arith.cmpi eq, %2, %684 : vector<1x256xi32>
    %686 = vector.extract_strided_slice %390 {offsets = [0, 16], sizes = [4, 240], strides = [1, 1]} : vector<4x256xf32> to vector<4x240xf32>
    %687 = vector.extract_strided_slice %390 {offsets = [0, 0], sizes = [4, 16], strides = [1, 1]} : vector<4x256xf32> to vector<4x16xf32>
    %688 = tpu.concatenate %686, %687 in 1 : vector<4x240xf32>, vector<4x16xf32> -> vector<4x256xf32>
    %cst_67 = arith.constant 0.000000e+00 : f32
    %689 = vector.broadcast %cst_67 : f32 to vector<4x256xf32>
    %690 = vector.shape_cast %685 : vector<1x256xi1> to vector<1x256xi1>
    %691 = vector.broadcast %690 : vector<1x256xi1> to vector<4x256xi1>
    %692 = arith.select %691, %689, %688 : vector<4x256xi1>, vector<4x256xf32>
    %693 = vector.extract_strided_slice %661 {offsets = [0, 1], sizes = [4, 1], strides = [1, 1]} : vector<4x9xf32> to vector<4x1xf32>
    %694 = vector.broadcast %693 : vector<4x1xf32> to vector<4x256xf32>
    %695 = arith.mulf %694, %692 : vector<4x256xf32>
    %696 = arith.addf %683, %695 : vector<4x256xf32>
    %c0_i32_68 = arith.constant 0 : i32
    %697 = vector.broadcast %c0_i32_68 : i32 to vector<1x256xi32>
    %698 = arith.cmpi eq, %1, %697 : vector<1x256xi32>
    %699 = vector.extract_strided_slice %390 {offsets = [0, 255], sizes = [4, 1], strides = [1, 1]} : vector<4x256xf32> to vector<4x1xf32>
    %700 = vector.extract_strided_slice %390 {offsets = [0, 0], sizes = [4, 255], strides = [1, 1]} : vector<4x256xf32> to vector<4x255xf32>
    %701 = tpu.concatenate %699, %700 in 1 : vector<4x1xf32>, vector<4x255xf32> -> vector<4x256xf32>
    %cst_69 = arith.constant 0.000000e+00 : f32
    %702 = vector.broadcast %cst_69 : f32 to vector<4x256xf32>
    %703 = vector.shape_cast %698 : vector<1x256xi1> to vector<1x256xi1>
    %704 = vector.broadcast %703 : vector<1x256xi1> to vector<4x256xi1>
    %705 = arith.select %704, %702, %701 : vector<4x256xi1>, vector<4x256xf32>
    %c15_i32_70 = arith.constant 15 : i32
    %706 = vector.broadcast %c15_i32_70 : i32 to vector<1x256xi32>
    %707 = arith.cmpi eq, %2, %706 : vector<1x256xi32>
    %708 = vector.extract_strided_slice %705 {offsets = [0, 16], sizes = [4, 240], strides = [1, 1]} : vector<4x256xf32> to vector<4x240xf32>
    %709 = vector.extract_strided_slice %705 {offsets = [0, 0], sizes = [4, 16], strides = [1, 1]} : vector<4x256xf32> to vector<4x16xf32>
    %710 = tpu.concatenate %708, %709 in 1 : vector<4x240xf32>, vector<4x16xf32> -> vector<4x256xf32>
    %cst_71 = arith.constant 0.000000e+00 : f32
    %711 = vector.broadcast %cst_71 : f32 to vector<4x256xf32>
    %712 = vector.shape_cast %707 : vector<1x256xi1> to vector<1x256xi1>
    %713 = vector.broadcast %712 : vector<1x256xi1> to vector<4x256xi1>
    %714 = arith.select %713, %711, %710 : vector<4x256xi1>, vector<4x256xf32>
    %715 = vector.extract_strided_slice %661 {offsets = [0, 2], sizes = [4, 1], strides = [1, 1]} : vector<4x9xf32> to vector<4x1xf32>
    %716 = vector.broadcast %715 : vector<4x1xf32> to vector<4x256xf32>
    %717 = arith.mulf %716, %714 : vector<4x256xf32>
    %718 = arith.addf %696, %717 : vector<4x256xf32>
    %c15_i32_72 = arith.constant 15 : i32
    %719 = vector.broadcast %c15_i32_72 : i32 to vector<1x256xi32>
    %720 = arith.cmpi eq, %1, %719 : vector<1x256xi32>
    %721 = vector.extract_strided_slice %390 {offsets = [0, 1], sizes = [4, 255], strides = [1, 1]} : vector<4x256xf32> to vector<4x255xf32>
    %722 = vector.extract_strided_slice %390 {offsets = [0, 0], sizes = [4, 1], strides = [1, 1]} : vector<4x256xf32> to vector<4x1xf32>
    %723 = tpu.concatenate %721, %722 in 1 : vector<4x255xf32>, vector<4x1xf32> -> vector<4x256xf32>
    %cst_73 = arith.constant 0.000000e+00 : f32
    %724 = vector.broadcast %cst_73 : f32 to vector<4x256xf32>
    %725 = vector.shape_cast %720 : vector<1x256xi1> to vector<1x256xi1>
    %726 = vector.broadcast %725 : vector<1x256xi1> to vector<4x256xi1>
    %727 = arith.select %726, %724, %723 : vector<4x256xi1>, vector<4x256xf32>
    %728 = vector.extract_strided_slice %661 {offsets = [0, 3], sizes = [4, 1], strides = [1, 1]} : vector<4x9xf32> to vector<4x1xf32>
    %729 = vector.broadcast %728 : vector<4x1xf32> to vector<4x256xf32>
    %730 = arith.mulf %729, %727 : vector<4x256xf32>
    %731 = arith.addf %718, %730 : vector<4x256xf32>
    %732 = vector.extract_strided_slice %661 {offsets = [0, 4], sizes = [4, 1], strides = [1, 1]} : vector<4x9xf32> to vector<4x1xf32>
    %733 = vector.broadcast %732 : vector<4x1xf32> to vector<4x256xf32>
    %734 = arith.mulf %733, %390 : vector<4x256xf32>
    %735 = arith.addf %731, %734 : vector<4x256xf32>
    %c0_i32_74 = arith.constant 0 : i32
    %736 = vector.broadcast %c0_i32_74 : i32 to vector<1x256xi32>
    %737 = arith.cmpi eq, %1, %736 : vector<1x256xi32>
    %738 = vector.extract_strided_slice %390 {offsets = [0, 255], sizes = [4, 1], strides = [1, 1]} : vector<4x256xf32> to vector<4x1xf32>
    %739 = vector.extract_strided_slice %390 {offsets = [0, 0], sizes = [4, 255], strides = [1, 1]} : vector<4x256xf32> to vector<4x255xf32>
    %740 = tpu.concatenate %738, %739 in 1 : vector<4x1xf32>, vector<4x255xf32> -> vector<4x256xf32>
    %cst_75 = arith.constant 0.000000e+00 : f32
    %741 = vector.broadcast %cst_75 : f32 to vector<4x256xf32>
    %742 = vector.shape_cast %737 : vector<1x256xi1> to vector<1x256xi1>
    %743 = vector.broadcast %742 : vector<1x256xi1> to vector<4x256xi1>
    %744 = arith.select %743, %741, %740 : vector<4x256xi1>, vector<4x256xf32>
    %745 = vector.extract_strided_slice %661 {offsets = [0, 5], sizes = [4, 1], strides = [1, 1]} : vector<4x9xf32> to vector<4x1xf32>
    %746 = vector.broadcast %745 : vector<4x1xf32> to vector<4x256xf32>
    %747 = arith.mulf %746, %744 : vector<4x256xf32>
    %748 = arith.addf %735, %747 : vector<4x256xf32>
    %c15_i32_76 = arith.constant 15 : i32
    %749 = vector.broadcast %c15_i32_76 : i32 to vector<1x256xi32>
    %750 = arith.cmpi eq, %1, %749 : vector<1x256xi32>
    %751 = vector.extract_strided_slice %390 {offsets = [0, 1], sizes = [4, 255], strides = [1, 1]} : vector<4x256xf32> to vector<4x255xf32>
    %752 = vector.extract_strided_slice %390 {offsets = [0, 0], sizes = [4, 1], strides = [1, 1]} : vector<4x256xf32> to vector<4x1xf32>
    %753 = tpu.concatenate %751, %752 in 1 : vector<4x255xf32>, vector<4x1xf32> -> vector<4x256xf32>
    %cst_77 = arith.constant 0.000000e+00 : f32
    %754 = vector.broadcast %cst_77 : f32 to vector<4x256xf32>
    %755 = vector.shape_cast %750 : vector<1x256xi1> to vector<1x256xi1>
    %756 = vector.broadcast %755 : vector<1x256xi1> to vector<4x256xi1>
    %757 = arith.select %756, %754, %753 : vector<4x256xi1>, vector<4x256xf32>
    %c0_i32_78 = arith.constant 0 : i32
    %758 = vector.broadcast %c0_i32_78 : i32 to vector<1x256xi32>
    %759 = arith.cmpi eq, %2, %758 : vector<1x256xi32>
    %760 = vector.extract_strided_slice %757 {offsets = [0, 240], sizes = [4, 16], strides = [1, 1]} : vector<4x256xf32> to vector<4x16xf32>
    %761 = vector.extract_strided_slice %757 {offsets = [0, 0], sizes = [4, 240], strides = [1, 1]} : vector<4x256xf32> to vector<4x240xf32>
    %762 = tpu.concatenate %760, %761 in 1 : vector<4x16xf32>, vector<4x240xf32> -> vector<4x256xf32>
    %cst_79 = arith.constant 0.000000e+00 : f32
    %763 = vector.broadcast %cst_79 : f32 to vector<4x256xf32>
    %764 = vector.shape_cast %759 : vector<1x256xi1> to vector<1x256xi1>
    %765 = vector.broadcast %764 : vector<1x256xi1> to vector<4x256xi1>
    %766 = arith.select %765, %763, %762 : vector<4x256xi1>, vector<4x256xf32>
    %767 = vector.extract_strided_slice %661 {offsets = [0, 6], sizes = [4, 1], strides = [1, 1]} : vector<4x9xf32> to vector<4x1xf32>
    %768 = vector.broadcast %767 : vector<4x1xf32> to vector<4x256xf32>
    %769 = arith.mulf %768, %766 : vector<4x256xf32>
    %770 = arith.addf %748, %769 : vector<4x256xf32>
    %c0_i32_80 = arith.constant 0 : i32
    %771 = vector.broadcast %c0_i32_80 : i32 to vector<1x256xi32>
    %772 = arith.cmpi eq, %2, %771 : vector<1x256xi32>
    %773 = vector.extract_strided_slice %390 {offsets = [0, 240], sizes = [4, 16], strides = [1, 1]} : vector<4x256xf32> to vector<4x16xf32>
    %774 = vector.extract_strided_slice %390 {offsets = [0, 0], sizes = [4, 240], strides = [1, 1]} : vector<4x256xf32> to vector<4x240xf32>
    %775 = tpu.concatenate %773, %774 in 1 : vector<4x16xf32>, vector<4x240xf32> -> vector<4x256xf32>
    %cst_81 = arith.constant 0.000000e+00 : f32
    %776 = vector.broadcast %cst_81 : f32 to vector<4x256xf32>
    %777 = vector.shape_cast %772 : vector<1x256xi1> to vector<1x256xi1>
    %778 = vector.broadcast %777 : vector<1x256xi1> to vector<4x256xi1>
    %779 = arith.select %778, %776, %775 : vector<4x256xi1>, vector<4x256xf32>
    %780 = vector.extract_strided_slice %661 {offsets = [0, 7], sizes = [4, 1], strides = [1, 1]} : vector<4x9xf32> to vector<4x1xf32>
    %781 = vector.broadcast %780 : vector<4x1xf32> to vector<4x256xf32>
    %782 = arith.mulf %781, %779 : vector<4x256xf32>
    %783 = arith.addf %770, %782 : vector<4x256xf32>
    %c0_i32_82 = arith.constant 0 : i32
    %784 = vector.broadcast %c0_i32_82 : i32 to vector<1x256xi32>
    %785 = arith.cmpi eq, %1, %784 : vector<1x256xi32>
    %786 = vector.extract_strided_slice %390 {offsets = [0, 255], sizes = [4, 1], strides = [1, 1]} : vector<4x256xf32> to vector<4x1xf32>
    %787 = vector.extract_strided_slice %390 {offsets = [0, 0], sizes = [4, 255], strides = [1, 1]} : vector<4x256xf32> to vector<4x255xf32>
    %788 = tpu.concatenate %786, %787 in 1 : vector<4x1xf32>, vector<4x255xf32> -> vector<4x256xf32>
    %cst_83 = arith.constant 0.000000e+00 : f32
    %789 = vector.broadcast %cst_83 : f32 to vector<4x256xf32>
    %790 = vector.shape_cast %785 : vector<1x256xi1> to vector<1x256xi1>
    %791 = vector.broadcast %790 : vector<1x256xi1> to vector<4x256xi1>
    %792 = arith.select %791, %789, %788 : vector<4x256xi1>, vector<4x256xf32>
    %c0_i32_84 = arith.constant 0 : i32
    %793 = vector.broadcast %c0_i32_84 : i32 to vector<1x256xi32>
    %794 = arith.cmpi eq, %2, %793 : vector<1x256xi32>
    %795 = vector.extract_strided_slice %792 {offsets = [0, 240], sizes = [4, 16], strides = [1, 1]} : vector<4x256xf32> to vector<4x16xf32>
    %796 = vector.extract_strided_slice %792 {offsets = [0, 0], sizes = [4, 240], strides = [1, 1]} : vector<4x256xf32> to vector<4x240xf32>
    %797 = tpu.concatenate %795, %796 in 1 : vector<4x16xf32>, vector<4x240xf32> -> vector<4x256xf32>
    %cst_85 = arith.constant 0.000000e+00 : f32
    %798 = vector.broadcast %cst_85 : f32 to vector<4x256xf32>
    %799 = vector.shape_cast %794 : vector<1x256xi1> to vector<1x256xi1>
    %800 = vector.broadcast %799 : vector<1x256xi1> to vector<4x256xi1>
    %801 = arith.select %800, %798, %797 : vector<4x256xi1>, vector<4x256xf32>
    %802 = vector.extract_strided_slice %661 {offsets = [0, 8], sizes = [4, 1], strides = [1, 1]} : vector<4x9xf32> to vector<4x1xf32>
    %803 = vector.broadcast %802 : vector<4x1xf32> to vector<4x256xf32>
    %804 = arith.mulf %803, %801 : vector<4x256xf32>
    %805 = arith.addf %783, %804 : vector<4x256xf32>
    %806 = vector.extract_strided_slice %7 {offsets = [1, 0, 0], sizes = [1, 4, 9], strides = [1, 1, 1]} : vector<3x4x9xf32> to vector<1x4x9xf32>
    %807 = vector.shape_cast %806 : vector<1x4x9xf32> to vector<4x9xf32>
    %c15_i32_86 = arith.constant 15 : i32
    %808 = vector.broadcast %c15_i32_86 : i32 to vector<1x256xi32>
    %809 = arith.cmpi eq, %1, %808 : vector<1x256xi32>
    %810 = vector.extract_strided_slice %524 {offsets = [0, 1], sizes = [4, 255], strides = [1, 1]} : vector<4x256xf32> to vector<4x255xf32>
    %811 = vector.extract_strided_slice %524 {offsets = [0, 0], sizes = [4, 1], strides = [1, 1]} : vector<4x256xf32> to vector<4x1xf32>
    %812 = tpu.concatenate %810, %811 in 1 : vector<4x255xf32>, vector<4x1xf32> -> vector<4x256xf32>
    %cst_87 = arith.constant 0.000000e+00 : f32
    %813 = vector.broadcast %cst_87 : f32 to vector<4x256xf32>
    %814 = vector.shape_cast %809 : vector<1x256xi1> to vector<1x256xi1>
    %815 = vector.broadcast %814 : vector<1x256xi1> to vector<4x256xi1>
    %816 = arith.select %815, %813, %812 : vector<4x256xi1>, vector<4x256xf32>
    %c15_i32_88 = arith.constant 15 : i32
    %817 = vector.broadcast %c15_i32_88 : i32 to vector<1x256xi32>
    %818 = arith.cmpi eq, %2, %817 : vector<1x256xi32>
    %819 = vector.extract_strided_slice %816 {offsets = [0, 16], sizes = [4, 240], strides = [1, 1]} : vector<4x256xf32> to vector<4x240xf32>
    %820 = vector.extract_strided_slice %816 {offsets = [0, 0], sizes = [4, 16], strides = [1, 1]} : vector<4x256xf32> to vector<4x16xf32>
    %821 = tpu.concatenate %819, %820 in 1 : vector<4x240xf32>, vector<4x16xf32> -> vector<4x256xf32>
    %cst_89 = arith.constant 0.000000e+00 : f32
    %822 = vector.broadcast %cst_89 : f32 to vector<4x256xf32>
    %823 = vector.shape_cast %818 : vector<1x256xi1> to vector<1x256xi1>
    %824 = vector.broadcast %823 : vector<1x256xi1> to vector<4x256xi1>
    %825 = arith.select %824, %822, %821 : vector<4x256xi1>, vector<4x256xf32>
    %826 = vector.extract_strided_slice %807 {offsets = [0, 0], sizes = [4, 1], strides = [1, 1]} : vector<4x9xf32> to vector<4x1xf32>
    %827 = vector.broadcast %826 : vector<4x1xf32> to vector<4x256xf32>
    %828 = arith.mulf %827, %825 : vector<4x256xf32>
    %829 = arith.addf %805, %828 : vector<4x256xf32>
    %c15_i32_90 = arith.constant 15 : i32
    %830 = vector.broadcast %c15_i32_90 : i32 to vector<1x256xi32>
    %831 = arith.cmpi eq, %2, %830 : vector<1x256xi32>
    %832 = vector.extract_strided_slice %524 {offsets = [0, 16], sizes = [4, 240], strides = [1, 1]} : vector<4x256xf32> to vector<4x240xf32>
    %833 = vector.extract_strided_slice %524 {offsets = [0, 0], sizes = [4, 16], strides = [1, 1]} : vector<4x256xf32> to vector<4x16xf32>
    %834 = tpu.concatenate %832, %833 in 1 : vector<4x240xf32>, vector<4x16xf32> -> vector<4x256xf32>
    %cst_91 = arith.constant 0.000000e+00 : f32
    %835 = vector.broadcast %cst_91 : f32 to vector<4x256xf32>
    %836 = vector.shape_cast %831 : vector<1x256xi1> to vector<1x256xi1>
    %837 = vector.broadcast %836 : vector<1x256xi1> to vector<4x256xi1>
    %838 = arith.select %837, %835, %834 : vector<4x256xi1>, vector<4x256xf32>
    %839 = vector.extract_strided_slice %807 {offsets = [0, 1], sizes = [4, 1], strides = [1, 1]} : vector<4x9xf32> to vector<4x1xf32>
    %840 = vector.broadcast %839 : vector<4x1xf32> to vector<4x256xf32>
    %841 = arith.mulf %840, %838 : vector<4x256xf32>
    %842 = arith.addf %829, %841 : vector<4x256xf32>
    %c0_i32_92 = arith.constant 0 : i32
    %843 = vector.broadcast %c0_i32_92 : i32 to vector<1x256xi32>
    %844 = arith.cmpi eq, %1, %843 : vector<1x256xi32>
    %845 = vector.extract_strided_slice %524 {offsets = [0, 255], sizes = [4, 1], strides = [1, 1]} : vector<4x256xf32> to vector<4x1xf32>
    %846 = vector.extract_strided_slice %524 {offsets = [0, 0], sizes = [4, 255], strides = [1, 1]} : vector<4x256xf32> to vector<4x255xf32>
    %847 = tpu.concatenate %845, %846 in 1 : vector<4x1xf32>, vector<4x255xf32> -> vector<4x256xf32>
    %cst_93 = arith.constant 0.000000e+00 : f32
    %848 = vector.broadcast %cst_93 : f32 to vector<4x256xf32>
    %849 = vector.shape_cast %844 : vector<1x256xi1> to vector<1x256xi1>
    %850 = vector.broadcast %849 : vector<1x256xi1> to vector<4x256xi1>
    %851 = arith.select %850, %848, %847 : vector<4x256xi1>, vector<4x256xf32>
    %c15_i32_94 = arith.constant 15 : i32
    %852 = vector.broadcast %c15_i32_94 : i32 to vector<1x256xi32>
    %853 = arith.cmpi eq, %2, %852 : vector<1x256xi32>
    %854 = vector.extract_strided_slice %851 {offsets = [0, 16], sizes = [4, 240], strides = [1, 1]} : vector<4x256xf32> to vector<4x240xf32>
    %855 = vector.extract_strided_slice %851 {offsets = [0, 0], sizes = [4, 16], strides = [1, 1]} : vector<4x256xf32> to vector<4x16xf32>
    %856 = tpu.concatenate %854, %855 in 1 : vector<4x240xf32>, vector<4x16xf32> -> vector<4x256xf32>
    %cst_95 = arith.constant 0.000000e+00 : f32
    %857 = vector.broadcast %cst_95 : f32 to vector<4x256xf32>
    %858 = vector.shape_cast %853 : vector<1x256xi1> to vector<1x256xi1>
    %859 = vector.broadcast %858 : vector<1x256xi1> to vector<4x256xi1>
    %860 = arith.select %859, %857, %856 : vector<4x256xi1>, vector<4x256xf32>
    %861 = vector.extract_strided_slice %807 {offsets = [0, 2], sizes = [4, 1], strides = [1, 1]} : vector<4x9xf32> to vector<4x1xf32>
    %862 = vector.broadcast %861 : vector<4x1xf32> to vector<4x256xf32>
    %863 = arith.mulf %862, %860 : vector<4x256xf32>
    %864 = arith.addf %842, %863 : vector<4x256xf32>
    %c15_i32_96 = arith.constant 15 : i32
    %865 = vector.broadcast %c15_i32_96 : i32 to vector<1x256xi32>
    %866 = arith.cmpi eq, %1, %865 : vector<1x256xi32>
    %867 = vector.extract_strided_slice %524 {offsets = [0, 1], sizes = [4, 255], strides = [1, 1]} : vector<4x256xf32> to vector<4x255xf32>
    %868 = vector.extract_strided_slice %524 {offsets = [0, 0], sizes = [4, 1], strides = [1, 1]} : vector<4x256xf32> to vector<4x1xf32>
    %869 = tpu.concatenate %867, %868 in 1 : vector<4x255xf32>, vector<4x1xf32> -> vector<4x256xf32>
    %cst_97 = arith.constant 0.000000e+00 : f32
    %870 = vector.broadcast %cst_97 : f32 to vector<4x256xf32>
    %871 = vector.shape_cast %866 : vector<1x256xi1> to vector<1x256xi1>
    %872 = vector.broadcast %871 : vector<1x256xi1> to vector<4x256xi1>
    %873 = arith.select %872, %870, %869 : vector<4x256xi1>, vector<4x256xf32>
    %874 = vector.extract_strided_slice %807 {offsets = [0, 3], sizes = [4, 1], strides = [1, 1]} : vector<4x9xf32> to vector<4x1xf32>
    %875 = vector.broadcast %874 : vector<4x1xf32> to vector<4x256xf32>
    %876 = arith.mulf %875, %873 : vector<4x256xf32>
    %877 = arith.addf %864, %876 : vector<4x256xf32>
    %878 = vector.extract_strided_slice %807 {offsets = [0, 4], sizes = [4, 1], strides = [1, 1]} : vector<4x9xf32> to vector<4x1xf32>
    %879 = vector.broadcast %878 : vector<4x1xf32> to vector<4x256xf32>
    %880 = arith.mulf %879, %524 : vector<4x256xf32>
    %881 = arith.addf %877, %880 : vector<4x256xf32>
    %c0_i32_98 = arith.constant 0 : i32
    %882 = vector.broadcast %c0_i32_98 : i32 to vector<1x256xi32>
    %883 = arith.cmpi eq, %1, %882 : vector<1x256xi32>
    %884 = vector.extract_strided_slice %524 {offsets = [0, 255], sizes = [4, 1], strides = [1, 1]} : vector<4x256xf32> to vector<4x1xf32>
    %885 = vector.extract_strided_slice %524 {offsets = [0, 0], sizes = [4, 255], strides = [1, 1]} : vector<4x256xf32> to vector<4x255xf32>
    %886 = tpu.concatenate %884, %885 in 1 : vector<4x1xf32>, vector<4x255xf32> -> vector<4x256xf32>
    %cst_99 = arith.constant 0.000000e+00 : f32
    %887 = vector.broadcast %cst_99 : f32 to vector<4x256xf32>
    %888 = vector.shape_cast %883 : vector<1x256xi1> to vector<1x256xi1>
    %889 = vector.broadcast %888 : vector<1x256xi1> to vector<4x256xi1>
    %890 = arith.select %889, %887, %886 : vector<4x256xi1>, vector<4x256xf32>
    %891 = vector.extract_strided_slice %807 {offsets = [0, 5], sizes = [4, 1], strides = [1, 1]} : vector<4x9xf32> to vector<4x1xf32>
    %892 = vector.broadcast %891 : vector<4x1xf32> to vector<4x256xf32>
    %893 = arith.mulf %892, %890 : vector<4x256xf32>
    %894 = arith.addf %881, %893 : vector<4x256xf32>
    %c15_i32_100 = arith.constant 15 : i32
    %895 = vector.broadcast %c15_i32_100 : i32 to vector<1x256xi32>
    %896 = arith.cmpi eq, %1, %895 : vector<1x256xi32>
    %897 = vector.extract_strided_slice %524 {offsets = [0, 1], sizes = [4, 255], strides = [1, 1]} : vector<4x256xf32> to vector<4x255xf32>
    %898 = vector.extract_strided_slice %524 {offsets = [0, 0], sizes = [4, 1], strides = [1, 1]} : vector<4x256xf32> to vector<4x1xf32>
    %899 = tpu.concatenate %897, %898 in 1 : vector<4x255xf32>, vector<4x1xf32> -> vector<4x256xf32>
    %cst_101 = arith.constant 0.000000e+00 : f32
    %900 = vector.broadcast %cst_101 : f32 to vector<4x256xf32>
    %901 = vector.shape_cast %896 : vector<1x256xi1> to vector<1x256xi1>
    %902 = vector.broadcast %901 : vector<1x256xi1> to vector<4x256xi1>
    %903 = arith.select %902, %900, %899 : vector<4x256xi1>, vector<4x256xf32>
    %c0_i32_102 = arith.constant 0 : i32
    %904 = vector.broadcast %c0_i32_102 : i32 to vector<1x256xi32>
    %905 = arith.cmpi eq, %2, %904 : vector<1x256xi32>
    %906 = vector.extract_strided_slice %903 {offsets = [0, 240], sizes = [4, 16], strides = [1, 1]} : vector<4x256xf32> to vector<4x16xf32>
    %907 = vector.extract_strided_slice %903 {offsets = [0, 0], sizes = [4, 240], strides = [1, 1]} : vector<4x256xf32> to vector<4x240xf32>
    %908 = tpu.concatenate %906, %907 in 1 : vector<4x16xf32>, vector<4x240xf32> -> vector<4x256xf32>
    %cst_103 = arith.constant 0.000000e+00 : f32
    %909 = vector.broadcast %cst_103 : f32 to vector<4x256xf32>
    %910 = vector.shape_cast %905 : vector<1x256xi1> to vector<1x256xi1>
    %911 = vector.broadcast %910 : vector<1x256xi1> to vector<4x256xi1>
    %912 = arith.select %911, %909, %908 : vector<4x256xi1>, vector<4x256xf32>
    %913 = vector.extract_strided_slice %807 {offsets = [0, 6], sizes = [4, 1], strides = [1, 1]} : vector<4x9xf32> to vector<4x1xf32>
    %914 = vector.broadcast %913 : vector<4x1xf32> to vector<4x256xf32>
    %915 = arith.mulf %914, %912 : vector<4x256xf32>
    %916 = arith.addf %894, %915 : vector<4x256xf32>
    %c0_i32_104 = arith.constant 0 : i32
    %917 = vector.broadcast %c0_i32_104 : i32 to vector<1x256xi32>
    %918 = arith.cmpi eq, %2, %917 : vector<1x256xi32>
    %919 = vector.extract_strided_slice %524 {offsets = [0, 240], sizes = [4, 16], strides = [1, 1]} : vector<4x256xf32> to vector<4x16xf32>
    %920 = vector.extract_strided_slice %524 {offsets = [0, 0], sizes = [4, 240], strides = [1, 1]} : vector<4x256xf32> to vector<4x240xf32>
    %921 = tpu.concatenate %919, %920 in 1 : vector<4x16xf32>, vector<4x240xf32> -> vector<4x256xf32>
    %cst_105 = arith.constant 0.000000e+00 : f32
    %922 = vector.broadcast %cst_105 : f32 to vector<4x256xf32>
    %923 = vector.shape_cast %918 : vector<1x256xi1> to vector<1x256xi1>
    %924 = vector.broadcast %923 : vector<1x256xi1> to vector<4x256xi1>
    %925 = arith.select %924, %922, %921 : vector<4x256xi1>, vector<4x256xf32>
    %926 = vector.extract_strided_slice %807 {offsets = [0, 7], sizes = [4, 1], strides = [1, 1]} : vector<4x9xf32> to vector<4x1xf32>
    %927 = vector.broadcast %926 : vector<4x1xf32> to vector<4x256xf32>
    %928 = arith.mulf %927, %925 : vector<4x256xf32>
    %929 = arith.addf %916, %928 : vector<4x256xf32>
    %c0_i32_106 = arith.constant 0 : i32
    %930 = vector.broadcast %c0_i32_106 : i32 to vector<1x256xi32>
    %931 = arith.cmpi eq, %1, %930 : vector<1x256xi32>
    %932 = vector.extract_strided_slice %524 {offsets = [0, 255], sizes = [4, 1], strides = [1, 1]} : vector<4x256xf32> to vector<4x1xf32>
    %933 = vector.extract_strided_slice %524 {offsets = [0, 0], sizes = [4, 255], strides = [1, 1]} : vector<4x256xf32> to vector<4x255xf32>
    %934 = tpu.concatenate %932, %933 in 1 : vector<4x1xf32>, vector<4x255xf32> -> vector<4x256xf32>
    %cst_107 = arith.constant 0.000000e+00 : f32
    %935 = vector.broadcast %cst_107 : f32 to vector<4x256xf32>
    %936 = vector.shape_cast %931 : vector<1x256xi1> to vector<1x256xi1>
    %937 = vector.broadcast %936 : vector<1x256xi1> to vector<4x256xi1>
    %938 = arith.select %937, %935, %934 : vector<4x256xi1>, vector<4x256xf32>
    %c0_i32_108 = arith.constant 0 : i32
    %939 = vector.broadcast %c0_i32_108 : i32 to vector<1x256xi32>
    %940 = arith.cmpi eq, %2, %939 : vector<1x256xi32>
    %941 = vector.extract_strided_slice %938 {offsets = [0, 240], sizes = [4, 16], strides = [1, 1]} : vector<4x256xf32> to vector<4x16xf32>
    %942 = vector.extract_strided_slice %938 {offsets = [0, 0], sizes = [4, 240], strides = [1, 1]} : vector<4x256xf32> to vector<4x240xf32>
    %943 = tpu.concatenate %941, %942 in 1 : vector<4x16xf32>, vector<4x240xf32> -> vector<4x256xf32>
    %cst_109 = arith.constant 0.000000e+00 : f32
    %944 = vector.broadcast %cst_109 : f32 to vector<4x256xf32>
    %945 = vector.shape_cast %940 : vector<1x256xi1> to vector<1x256xi1>
    %946 = vector.broadcast %945 : vector<1x256xi1> to vector<4x256xi1>
    %947 = arith.select %946, %944, %943 : vector<4x256xi1>, vector<4x256xf32>
    %948 = vector.extract_strided_slice %807 {offsets = [0, 8], sizes = [4, 1], strides = [1, 1]} : vector<4x9xf32> to vector<4x1xf32>
    %949 = vector.broadcast %948 : vector<4x1xf32> to vector<4x256xf32>
    %950 = arith.mulf %949, %947 : vector<4x256xf32>
    %951 = arith.addf %929, %950 : vector<4x256xf32>
    %952 = vector.extract_strided_slice %7 {offsets = [2, 0, 0], sizes = [1, 4, 9], strides = [1, 1, 1]} : vector<3x4x9xf32> to vector<1x4x9xf32>
    %953 = vector.shape_cast %952 : vector<1x4x9xf32> to vector<4x9xf32>
    %c15_i32_110 = arith.constant 15 : i32
    %954 = vector.broadcast %c15_i32_110 : i32 to vector<1x256xi32>
    %955 = arith.cmpi eq, %1, %954 : vector<1x256xi32>
    %956 = vector.extract_strided_slice %658 {offsets = [0, 1], sizes = [4, 255], strides = [1, 1]} : vector<4x256xf32> to vector<4x255xf32>
    %957 = vector.extract_strided_slice %658 {offsets = [0, 0], sizes = [4, 1], strides = [1, 1]} : vector<4x256xf32> to vector<4x1xf32>
    %958 = tpu.concatenate %956, %957 in 1 : vector<4x255xf32>, vector<4x1xf32> -> vector<4x256xf32>
    %cst_111 = arith.constant 0.000000e+00 : f32
    %959 = vector.broadcast %cst_111 : f32 to vector<4x256xf32>
    %960 = vector.shape_cast %955 : vector<1x256xi1> to vector<1x256xi1>
    %961 = vector.broadcast %960 : vector<1x256xi1> to vector<4x256xi1>
    %962 = arith.select %961, %959, %958 : vector<4x256xi1>, vector<4x256xf32>
    %c15_i32_112 = arith.constant 15 : i32
    %963 = vector.broadcast %c15_i32_112 : i32 to vector<1x256xi32>
    %964 = arith.cmpi eq, %2, %963 : vector<1x256xi32>
    %965 = vector.extract_strided_slice %962 {offsets = [0, 16], sizes = [4, 240], strides = [1, 1]} : vector<4x256xf32> to vector<4x240xf32>
    %966 = vector.extract_strided_slice %962 {offsets = [0, 0], sizes = [4, 16], strides = [1, 1]} : vector<4x256xf32> to vector<4x16xf32>
    %967 = tpu.concatenate %965, %966 in 1 : vector<4x240xf32>, vector<4x16xf32> -> vector<4x256xf32>
    %cst_113 = arith.constant 0.000000e+00 : f32
    %968 = vector.broadcast %cst_113 : f32 to vector<4x256xf32>
    %969 = vector.shape_cast %964 : vector<1x256xi1> to vector<1x256xi1>
    %970 = vector.broadcast %969 : vector<1x256xi1> to vector<4x256xi1>
    %971 = arith.select %970, %968, %967 : vector<4x256xi1>, vector<4x256xf32>
    %972 = vector.extract_strided_slice %953 {offsets = [0, 0], sizes = [4, 1], strides = [1, 1]} : vector<4x9xf32> to vector<4x1xf32>
    %973 = vector.broadcast %972 : vector<4x1xf32> to vector<4x256xf32>
    %974 = arith.mulf %973, %971 : vector<4x256xf32>
    %975 = arith.addf %951, %974 : vector<4x256xf32>
    %c15_i32_114 = arith.constant 15 : i32
    %976 = vector.broadcast %c15_i32_114 : i32 to vector<1x256xi32>
    %977 = arith.cmpi eq, %2, %976 : vector<1x256xi32>
    %978 = vector.extract_strided_slice %658 {offsets = [0, 16], sizes = [4, 240], strides = [1, 1]} : vector<4x256xf32> to vector<4x240xf32>
    %979 = vector.extract_strided_slice %658 {offsets = [0, 0], sizes = [4, 16], strides = [1, 1]} : vector<4x256xf32> to vector<4x16xf32>
    %980 = tpu.concatenate %978, %979 in 1 : vector<4x240xf32>, vector<4x16xf32> -> vector<4x256xf32>
    %cst_115 = arith.constant 0.000000e+00 : f32
    %981 = vector.broadcast %cst_115 : f32 to vector<4x256xf32>
    %982 = vector.shape_cast %977 : vector<1x256xi1> to vector<1x256xi1>
    %983 = vector.broadcast %982 : vector<1x256xi1> to vector<4x256xi1>
    %984 = arith.select %983, %981, %980 : vector<4x256xi1>, vector<4x256xf32>
    %985 = vector.extract_strided_slice %953 {offsets = [0, 1], sizes = [4, 1], strides = [1, 1]} : vector<4x9xf32> to vector<4x1xf32>
    %986 = vector.broadcast %985 : vector<4x1xf32> to vector<4x256xf32>
    %987 = arith.mulf %986, %984 : vector<4x256xf32>
    %988 = arith.addf %975, %987 : vector<4x256xf32>
    %c0_i32_116 = arith.constant 0 : i32
    %989 = vector.broadcast %c0_i32_116 : i32 to vector<1x256xi32>
    %990 = arith.cmpi eq, %1, %989 : vector<1x256xi32>
    %991 = vector.extract_strided_slice %658 {offsets = [0, 255], sizes = [4, 1], strides = [1, 1]} : vector<4x256xf32> to vector<4x1xf32>
    %992 = vector.extract_strided_slice %658 {offsets = [0, 0], sizes = [4, 255], strides = [1, 1]} : vector<4x256xf32> to vector<4x255xf32>
    %993 = tpu.concatenate %991, %992 in 1 : vector<4x1xf32>, vector<4x255xf32> -> vector<4x256xf32>
    %cst_117 = arith.constant 0.000000e+00 : f32
    %994 = vector.broadcast %cst_117 : f32 to vector<4x256xf32>
    %995 = vector.shape_cast %990 : vector<1x256xi1> to vector<1x256xi1>
    %996 = vector.broadcast %995 : vector<1x256xi1> to vector<4x256xi1>
    %997 = arith.select %996, %994, %993 : vector<4x256xi1>, vector<4x256xf32>
    %c15_i32_118 = arith.constant 15 : i32
    %998 = vector.broadcast %c15_i32_118 : i32 to vector<1x256xi32>
    %999 = arith.cmpi eq, %2, %998 : vector<1x256xi32>
    %1000 = vector.extract_strided_slice %997 {offsets = [0, 16], sizes = [4, 240], strides = [1, 1]} : vector<4x256xf32> to vector<4x240xf32>
    %1001 = vector.extract_strided_slice %997 {offsets = [0, 0], sizes = [4, 16], strides = [1, 1]} : vector<4x256xf32> to vector<4x16xf32>
    %1002 = tpu.concatenate %1000, %1001 in 1 : vector<4x240xf32>, vector<4x16xf32> -> vector<4x256xf32>
    %cst_119 = arith.constant 0.000000e+00 : f32
    %1003 = vector.broadcast %cst_119 : f32 to vector<4x256xf32>
    %1004 = vector.shape_cast %999 : vector<1x256xi1> to vector<1x256xi1>
    %1005 = vector.broadcast %1004 : vector<1x256xi1> to vector<4x256xi1>
    %1006 = arith.select %1005, %1003, %1002 : vector<4x256xi1>, vector<4x256xf32>
    %1007 = vector.extract_strided_slice %953 {offsets = [0, 2], sizes = [4, 1], strides = [1, 1]} : vector<4x9xf32> to vector<4x1xf32>
    %1008 = vector.broadcast %1007 : vector<4x1xf32> to vector<4x256xf32>
    %1009 = arith.mulf %1008, %1006 : vector<4x256xf32>
    %1010 = arith.addf %988, %1009 : vector<4x256xf32>
    %c15_i32_120 = arith.constant 15 : i32
    %1011 = vector.broadcast %c15_i32_120 : i32 to vector<1x256xi32>
    %1012 = arith.cmpi eq, %1, %1011 : vector<1x256xi32>
    %1013 = vector.extract_strided_slice %658 {offsets = [0, 1], sizes = [4, 255], strides = [1, 1]} : vector<4x256xf32> to vector<4x255xf32>
    %1014 = vector.extract_strided_slice %658 {offsets = [0, 0], sizes = [4, 1], strides = [1, 1]} : vector<4x256xf32> to vector<4x1xf32>
    %1015 = tpu.concatenate %1013, %1014 in 1 : vector<4x255xf32>, vector<4x1xf32> -> vector<4x256xf32>
    %cst_121 = arith.constant 0.000000e+00 : f32
    %1016 = vector.broadcast %cst_121 : f32 to vector<4x256xf32>
    %1017 = vector.shape_cast %1012 : vector<1x256xi1> to vector<1x256xi1>
    %1018 = vector.broadcast %1017 : vector<1x256xi1> to vector<4x256xi1>
    %1019 = arith.select %1018, %1016, %1015 : vector<4x256xi1>, vector<4x256xf32>
    %1020 = vector.extract_strided_slice %953 {offsets = [0, 3], sizes = [4, 1], strides = [1, 1]} : vector<4x9xf32> to vector<4x1xf32>
    %1021 = vector.broadcast %1020 : vector<4x1xf32> to vector<4x256xf32>
    %1022 = arith.mulf %1021, %1019 : vector<4x256xf32>
    %1023 = arith.addf %1010, %1022 : vector<4x256xf32>
    %1024 = vector.extract_strided_slice %953 {offsets = [0, 4], sizes = [4, 1], strides = [1, 1]} : vector<4x9xf32> to vector<4x1xf32>
    %1025 = vector.broadcast %1024 : vector<4x1xf32> to vector<4x256xf32>
    %1026 = arith.mulf %1025, %658 : vector<4x256xf32>
    %1027 = arith.addf %1023, %1026 : vector<4x256xf32>
    %c0_i32_122 = arith.constant 0 : i32
    %1028 = vector.broadcast %c0_i32_122 : i32 to vector<1x256xi32>
    %1029 = arith.cmpi eq, %1, %1028 : vector<1x256xi32>
    %1030 = vector.extract_strided_slice %658 {offsets = [0, 255], sizes = [4, 1], strides = [1, 1]} : vector<4x256xf32> to vector<4x1xf32>
    %1031 = vector.extract_strided_slice %658 {offsets = [0, 0], sizes = [4, 255], strides = [1, 1]} : vector<4x256xf32> to vector<4x255xf32>
    %1032 = tpu.concatenate %1030, %1031 in 1 : vector<4x1xf32>, vector<4x255xf32> -> vector<4x256xf32>
    %cst_123 = arith.constant 0.000000e+00 : f32
    %1033 = vector.broadcast %cst_123 : f32 to vector<4x256xf32>
    %1034 = vector.shape_cast %1029 : vector<1x256xi1> to vector<1x256xi1>
    %1035 = vector.broadcast %1034 : vector<1x256xi1> to vector<4x256xi1>
    %1036 = arith.select %1035, %1033, %1032 : vector<4x256xi1>, vector<4x256xf32>
    %1037 = vector.extract_strided_slice %953 {offsets = [0, 5], sizes = [4, 1], strides = [1, 1]} : vector<4x9xf32> to vector<4x1xf32>
    %1038 = vector.broadcast %1037 : vector<4x1xf32> to vector<4x256xf32>
    %1039 = arith.mulf %1038, %1036 : vector<4x256xf32>
    %1040 = arith.addf %1027, %1039 : vector<4x256xf32>
    %c15_i32_124 = arith.constant 15 : i32
    %1041 = vector.broadcast %c15_i32_124 : i32 to vector<1x256xi32>
    %1042 = arith.cmpi eq, %1, %1041 : vector<1x256xi32>
    %1043 = vector.extract_strided_slice %658 {offsets = [0, 1], sizes = [4, 255], strides = [1, 1]} : vector<4x256xf32> to vector<4x255xf32>
    %1044 = vector.extract_strided_slice %658 {offsets = [0, 0], sizes = [4, 1], strides = [1, 1]} : vector<4x256xf32> to vector<4x1xf32>
    %1045 = tpu.concatenate %1043, %1044 in 1 : vector<4x255xf32>, vector<4x1xf32> -> vector<4x256xf32>
    %cst_125 = arith.constant 0.000000e+00 : f32
    %1046 = vector.broadcast %cst_125 : f32 to vector<4x256xf32>
    %1047 = vector.shape_cast %1042 : vector<1x256xi1> to vector<1x256xi1>
    %1048 = vector.broadcast %1047 : vector<1x256xi1> to vector<4x256xi1>
    %1049 = arith.select %1048, %1046, %1045 : vector<4x256xi1>, vector<4x256xf32>
    %c0_i32_126 = arith.constant 0 : i32
    %1050 = vector.broadcast %c0_i32_126 : i32 to vector<1x256xi32>
    %1051 = arith.cmpi eq, %2, %1050 : vector<1x256xi32>
    %1052 = vector.extract_strided_slice %1049 {offsets = [0, 240], sizes = [4, 16], strides = [1, 1]} : vector<4x256xf32> to vector<4x16xf32>
    %1053 = vector.extract_strided_slice %1049 {offsets = [0, 0], sizes = [4, 240], strides = [1, 1]} : vector<4x256xf32> to vector<4x240xf32>
    %1054 = tpu.concatenate %1052, %1053 in 1 : vector<4x16xf32>, vector<4x240xf32> -> vector<4x256xf32>
    %cst_127 = arith.constant 0.000000e+00 : f32
    %1055 = vector.broadcast %cst_127 : f32 to vector<4x256xf32>
    %1056 = vector.shape_cast %1051 : vector<1x256xi1> to vector<1x256xi1>
    %1057 = vector.broadcast %1056 : vector<1x256xi1> to vector<4x256xi1>
    %1058 = arith.select %1057, %1055, %1054 : vector<4x256xi1>, vector<4x256xf32>
    %1059 = vector.extract_strided_slice %953 {offsets = [0, 6], sizes = [4, 1], strides = [1, 1]} : vector<4x9xf32> to vector<4x1xf32>
    %1060 = vector.broadcast %1059 : vector<4x1xf32> to vector<4x256xf32>
    %1061 = arith.mulf %1060, %1058 : vector<4x256xf32>
    %1062 = arith.addf %1040, %1061 : vector<4x256xf32>
    %c0_i32_128 = arith.constant 0 : i32
    %1063 = vector.broadcast %c0_i32_128 : i32 to vector<1x256xi32>
    %1064 = arith.cmpi eq, %2, %1063 : vector<1x256xi32>
    %1065 = vector.extract_strided_slice %658 {offsets = [0, 240], sizes = [4, 16], strides = [1, 1]} : vector<4x256xf32> to vector<4x16xf32>
    %1066 = vector.extract_strided_slice %658 {offsets = [0, 0], sizes = [4, 240], strides = [1, 1]} : vector<4x256xf32> to vector<4x240xf32>
    %1067 = tpu.concatenate %1065, %1066 in 1 : vector<4x16xf32>, vector<4x240xf32> -> vector<4x256xf32>
    %cst_129 = arith.constant 0.000000e+00 : f32
    %1068 = vector.broadcast %cst_129 : f32 to vector<4x256xf32>
    %1069 = vector.shape_cast %1064 : vector<1x256xi1> to vector<1x256xi1>
    %1070 = vector.broadcast %1069 : vector<1x256xi1> to vector<4x256xi1>
    %1071 = arith.select %1070, %1068, %1067 : vector<4x256xi1>, vector<4x256xf32>
    %1072 = vector.extract_strided_slice %953 {offsets = [0, 7], sizes = [4, 1], strides = [1, 1]} : vector<4x9xf32> to vector<4x1xf32>
    %1073 = vector.broadcast %1072 : vector<4x1xf32> to vector<4x256xf32>
    %1074 = arith.mulf %1073, %1071 : vector<4x256xf32>
    %1075 = arith.addf %1062, %1074 : vector<4x256xf32>
    %c0_i32_130 = arith.constant 0 : i32
    %1076 = vector.broadcast %c0_i32_130 : i32 to vector<1x256xi32>
    %1077 = arith.cmpi eq, %1, %1076 : vector<1x256xi32>
    %1078 = vector.extract_strided_slice %658 {offsets = [0, 255], sizes = [4, 1], strides = [1, 1]} : vector<4x256xf32> to vector<4x1xf32>
    %1079 = vector.extract_strided_slice %658 {offsets = [0, 0], sizes = [4, 255], strides = [1, 1]} : vector<4x256xf32> to vector<4x255xf32>
    %1080 = tpu.concatenate %1078, %1079 in 1 : vector<4x1xf32>, vector<4x255xf32> -> vector<4x256xf32>
    %cst_131 = arith.constant 0.000000e+00 : f32
    %1081 = vector.broadcast %cst_131 : f32 to vector<4x256xf32>
    %1082 = vector.shape_cast %1077 : vector<1x256xi1> to vector<1x256xi1>
    %1083 = vector.broadcast %1082 : vector<1x256xi1> to vector<4x256xi1>
    %1084 = arith.select %1083, %1081, %1080 : vector<4x256xi1>, vector<4x256xf32>
    %c0_i32_132 = arith.constant 0 : i32
    %1085 = vector.broadcast %c0_i32_132 : i32 to vector<1x256xi32>
    %1086 = arith.cmpi eq, %2, %1085 : vector<1x256xi32>
    %1087 = vector.extract_strided_slice %1084 {offsets = [0, 240], sizes = [4, 16], strides = [1, 1]} : vector<4x256xf32> to vector<4x16xf32>
    %1088 = vector.extract_strided_slice %1084 {offsets = [0, 0], sizes = [4, 240], strides = [1, 1]} : vector<4x256xf32> to vector<4x240xf32>
    %1089 = tpu.concatenate %1087, %1088 in 1 : vector<4x16xf32>, vector<4x240xf32> -> vector<4x256xf32>
    %cst_133 = arith.constant 0.000000e+00 : f32
    %1090 = vector.broadcast %cst_133 : f32 to vector<4x256xf32>
    %1091 = vector.shape_cast %1086 : vector<1x256xi1> to vector<1x256xi1>
    %1092 = vector.broadcast %1091 : vector<1x256xi1> to vector<4x256xi1>
    %1093 = arith.select %1092, %1090, %1089 : vector<4x256xi1>, vector<4x256xf32>
    %1094 = vector.extract_strided_slice %953 {offsets = [0, 8], sizes = [4, 1], strides = [1, 1]} : vector<4x9xf32> to vector<4x1xf32>
    %1095 = vector.broadcast %1094 : vector<4x1xf32> to vector<4x256xf32>
    %1096 = arith.mulf %1095, %1093 : vector<4x256xf32>
    %1097 = arith.addf %1075, %1096 : vector<4x256xf32>
    %c0_134 = arith.constant 0 : index
    %c0_135 = arith.constant 0 : index
    %c0_136 = arith.constant 0 : index
    %1098 = vector.load %arg5[%c0_134, %c0_135, %c0_136] : memref<1x4x256xf32, #tpu.memory_space<vmem>>, vector<1x4x256xf32>
    %1099 = vector.shape_cast %1098 : vector<1x4x256xf32> to vector<4x256xf32>
    %1100 = vector.shape_cast %1097 : vector<4x256xf32> to vector<1x4x256xf32>
    tpu.vector_store %arg5[%c0_134, %c0_135, %c0_136], %1100 {strides = array<i32>} : memref<1x4x256xf32, #tpu.memory_space<vmem>>, vector<1x4x256xf32>,
    return
  }
  func.func @transform_0(%arg0: i32) -> (i32, i32) {
    %c0_i32 = arith.constant 0 : i32
    %c0_i32_0 = arith.constant 0 : i32
    %c0_i32_1 = arith.constant 0 : i32
    return %c0_i32, %c0_i32_0 : i32, i32
  }
  func.func @transform_1(%arg0: i32) -> (i32, i32, i32) {
    %c0_i32 = arith.constant 0 : i32
    %c0_i32_0 = arith.constant 0 : i32
    %c0_i32_1 = arith.constant 0 : i32
    %c0_i32_2 = arith.constant 0 : i32
    return %c0_i32, %c0_i32_0, %c0_i32_1 : i32, i32, i32
  }
  func.func @transform_2(%arg0: i32) -> (i32, i32, i32) {
    %c0_i32 = arith.constant 0 : i32
    %c0_i32_0 = arith.constant 0 : i32
    %c0_i32_1 = arith.constant 0 : i32
    return %arg0, %c0_i32, %c0_i32_0 : i32, i32, i32
  }
  func.func @transform_3(%arg0: i32) -> (i32, i32, i32) {
    %c0_i32 = arith.constant 0 : i32
    %c0_i32_0 = arith.constant 0 : i32
    %c0_i32_1 = arith.constant 0 : i32
    return %arg0, %c0_i32, %c0_i32_0 : i32, i32, i32
  }
  func.func @transform_4(%arg0: i32) -> (i32, i32, i32) {
    %c0_i32 = arith.constant 0 : i32
    %c0_i32_0 = arith.constant 0 : i32
    %c0_i32_1 = arith.constant 0 : i32
    return %arg0, %c0_i32, %c0_i32_0 : i32, i32, i32
  }
}

</mosaic_0001>

<bundles_post_ra>
// kernel: tpu_custom_call.1
= control target key start
LH: loop header
LB: loop body
LE: loop exit
PB: predicated region body
PF: predicated region fallthrough
CT: control target
= control target key end

     0   :  { %9 = vsyncpa [#allocation3], 0  ;;  %s3102_s0 = inlined_call_operand.vmem [shape: s32[2,256], index: 0, kind: input, shape index: {}]   ;;  %s3103_s1 = inlined_call_operand.vmem [shape: f32[3,4,9], index: 1, kind: input, shape index: {}]   ;;  %s3104_s2 = inlined_call_operand.vmem [shape: f32[4,4,256], index: 2, kind: input, shape index: {}]   ;;  %s3105_s3 = inlined_call_operand.vmem [shape: f32[4,9,256], index: 3, kind: input, shape index: {}]   ;;  %s3106_s4 = inlined_call_operand.hbm [shape: f32[4,4,256], index: 4, kind: output, shape index: {}]  }
   0x1   :  { %11 = vsyncpa [#allocation3 + $0x1], 0  ;;  %s1769_s15 = smov 0   ;;  %s1771_s16 = smov 0  }
   0x2   :  { %s1773_s17 = smov 0   ;;  %s1775_s18 = smov 0  }
   0x3 LB: > { %s1790_s19 = sadd.s32 4294967295, %s1728_s18   ;;  %s1568_s20 = sadd.s32 4294967294, %s1728_s18   ;;  %s1728_s18 = sphi %s1775_s18, %s3240_s18   ;;  %s1724_s17 = sphi %s1773_s17, %s3239_s17   ;;  %s1720_s16 = sphi %s1771_s16, %s3238_s16   ;;  %s1716_s15 = sphi %s1769_s15, %s3237_s15  }
   0x4   : > { %s1794_s21 = sadd.s32 1, %s1728_s18   ;;  %s118_s22 = sadd.s32 1, %s1724_s17 }
   0x5   : > { %s115_s23 = ssub.s32 %s1728_s18, %s1794_s21  ;;  %p128_p0 = scmp.ne.s32.totalorder %s1724_s17, %s1720_s16 }
   0x6   : > { %p116_p1 = scmp.eq.s32.totalorder %s115_s23, 0  ;;  %p129_p2 = scmp.eq.s32.totalorder %s1790_s19, 3 }
   0x7   : > { %p134_p3 = scmp.ne.s32.totalorder %s1720_s16, %s1716_s15  ;;  %p135_p4 = scmp.eq.s32.totalorder %s1568_s20, 3 }
   0x8   : > { %s1805_s24 = scalar_select %p116_p1, %s1724_s17, %s118_s22  }
   0x9   : > { %p1807_p5 = por %p129_p2, %p128_p0  ;;  %p1811_p6 = por %p135_p4, %p134_p3 }
   0xa   : > { %p1571_p7 = scmp.ge.s32.totalorder %s1728_s18, 1  ;;  %p175_p8 = scmp.lt.s32.totalorder %s1728_s18, 5 }
   0xc   : > { %p176_p9 = pnand %p1571_p7, %p175_p8 }
   0xe   : > { %179 = sbr.rel (%p176_p9) target bundleno = 872 (0x368), region = 36 }
  0x13   : > { %p206_p10 = scmp.lt.s32.totalorder %s1790_s19, 3  ;;  %v1730_v0 = vmov 1   ;;  %v1731_v1 = vmov 0   ;;  %s1732_s6 = smov 127   ;;  %v222_v4 = vld [vmem:[%s3103_s1] sm:$0xf]  ;;  %v249_v13 = vlaneseq }
  0x14   : > { %1640 = vset.pattern.permute.xlu1 %v1730_v0  ;;  %1639 = vset.pattern.permute.xlu0 %v1731_v1  ;;  %s1733_s7 = smov 1   ;;  %v1734_v5 = vmov 2   ;;  %s1735_s10 = smov 16   ;;  %v1736_v6 = vmov 3   ;;  %v1738_v7 = vmov 5   ;;  %v1739_v8 = vmov 4  }
  0x15   : > { %s1821_s27 = scalar_select %p206_p10, %s1790_s19, 3  ;;  %v1740_v9 = vmov 6   ;;  %v1741_v10 = vmov 7   ;;  %v1742_v11 = vmov 8   ;;  %v1863_v12 = vld [vmem:[%s3103_s1 + $0x4] sm:$0xf] }
  0x16   : > { %s1737_s11 = smov 112   ;;  %v216_v14 = vld [vmem:[%s3102_s0] sm:$0xf]  ;;  %v1871_v15 = vshrl.u32 %v249_v13, 7  ;;  %vm242_vm2 = vcmask 1039360   ;;  %vm233_vm3 = vcmask 7168  }
  0x17   : > { %s1584_s28 = sshll.u32 %s1821_s27, 3  ;;  %vm225_vm0 = vcmp.eq.s32.totalorder %v216_v14, 0  ;;  %vm331_vm1 = vcmp.eq.s32.totalorder %v216_v14, 15  ;;  %v224_v40 = vld [vmem:[%s3103_s1 + $0x8] sm:$0xf]  ;;  %vm276_vm8 = vcmask 130048  }
  0x18   : > { %s210_s5 = scalar_lea.vmem %s3104_s2, %s1584_s28  ;;  %v1874_v16 = vsub.s32 0, %v1871_v15  ;;  %v1877_v17 = vsub.s32 2, %v1871_v15  ;;  %v1880_v18 = vsel %vm225_vm0, 1, %v1731_v1  ;;  %v1893_v24 = vsel %vm331_vm1, 1, %v1731_v1  ;;  %s1585_s28 = sshll.u32 %s1821_s27, 5 }
  0x19   : > { %v1827_v2 = vld [vmem:[%s210_s5] sm:$0xff]  ;;  %v1993_v55 = vsub.s32 1, %v1871_v15  ;;  %v1996_v56 = vsub.s32 3, %v1871_v15  ;;  %vm285_vm9 = vcmask 916480   ;;  %s2412_s5 = scalar_lea.vmem %s3105_s3, %s1585_s28  ;;  %s203_s27 = sand.u32 1, %s1720_s16  }
  0x1a   : > { %238 = vrot.lane.b32.xlu1 %v1827_v2, %s1732_s6  ;;  %v1833_v3 = vcombine.high %v1827_v2, %v1827_v2  ;;  %v252_v19 = vrot.slane %v1880_v18, %v1874_v16  ;;  %v256_v20 = vrot.slane %v1880_v18, %v1877_v17  ;;  %v336_v27 = vrot.slane %v1893_v24, %v1874_v16  ;;  %s1483_s13 = scalar_lea.sflag [#allocation3], %s203_s27  ;;  %s1743_s20 = smov [#allocation2]  }
  0x1b   : > { %v340_v28 = vrot.slane %v1893_v24, %v1877_v17  ;;  %v294_v59 = vrot.slane %v1880_v18, %v1993_v55  ;;  %v298_v60 = vrot.slane %v1880_v18, %v1996_v56 }
  0x1c   : > { %228 = vrot.lane.b32.xlu0 %v1833_v3, %s1733_s7  ;;  %v1887_v22 = vrot.slane %v252_v19, %v1874_v16  ;;  %v1890_v23 = vrot.slane %v256_v20, %v1874_v16  ;;  %v1914_v36 = vrot.slane %v336_v27, %v1874_v16 }
  0x1d   : > { %v1917_v37 = vrot.slane %v340_v28, %v1874_v16  ;;  %v2003_v62 = vrot.slane %v294_v59, %v1993_v55  ;;  %v2006_v63 = vrot.slane %v298_v60, %v1993_v55 }
  0x1e   : > { %240 = vrot.lane.b32.xlu1 %v1833_v3, %s1732_s6  ;;  %3173 = vst [vmem:[#allocation5_spill] sm:$0xff] %v1887_v22  ;;  %3174 = vst [vmem:[#allocation6_spill] sm:$0xff] %v1890_v23  ;;  %vm265_vm4 = vcmp.eq.s32.totalorder %v1887_v22, 1  ;;  %vm266_vm5 = vcmp.eq.s32.totalorder %v1890_v23, 1  ;;  %vm349_vm7 = vcmp.eq.s32.totalorder %v1914_v36, 1 }
  0x1f   : > { %3175 = vst [vmem:[#allocation7_spill] sm:$0xff] %v1914_v36  ;;  %3176 = vst [vmem:[#allocation8_spill] sm:$0xff] %v1917_v37  ;;  %vm350_vm6 = vcmp.eq.s32.totalorder %v1917_v37, 1  ;;  %vm307_vm10 = vcmp.eq.s32.totalorder %v2003_v62, 1  ;;  %vm308_vm11 = vcmp.eq.s32.totalorder %v2006_v63, 1 }
  0x20   : > { %231 = vrot.lane.b32.xlu0 %v1827_v2, %s1733_s7 }
  0x22   : > { %409 = vperm.xlu1 %1640, %v222_v4  }
  0x24   : > { %401 = vperm.xlu0 %1639, %v222_v4  }
  0x26   : > { %1641 = vset.pattern.permute.xlu1 %v1734_v5 }
  0x27   : > { %417 = vperm.xlu1 %1641, %v222_v4  }
  0x28   : > { %311 = vrot.lane.b32.xlu0 %v1833_v3, %s1735_s10 }
  0x29   : > { %1642 = vset.pattern.permute.xlu0 %v1736_v6 }
  0x2b   : > { %314 = vrot.lane.b32.xlu1 %v1827_v2, %s1735_s10 }
  0x2c   : > { %320 = vrot.lane.b32.xlu0 %v1827_v2, %s1737_s11  ;;  %1644 = vset.pattern.permute.xlu1 %v1738_v7 }
  0x2f   : > { %322 = vrot.lane.b32.xlu1 %v1833_v3, %s1737_s11 }
  0x30   : > { %425 = vperm.xlu0 %1642, %v222_v4  }
  0x33   : > { %442 = vperm.xlu1 %1644, %v222_v4  }
  0x34   : > { %1643 = vset.pattern.permute.xlu0 %v1739_v8 }
  0x35   : > { %433 = vperm.xlu0 %1643, %v222_v4  }
  0x37   : > { %1645 = vset.pattern.permute.xlu1 %v1740_v9 }
  0x38   : > { %450 = vperm.xlu1 %1645, %v222_v4  }
  0x39   : > { %1646 = vset.pattern.permute.xlu0 %v1741_v10 }
  0x3a   : > { %458 = vperm.xlu0 %1646, %v222_v4  }
  0x3c   : > { %1647 = vset.pattern.permute.xlu1 %v1742_v11 }
  0x3d   : > { %466 = vperm.xlu1 %1647, %v222_v4  }
  0x3e   : > { %1649 = vset.pattern.permute.xlu0 %v1730_v0 }
  0x41   : > { %1648 = vset.pattern.permute.xlu1 %v1731_v1 }
  0x42   : > { %475 = vperm.xlu1 %1648, %v1863_v12  }
  0x46   : > { %1650 = vset.pattern.permute.xlu1 %v1734_v5 }
  0x8c   : > { %v239_v21 = vpop.permute.xlu1 %238 }
  0x8e   : > { %v229_v25 = vpop.permute.xlu0 %228 }
  0x90   : > { %v241_v26 = vpop.permute.xlu1 %240 }
  0x91   : > { %v243_v30 = vsel %vm242_vm2, %v239_v21, %v241_v26  ;;  %v247_v31 = vsel %vm242_vm2, %v241_v26, %v239_v21  ;;  %v382_v21 = vrot.slane %v1893_v24, %v1996_v56 }
  0x92   : > { %v232_v29 = vpop.permute.xlu0 %231 }
  0x93   : > { %v234_v32 = vsel %vm233_vm3, %v232_v29, %v229_v25  ;;  %v237_v33 = vsel %vm233_vm3, %v229_v25, %v232_v29 }
  0x94   : > { %v1907_v34 = vsel %vm265_vm4, %v243_v30, %v237_v33  ;;  %v1911_v35 = vsel %vm266_vm5, %v247_v31, %v234_v32  ;;  %v1931_v38 = vsel %vm350_vm6, %v234_v32, %v247_v31  ;;  %v1935_v39 = vsel %vm349_vm7, %v237_v33, %v243_v30 }
  0x95   : > { %274 = vrot.lane.b32.xlu1 %v1907_v34, %s1735_s10  ;;  %270 = vrot.lane.b32.xlu0 %v1911_v35, %s1735_s10 }
  0x99   : > { %283 = vrot.lane.b32.xlu1 %v1911_v35, %s1737_s11  ;;  %281 = vrot.lane.b32.xlu0 %v1907_v34, %s1737_s11 }
  0x9d   : > { %354 = vrot.lane.b32.xlu1 %v1931_v38, %s1735_s10  ;;  %364 = vrot.lane.b32.xlu0 %v1935_v39, %s1737_s11  ;;  %v1971_v41 = vpop.permute.xlu1 %409 }
  0x9e   : > { %3177 = vst [vmem:[#allocation9_spill] sm:$0xff] %v1971_v41 }
  0x9f   : > { %v1976_v44 = vpop.permute.xlu0 %401 }
  0xa0   : > { %3179 = vst [vmem:[#allocation11_spill] sm:$0xff] %v1976_v44 }
  0xa1   : > { %358 = vrot.lane.b32.xlu1 %v1935_v39, %s1735_s10  ;;  %483 = vperm.xlu0 %1649, %v1863_v12  }
  0xa2   : > { %v1974_v42 = vpop.permute.xlu1 %417 }
  0xa3   : > { %3178 = vst [vmem:[#allocation10_spill] sm:$0xff] %v1974_v42  ;;  %v312_v46 = vpop.permute.xlu0 %311 }
  0xa5   : > { %366 = vrot.lane.b32.xlu1 %v1931_v38, %s1737_s11  ;;  %1652 = vset.pattern.permute.xlu0 %v1739_v8 }
  0xa6   : > { %507 = vperm.xlu0 %1652, %v1863_v12   ;;  %v315_v43 = vpop.permute.xlu1 %314 }
  0xa7   : > { %v321_v48 = vpop.permute.xlu0 %320 }
  0xa9   : > { %491 = vperm.xlu1 %1650, %v1863_v12  }
  0xaa   : > { %1655 = vset.pattern.permute.xlu0 %v1741_v10  ;;  %v323_v45 = vpop.permute.xlu1 %322 }
  0xab   : > { %531 = vperm.xlu0 %1655, %v1863_v12   ;;  %v1982_v50 = vpop.permute.xlu0 %425 }
  0xac   : > { %3182 = vst [vmem:[#allocation14_spill] sm:$0xff] %v1982_v50  ;;  %v428_v60 = vmul.f32 %v1982_v50, %v1907_v34 }
  0xad   : > { %1651 = vset.pattern.permute.xlu1 %v1736_v6 }
  0xae   : > { %499 = vperm.xlu1 %1651, %v1863_v12   ;;  %v1978_v47 = vpop.permute.xlu1 %442 }
  0xaf   : > { %1658 = vset.pattern.permute.xlu0 %v1730_v0  ;;  %3180 = vst [vmem:[#allocation12_spill] sm:$0xff] %v1978_v47 }
  0xb0   : > { %556 = vperm.xlu0 %1658, %v224_v40   ;;  %v1986_v52 = vpop.permute.xlu0 %433 }
  0xb1   : > { %3184 = vst [vmem:[#allocation16_spill] sm:$0xff] %v1986_v52 }
  0xb2   : > { %1653 = vset.pattern.permute.xlu1 %v1738_v7 }
  0xb3   : > { %515 = vperm.xlu1 %1653, %v1863_v12   ;;  %v1980_v49 = vpop.permute.xlu1 %450 }
  0xb4   : > { %1661 = vset.pattern.permute.xlu0 %v1739_v8  ;;  %3181 = vst [vmem:[#allocation13_spill] sm:$0xff] %v1980_v49  ;;  %v324_v8 = vsel %vm285_vm9, %v321_v48, %v323_v45 }
  0xb5   : > { %580 = vperm.xlu0 %1661, %v224_v40   ;;  %v1990_v54 = vpop.permute.xlu0 %458 }
  0xb6   : > { %3186 = vst [vmem:[#allocation18_spill] sm:$0xff] %v1990_v54 }
  0xb7   : > { %1654 = vset.pattern.permute.xlu1 %v1740_v9 }
  0xb8   : > { %523 = vperm.xlu1 %1654, %v1863_v12   ;;  %v1984_v51 = vpop.permute.xlu1 %466 }
  0xb9   : > { %1664 = vset.pattern.permute.xlu0 %v1741_v10  ;;  %3183 = vst [vmem:[#allocation15_spill] sm:$0xff] %v1984_v51 }
  0xba   : > { %604 = vperm.xlu0 %1664, %v224_v40  }
  0xbc   : > { %1656 = vset.pattern.permute.xlu1 %v1742_v11 }
  0xbd   : > { %539 = vperm.xlu1 %1656, %v1863_v12   ;;  %v1988_v53 = vpop.permute.xlu1 %475  ;;  %v378_v12 = vrot.slane %v1893_v24, %v1993_v55 }
  0xbe   : > { %1666 = vset.pattern.permute.xlu0 %v1742_v11  ;;  %3185 = vst [vmem:[#allocation17_spill] sm:$0xff] %v1988_v53 }
  0xbf   : > { %v2043_v27 = vrot.slane %v378_v12, %v1993_v55  ;;  %v437_v12 = vmul.f32 %v1986_v52, %v1827_v2 }
  0xc1   : > { %1657 = vset.pattern.permute.xlu1 %v1731_v1  ;;  %vm391_vm12 = vcmp.eq.s32.totalorder %v2043_v27, 1 }
  0xc2   : > { %548 = vperm.xlu1 %1657, %v224_v40  }
  0xc6   : > { %1659 = vset.pattern.permute.xlu1 %v1734_v5 }
  0xc7   : > { %564 = vperm.xlu1 %1659, %v224_v40  }
  0xcb   : > { %1660 = vset.pattern.permute.xlu1 %v1736_v6  ;;  %v316_v6 = vsel %vm276_vm8, %v315_v43, %v312_v46 }
  0xcc   : > { %572 = vperm.xlu1 %1660, %v224_v40  }
  0xd0   : > { %1662 = vset.pattern.permute.xlu1 %v1738_v7  ;;  %v319_v7 = vsel %vm276_vm8, %v312_v46, %v315_v43  ;;  %v2054_v43 = vrot.slane %v382_v21, %v1993_v55 }
  0xd1   : > { %588 = vperm.xlu1 %1662, %v224_v40   ;;  %v2030_v19 = vsel %vm307_vm10, %v324_v8, %v319_v7 }
  0xd2   : > { %v412_v28 = vmul.f32 %v1971_v41, %v2030_v19  ;;  %vm392_vm13 = vcmp.eq.s32.totalorder %v2054_v43, 1 }
  0xd5   : > { %1663 = vset.pattern.permute.xlu1 %v1740_v9  ;;  %v328_v9 = vsel %vm285_vm9, %v323_v45, %v321_v48 }
  0xd6   : > { %596 = vperm.xlu1 %1663, %v224_v40   ;;  %v2034_v20 = vsel %vm308_vm11, %v328_v9, %v316_v6 }
  0xd7   : > { %v413_v29 = vmul.f32 %v1971_v41, %v2034_v20  ;;  %v765_v41 = vsub.s32 6, %v1871_v15 }
  0xda   : > { %1665 = vset.pattern.permute.xlu1 %v1742_v11 }
  0xdb   : > { %612 = vperm.xlu1 %1665, %v224_v40  }
 0x107   : > { %v275_v57 = vpop.permute.xlu1 %274  ;;  %v271_v58 = vpop.permute.xlu0 %270 }
 0x108   : > { %v277_v10 = vsel %vm276_vm8, %v275_v57, %v271_v58  ;;  %v280_v11 = vsel %vm276_vm8, %v271_v58, %v275_v57 }
 0x10b   : > { %v284_v61 = vpop.permute.xlu1 %283  ;;  %v282_v0 = vpop.permute.xlu0 %281 }
 0x10c   : > { %v286_v4 = vsel %vm285_vm9, %v282_v0, %v284_v61  ;;  %v290_v5 = vsel %vm285_vm9, %v284_v61, %v282_v0  ;;  %v429_v61 = vmul.f32 %v1982_v50, %v1911_v35  ;;  %v788_v50 = vsub.s32 7, %v1871_v15 }
 0x10d   : > { %v2022_v13 = vsel %vm307_vm10, %v286_v4, %v280_v11  ;;  %v2026_v14 = vsel %vm308_vm11, %v290_v5, %v277_v10  ;;  %v2080_v21 = vsel %vm391_vm12, %v280_v11, %v286_v4  ;;  %v2098_v11 = vsel %vm392_vm13, %v316_v6, %v328_v9 }
 0x10e   : > { %v404_v25 = vmul.f32 %v1976_v44, %v2022_v13  ;;  %v405_v26 = vmul.f32 %v1976_v44, %v2026_v14  ;;  %v462_v9 = vmul.f32 %v1990_v54, %v2098_v11 }
 0x10f   : > { %v355_v1 = vpop.permute.xlu1 %354  ;;  %v365_v30 = vpop.permute.xlu0 %364 }
 0x110   : > { %v414_v48 = vadd.f32 %v412_v28, %v404_v25  ;;  %v415_v57 = vadd.f32 %v413_v29, %v405_v26  ;;  %v2084_v28 = vsel %vm391_vm12, %v319_v7, %v324_v8  ;;  %v2088_v29 = vsel %vm392_vm13, %v277_v10, %v290_v5 }
 0x111   : > { %v453_v7 = vmul.f32 %v1980_v49, %v2080_v21  ;;  %v454_v5 = vmul.f32 %v1980_v49, %v2088_v29 }
 0x113   : > { %v359_v18 = vpop.permute.xlu1 %358 }
 0x114   : > { %v360_v32 = vsel %vm276_vm8, %v359_v18, %v355_v1  ;;  %v363_v24 = vsel %vm276_vm8, %v355_v1, %v359_v18  ;;  %v438_v18 = vmul.f32 %v1986_v52, %v1833_v3 }
 0x117   : > { %v367_v31 = vpop.permute.xlu1 %366 }
 0x118   : > { %v368_v33 = vsel %vm285_vm9, %v365_v30, %v367_v31  ;;  %v372_v40 = vsel %vm285_vm9, %v367_v31, %v365_v30  ;;  %v445_v30 = vmul.f32 %v1978_v47, %v1935_v39  ;;  %v446_v31 = vmul.f32 %v1978_v47, %v1931_v38 }
 0x119   : > { %v2058_v45 = vsel %vm307_vm10, %v368_v33, %v363_v24  ;;  %v2062_v46 = vsel %vm308_vm11, %v372_v40, %v360_v32  ;;  %v2106_v8 = vsel %vm391_vm12, %v363_v24, %v368_v33 }
 0x11a   : > { %v420_v58 = vmul.f32 %v1974_v42, %v2058_v45  ;;  %v421_v59 = vmul.f32 %v1974_v42, %v2062_v46 }
 0x11c   : > { %v422_v0 = vadd.f32 %v420_v58, %v414_v48  ;;  %v423_v1 = vadd.f32 %v421_v59, %v415_v57  ;;  %v2094_v4 = vpop.permute.xlu0 %483  ;;  %v461_v59 = vmul.f32 %v1990_v54, %v2084_v28 }
 0x11d   : > { %3187 = vst [vmem:[#allocation19_spill] sm:$0xff] %v2094_v4  ;;  %v486_v6 = vmul.f32 %v2094_v4, %v2030_v19  ;;  %v487_v24 = vmul.f32 %v2094_v4, %v2034_v20 }
 0x11e   : > { %v430_v25 = vadd.f32 %v428_v60, %v422_v0  ;;  %v431_v26 = vadd.f32 %v429_v61, %v423_v1  ;;  %v2112_v60 = vsel %vm392_vm13, %v360_v32, %v372_v40  ;;  %v478_v1 = vmul.f32 %v1988_v53, %v2022_v13 }
 0x11f   : > { %v479_v32 = vmul.f32 %v1988_v53, %v2026_v14  ;;  %v469_v40 = vmul.f32 %v1984_v51, %v2106_v8 }
 0x120   : > { %v439_v48 = vadd.f32 %v437_v12, %v430_v25  ;;  %v440_v57 = vadd.f32 %v438_v18, %v431_v26  ;;  %v470_v26 = vmul.f32 %v1984_v51, %v2112_v60 }
 0x122   : > { %v447_v10 = vadd.f32 %v445_v30, %v439_v48  ;;  %v448_v58 = vadd.f32 %v446_v31, %v440_v57  ;;  %v488_v31 = vadd.f32 %v486_v6, %v478_v1  ;;  %v2148_v6 = vpop.permute.xlu0 %507 }
 0x123   : > { %3190 = vst [vmem:[#allocation22_spill] sm:$0xff] %v2148_v6 }
 0x124   : > { %v455_v61 = vadd.f32 %v453_v7, %v447_v10  ;;  %v456_v0 = vadd.f32 %v454_v5, %v448_v58  ;;  %v2120_v33 = vpop.permute.xlu1 %491  ;;  %v489_v7 = vadd.f32 %v487_v24, %v479_v32 }
 0x125   : > { %3188 = vst [vmem:[#allocation20_spill] sm:$0xff] %v2120_v33  ;;  %v494_v12 = vmul.f32 %v2120_v33, %v2058_v45  ;;  %v495_v30 = vmul.f32 %v2120_v33, %v2062_v46 }
 0x126   : > { %v463_v18 = vadd.f32 %v461_v59, %v455_v61  ;;  %v464_v25 = vadd.f32 %v462_v9, %v456_v0  ;;  %v510_v61 = vmul.f32 %v2148_v6, %v1827_v2  ;;  %v511_v0 = vmul.f32 %v2148_v6, %v1833_v3 }
 0x127   : > { %v496_v5 = vadd.f32 %v494_v12, %v488_v31  ;;  %v497_v58 = vadd.f32 %v495_v30, %v489_v7 }
 0x128   : > { %v2134_v48 = vadd.f32 %v469_v40, %v463_v18  ;;  %v2136_v57 = vadd.f32 %v470_v26, %v464_v25  ;;  %v2164_v26 = vpop.permute.xlu0 %531 }
 0x129   : > { %v2138_v10 = vpop.permute.xlu1 %499  ;;  %3192 = vst [vmem:[#allocation24_spill] sm:$0xff] %v2164_v26 }
 0x12a   : > { %3189 = vst [vmem:[#allocation21_spill] sm:$0xff] %v2138_v10  ;;  %v502_v59 = vmul.f32 %v2138_v10, %v1907_v34  ;;  %v503_v9 = vmul.f32 %v2138_v10, %v1911_v35  ;;  %620 = vrot.lane.b32.xlu1 %v2136_v57, %s1733_s7  ;;  %624 = vrot.lane.b32.xlu0 %v2134_v48, %s1733_s7 }
 0x12c   : > { %v504_v24 = vadd.f32 %v502_v59, %v496_v5  ;;  %v505_v1 = vadd.f32 %v503_v9, %v497_v58  ;;  %v534_v59 = vmul.f32 %v2164_v26, %v2084_v28  ;;  %v535_v9 = vmul.f32 %v2164_v26, %v2098_v11 }
 0x12d   : > { %v742_v26 = vsub.s32 5, %v1871_v15 }
 0x12e   : > { %v2154_v32 = vpop.permute.xlu1 %515  ;;  %680 = vrot.lane.b32.xlu1 %v2134_v48, %s1732_s6  ;;  %682 = vrot.lane.b32.xlu0 %v2136_v57, %s1732_s6  ;;  %v512_v40 = vadd.f32 %v510_v61, %v504_v24  ;;  %v513_v12 = vadd.f32 %v511_v0, %v505_v1 }
 0x12f   : > { %3191 = vst [vmem:[#allocation23_spill] sm:$0xff] %v2154_v32  ;;  %v518_v18 = vmul.f32 %v2154_v32, %v1935_v39  ;;  %v519_v25 = vmul.f32 %v2154_v32, %v1931_v38 }
 0x131   : > { %v520_v31 = vadd.f32 %v518_v18, %v512_v40  ;;  %v521_v7 = vadd.f32 %v519_v25, %v513_v12 }
 0x133   : > { %v2166_v30 = vpop.permute.xlu1 %523 }
 0x134   : > { %3193 = vst [vmem:[#allocation25_spill] sm:$0xff] %v2166_v30  ;;  %v526_v5 = vmul.f32 %v2166_v30, %v2080_v21  ;;  %v527_v58 = vmul.f32 %v2166_v30, %v2088_v29 }
 0x136   : > { %v528_v61 = vadd.f32 %v526_v5, %v520_v31  ;;  %v529_v0 = vadd.f32 %v527_v58, %v521_v7  ;;  %v2192_v31 = vpop.permute.xlu0 %556 }
 0x137   : > { %3196 = vst [vmem:[#allocation28_spill] sm:$0xff] %v2192_v31  ;;  %v559_v58 = vmul.f32 %v2192_v31, %v2030_v19 }
 0x138   : > { %v2176_v24 = vpop.permute.xlu1 %539  ;;  %v536_v1 = vadd.f32 %v534_v59, %v528_v61  ;;  %v537_v32 = vadd.f32 %v535_v9, %v529_v0  ;;  %v560_v59 = vmul.f32 %v2192_v31, %v2034_v20 }
 0x139   : > { %3194 = vst [vmem:[#allocation26_spill] sm:$0xff] %v2176_v24  ;;  %v542_v40 = vmul.f32 %v2176_v24, %v2106_v8  ;;  %v543_v12 = vmul.f32 %v2176_v24, %v2112_v60 }
 0x13b   : > { %v2182_v18 = vadd.f32 %v542_v40, %v536_v1  ;;  %v2184_v25 = vadd.f32 %v543_v12, %v537_v32 }
 0x13d   : > { %v2186_v30 = vpop.permute.xlu1 %548  ;;  %824 = vrot.lane.b32.xlu1 %v2184_v25, %s1733_s7  ;;  %828 = vrot.lane.b32.xlu0 %v2182_v18, %s1733_s7 }
 0x13e   : > { %3195 = vst [vmem:[#allocation27_spill] sm:$0xff] %v2186_v30  ;;  %v551_v32 = vmul.f32 %v2186_v30, %v2022_v13  ;;  %v552_v7 = vmul.f32 %v2186_v30, %v2026_v14  ;;  %v2218_v30 = vpop.permute.xlu0 %580 }
 0x13f   : > { %3199 = vst [vmem:[#allocation31_spill] sm:$0xff] %v2218_v30  ;;  %v583_v20 = vmul.f32 %v2218_v30, %v1827_v2 }
 0x140   : > { %v561_v0 = vadd.f32 %v559_v58, %v551_v32  ;;  %v562_v1 = vadd.f32 %v560_v59, %v552_v7 }
 0x141   : > { %868 = vrot.lane.b32.xlu1 %v2182_v18, %s1732_s6  ;;  %870 = vrot.lane.b32.xlu0 %v2184_v25, %s1732_s6 }
 0x142   : > { %v2202_v5 = vpop.permute.xlu1 %564 }
 0x143   : > { %3197 = vst [vmem:[#allocation29_spill] sm:$0xff] %v2202_v5  ;;  %v567_v9 = vmul.f32 %v2202_v5, %v2058_v45  ;;  %v568_v61 = vmul.f32 %v2202_v5, %v2062_v46  ;;  %v584_v45 = vmul.f32 %v2218_v30, %v1833_v3 }
 0x145   : > { %v569_v40 = vadd.f32 %v567_v9, %v561_v0  ;;  %v570_v14 = vadd.f32 %v568_v61, %v562_v1  ;;  %v2230_v9 = vpop.permute.xlu0 %604 }
 0x146   : > { %3201 = vst [vmem:[#allocation33_spill] sm:$0xff] %v2230_v9 }
 0x147   : > { %v2212_v13 = vpop.permute.xlu1 %572 }
 0x148   : > { %3198 = vst [vmem:[#allocation30_spill] sm:$0xff] %v2212_v13  ;;  %v575_v12 = vmul.f32 %v2212_v13, %v1907_v34  ;;  %v576_v19 = vmul.f32 %v2212_v13, %v1911_v35 }
 0x14a   : > { %v577_v46 = vadd.f32 %v575_v12, %v569_v40  ;;  %v578_v32 = vadd.f32 %v576_v19, %v570_v14  ;;  %v607_v40 = vmul.f32 %v2230_v9, %v2084_v28 }
 0x14c   : > { %v2224_v7 = vpop.permute.xlu1 %588  ;;  %v585_v58 = vadd.f32 %v583_v20, %v577_v46  ;;  %v586_v59 = vadd.f32 %v584_v45, %v578_v32 }
 0x14d   : > { %3200 = vst [vmem:[#allocation32_spill] sm:$0xff] %v2224_v7  ;;  %v591_v34 = vmul.f32 %v2224_v7, %v1935_v39  ;;  %v592_v35 = vmul.f32 %v2224_v7, %v1931_v38  ;;  %v608_v39 = vmul.f32 %v2230_v9, %v2098_v11  ;;  %v219_v9 = vld [vmem:[%s2412_s5 + $0x8] sm:$0xff] }
 0x14e   : > { %v2429_v5 = vrot.slane %v219_v9, %v1874_v16  ;;  %v2435_v24 = vrot.slane %v219_v9, %v1996_v56 }
 0x14f   : > { %v593_v2 = vadd.f32 %v591_v34, %v585_v58  ;;  %v594_v0 = vadd.f32 %v592_v35, %v586_v59 }
 0x151   : > { %v2232_v61 = vpop.permute.xlu1 %596 }
 0x152   : > { %3202 = vst [vmem:[#allocation34_spill] sm:$0xff] %v2232_v61  ;;  %v599_v3 = vmul.f32 %v2232_v61, %v2080_v21  ;;  %v600_v1 = vmul.f32 %v2232_v61, %v2088_v29 }
 0x154   : > { %v601_v14 = vadd.f32 %v599_v3, %v593_v2  ;;  %v602_v38 = vadd.f32 %v600_v1, %v594_v0 }
 0x156   : > { %v2242_v12 = vpop.permute.xlu1 %612  ;;  %v609_v19 = vadd.f32 %v607_v40, %v601_v14  ;;  %v610_v20 = vadd.f32 %v608_v39, %v602_v38 }
 0x157   : > { %3203 = vst [vmem:[#allocation35_spill] sm:$0xff] %v2242_v12  ;;  %v615_v45 = vmul.f32 %v2242_v12, %v2106_v8  ;;  %v616_v21 = vmul.f32 %v2242_v12, %v2112_v60 }
 0x159   : > { %v2248_v46 = vadd.f32 %v615_v45, %v609_v19  ;;  %v2250_v29 = vadd.f32 %v616_v21, %v610_v20 }
 0x15b   : > { %956 = vrot.lane.b32.xlu1 %v2250_v29, %s1733_s7  ;;  %960 = vrot.lane.b32.xlu0 %v2248_v46, %s1733_s7 }
 0x15f   : > { %1000 = vrot.lane.b32.xlu1 %v2248_v46, %s1732_s6  ;;  %1002 = vrot.lane.b32.xlu0 %v2250_v29, %s1732_s6 }
 0x163   : > { %657 = vrot.lane.b32.xlu1 %v2136_v57, %s1735_s10  ;;  %660 = vrot.lane.b32.xlu0 %v2134_v48, %s1735_s10 }
 0x167   : > { %775 = vrot.lane.b32.xlu1 %v2134_v48, %s1737_s11  ;;  %777 = vrot.lane.b32.xlu0 %v2136_v57, %s1737_s11 }
 0x16b   : > { %853 = vrot.lane.b32.xlu1 %v2184_v25, %s1735_s10  ;;  %856 = vrot.lane.b32.xlu0 %v2182_v18, %s1735_s10 }
 0x16f   : > { %923 = vrot.lane.b32.xlu1 %v2182_v18, %s1737_s11  ;;  %925 = vrot.lane.b32.xlu0 %v2184_v25, %s1737_s11 }
 0x19c   : > { %v621_v28 = vpop.permute.xlu1 %620  ;;  %v625_v11 = vpop.permute.xlu0 %624 }
 0x19d   : > { %v626_v8 = vsel %vm233_vm3, %v625_v11, %v621_v28  ;;  %v629_v60 = vsel %vm233_vm3, %v621_v28, %v625_v11 }
 0x19e   : > { %v2281_v32 = vsel %vm265_vm4, %v2134_v48, %v629_v60  ;;  %v2286_v58 = vsel %vm266_vm5, %v2136_v57, %v626_v8 }
 0x19f   : > { %637 = vrot.lane.b32.xlu0 %v2281_v32, %s1735_s10  ;;  %633 = vrot.lane.b32.xlu1 %v2286_v58, %s1735_s10 }
 0x1a0   : > { %v681_v59 = vpop.permute.xlu1 %680  ;;  %v683_v34 = vpop.permute.xlu0 %682 }
 0x1a1   : > { %v684_v35 = vsel %vm242_vm2, %v681_v59, %v683_v34  ;;  %v688_v2 = vsel %vm242_vm2, %v683_v34, %v681_v59 }
 0x1a2   : > { %v2297_v0 = vsel %vm349_vm7, %v2134_v48, %v684_v35  ;;  %v2302_v3 = vsel %vm350_vm6, %v2136_v57, %v688_v2 }
 0x1a3   : > { %692 = vrot.lane.b32.xlu1 %v2302_v3, %s1735_s10  ;;  %696 = vrot.lane.b32.xlu0 %v2297_v0, %s1735_s10 }
 0x1a7   : > { %752 = vrot.lane.b32.xlu1 %v2281_v32, %s1737_s11  ;;  %754 = vrot.lane.b32.xlu0 %v2286_v58, %s1737_s11 }
 0x1ab   : > { %798 = vrot.lane.b32.xlu1 %v2297_v0, %s1737_s11  ;;  %800 = vrot.lane.b32.xlu0 %v2302_v3, %s1737_s11 }
 0x1af   : > { %v825_v1 = vpop.permute.xlu1 %824  ;;  %v829_v40 = vpop.permute.xlu0 %828 }
 0x1b0   : > { %v830_v39 = vsel %vm233_vm3, %v829_v40, %v825_v1  ;;  %v833_v14 = vsel %vm233_vm3, %v825_v1, %v829_v40 }
 0x1b1   : > { %v2321_v38 = vsel %vm265_vm4, %v2182_v18, %v833_v14  ;;  %v2326_v19 = vsel %vm266_vm5, %v2184_v25, %v830_v39 }
 0x1b2   : > { %841 = vrot.lane.b32.xlu0 %v2321_v38, %s1735_s10  ;;  %837 = vrot.lane.b32.xlu1 %v2326_v19, %s1735_s10 }
 0x1b3   : > { %v869_v20 = vpop.permute.xlu1 %868  ;;  %v871_v45 = vpop.permute.xlu0 %870 }
 0x1b4   : > { %v872_v21 = vsel %vm242_vm2, %v869_v20, %v871_v45  ;;  %v876_v28 = vsel %vm242_vm2, %v871_v45, %v869_v20 }
 0x1b5   : > { %v2337_v11 = vsel %vm349_vm7, %v2182_v18, %v872_v21  ;;  %v2342_v8 = vsel %vm350_vm6, %v2184_v25, %v876_v28 }
 0x1b6   : > { %880 = vrot.lane.b32.xlu1 %v2342_v8, %s1735_s10  ;;  %884 = vrot.lane.b32.xlu0 %v2337_v11, %s1735_s10 }
 0x1ba   : > { %985 = vrot.lane.b32.xlu1 %v2250_v29, %s1735_s10  ;;  %988 = vrot.lane.b32.xlu0 %v2248_v46, %s1735_s10 }
 0x1be   : > { %908 = vrot.lane.b32.xlu1 %v2321_v38, %s1737_s11  ;;  %910 = vrot.lane.b32.xlu0 %v2326_v19, %s1737_s11 }
 0x1c2   : > { %938 = vrot.lane.b32.xlu1 %v2337_v11, %s1737_s11  ;;  %940 = vrot.lane.b32.xlu0 %v2342_v8, %s1737_s11 }
 0x1cd   : > { %v957_v60 = vpop.permute.xlu1 %956  ;;  %v961_v59 = vpop.permute.xlu0 %960 }
 0x1ce   : > { %v962_v34 = vsel %vm233_vm3, %v961_v59, %v957_v60  ;;  %v965_v35 = vsel %vm233_vm3, %v957_v60, %v961_v59 }
 0x1cf   : > { %v2365_v2 = vsel %vm265_vm4, %v2248_v46, %v965_v35  ;;  %v2370_v1 = vsel %vm266_vm5, %v2250_v29, %v962_v34 }
 0x1d0   : > { %973 = vrot.lane.b32.xlu0 %v2365_v2, %s1735_s10  ;;  %969 = vrot.lane.b32.xlu1 %v2370_v1, %s1735_s10 }
 0x1d1   : > { %v1001_v40 = vpop.permute.xlu1 %1000  ;;  %v1003_v39 = vpop.permute.xlu0 %1002 }
 0x1d2   : > { %v1004_v14 = vsel %vm242_vm2, %v1001_v40, %v1003_v39  ;;  %v1008_v20 = vsel %vm242_vm2, %v1003_v39, %v1001_v40  ;;  %v730_v39 = vsub.s32 4, %v1871_v15 }
 0x1d3   : > { %v2381_v45 = vsel %vm349_vm7, %v2248_v46, %v1004_v14  ;;  %v2386_v21 = vsel %vm350_vm6, %v2250_v29, %v1008_v20  ;;  %v218_v14 = vld [vmem:[%s2412_s5] sm:$0xff] }
 0x1d4   : > { %3204 = vst [vmem:[#allocation36_spill] sm:$0xff] %v2386_v21  ;;  %1012 = vrot.lane.b32.xlu1 %v2386_v21, %s1735_s10  ;;  %1016 = vrot.lane.b32.xlu0 %v2381_v45, %s1735_s10  ;;  %v2421_v61 = vrot.slane %v218_v14, %v730_v39  ;;  %v2426_v13 = vrot.slane %v218_v14, %v1874_v16 }
 0x1d5   : > { %v658_v28 = vpop.permute.xlu1 %657  ;;  %v661_v60 = vpop.permute.xlu0 %660  ;;  %v2432_v31 = vrot.slane %v218_v14, %v1996_v56  ;;  %v2438_v33 = vrot.slane %v219_v9, %v730_v39  ;;  %v2468_v54 = vrot.slane %v218_v14, %v742_v26 }
 0x1d6   : > { %v662_v7 = vsel %vm276_vm8, %v661_v60, %v658_v28  ;;  %v665_v30 = vsel %vm276_vm8, %v658_v28, %v661_v60  ;;  %v2441_v28 = vrot.slane %v218_v14, %v1993_v55  ;;  %v2444_v60 = vrot.slane %v219_v9, %v1993_v55 }
 0x1d7   : > { %v666_v56 = vsel %vm307_vm10, %v2134_v48, %v665_v30  ;;  %v667_v53 = vsel %vm308_vm11, %v2136_v57, %v662_v7  ;;  %v2466_v30 = vrot.slane %v219_v9, %v1877_v17  ;;  %v2470_v7 = vrot.slane %v219_v9, %v742_v26 }
 0x1d8   : > { %1055 = vrot.lane.b32.xlu1 %v2248_v46, %s1737_s11  ;;  %1057 = vrot.lane.b32.xlu0 %v2250_v29, %s1737_s11  ;;  %v736_v47 = vmul.f32 %v2421_v61, %v2134_v48 }
 0x1d9   : > { %v776_v59 = vpop.permute.xlu1 %775  ;;  %v778_v34 = vpop.permute.xlu0 %777 }
 0x1da   : > { %v783_v22 = vsel %vm285_vm9, %v778_v34, %v776_v59 }
 0x1dc   : > { %1040 = vrot.lane.b32.xlu1 %v2365_v2, %s1737_s11  ;;  %1042 = vrot.lane.b32.xlu0 %v2370_v1, %s1737_s11 }
 0x1dd   : > { %v2405_v35 = vpop.permute.xlu1 %853  ;;  %v2407_v40 = vpop.permute.xlu0 %856 }
 0x1e0   : > { %1070 = vrot.lane.b32.xlu1 %v2381_v45, %s1737_s11  ;;  %1072 = vrot.lane.b32.xlu0 %v2386_v21, %s1737_s11  ;;  %v748_v21 = vmul.f32 %v2468_v54, %v2297_v0 }
 0x1e1   : > { %v2416_v20 = vpop.permute.xlu1 %923  ;;  %v2418_v12 = vpop.permute.xlu0 %925 }
 0x211   : > { %v634_v6 = vpop.permute.xlu1 %633  ;;  %v638_v10 = vpop.permute.xlu0 %637 }
 0x212   : > { %v639_v16 = vsel %vm276_vm8, %v638_v10, %v634_v6  ;;  %v642_v4 = vsel %vm276_vm8, %v634_v6, %v638_v10  ;;  %v2463_v6 = vrot.slane %v218_v14, %v1877_v17 }
 0x213   : > { %v643_v39 = vsel %vm307_vm10, %v2281_v32, %v642_v4  ;;  %v644_v55 = vsel %vm308_vm11, %v2286_v58, %v639_v16  ;;  %v737_v16 = vmul.f32 %v2438_v33, %v2136_v57 }
 0x214   : > { %v653_v51 = vmul.f32 %v2426_v13, %v643_v39  ;;  %v654_v10 = vmul.f32 %v2429_v5, %v644_v55  ;;  %v676_v39 = vmul.f32 %v2441_v28, %v666_v56  ;;  %v677_v55 = vmul.f32 %v2444_v60, %v667_v53 }
 0x215   : > { %v693_v49 = vpop.permute.xlu1 %692  ;;  %v697_v4 = vpop.permute.xlu0 %696 }
 0x216   : > { %v698_v52 = vsel %vm276_vm8, %v697_v4, %v693_v49  ;;  %v701_v17 = vsel %vm276_vm8, %v693_v49, %v697_v4  ;;  %v678_v44 = vadd.f32 %v676_v39, %v653_v51  ;;  %v679_v56 = vadd.f32 %v677_v55, %v654_v10 }
 0x217   : > { %v702_v26 = vsel %vm307_vm10, %v2297_v0, %v701_v17  ;;  %v703_v42 = vsel %vm308_vm11, %v2302_v3, %v698_v52  ;;  %v724_v49 = vmul.f32 %v2432_v31, %v2281_v32  ;;  %v725_v4 = vmul.f32 %v2435_v24, %v2286_v58 }
 0x218   : > { %v712_v53 = vmul.f32 %v2463_v6, %v702_v26  ;;  %v713_v23 = vmul.f32 %v2466_v30, %v703_v42  ;;  %v779_v17 = vsel %vm285_vm9, %v776_v59, %v778_v34  ;;  %v2498_v39 = vrot.slane %v218_v14, %v788_v50 }
 0x219   : > { %v753_v37 = vpop.permute.xlu1 %752  ;;  %v755_v52 = vpop.permute.xlu0 %754  ;;  %v2500_v42 = vrot.slane %v219_v9, %v788_v50  ;;  %v2502_v55 = vrot.slane %v218_v14, %v765_v41  ;;  %v2504_v26 = vrot.slane %v219_v9, %v765_v41  ;;  %v749_v59 = vmul.f32 %v2470_v7, %v2302_v3 }
 0x21a   : > { %v714_v36 = vadd.f32 %v712_v53, %v678_v44  ;;  %v715_v15 = vadd.f32 %v713_v23, %v679_v56  ;;  %v756_v51 = vsel %vm285_vm9, %v753_v37, %v755_v52  ;;  %v760_v10 = vsel %vm285_vm9, %v755_v52, %v753_v37 }
 0x21b   : > { %v784_v37 = vsel %vm391_vm12, %v2134_v48, %v779_v17  ;;  %v785_v50 = vsel %vm392_vm13, %v2136_v57, %v783_v22  ;;  %v761_v41 = vsel %vm391_vm12, %v2281_v32, %v756_v51  ;;  %v762_v9 = vsel %vm392_vm13, %v2286_v58, %v760_v10  ;;  %v2529_v51 = vld [vmem:[%s2412_s5 + $0x10] ss:$0 sm:$0xff]  ;;  %v2532_v58 = vld [vmem:[%s2412_s5 + $0x18] ss:$0 sm:$0xff] }
 0x21c   : > { %v726_v44 = vadd.f32 %v724_v49, %v714_v36  ;;  %v727_v23 = vadd.f32 %v725_v4, %v715_v15  ;;  %v771_v22 = vmul.f32 %v2502_v55, %v761_v41  ;;  %v772_v52 = vmul.f32 %v2504_v26, %v762_v9 }
 0x21d   : > { %v799_v36 = vpop.permute.xlu1 %798  ;;  %v801_v34 = vpop.permute.xlu0 %800  ;;  %v794_v32 = vmul.f32 %v2498_v39, %v784_v37  ;;  %v795_v15 = vmul.f32 %v2500_v42, %v785_v50  ;;  %v861_v10 = vsel %vm276_vm8, %v2405_v35, %v2407_v40 }
 0x21e   : > { %v738_v14 = vadd.f32 %v736_v47, %v726_v44  ;;  %v739_v56 = vadd.f32 %v737_v16, %v727_v23  ;;  %v802_v53 = vsel %vm285_vm9, %v799_v36, %v801_v34  ;;  %v806_v49 = vsel %vm285_vm9, %v801_v34, %v799_v36 }
 0x21f   : > { %v807_v47 = vsel %vm391_vm12, %v2297_v0, %v802_v53  ;;  %v858_v16 = vsel %vm276_vm8, %v2407_v40, %v2405_v35 }
 0x220   : > { %v750_v4 = vadd.f32 %v748_v21, %v738_v14  ;;  %v751_v17 = vadd.f32 %v749_v59, %v739_v56  ;;  %v808_v21 = vsel %vm392_vm13, %v2302_v3, %v806_v49  ;;  %v817_v50 = vmul.f32 %v2529_v51, %v807_v47 }
 0x221   : > { %v818_v0 = vmul.f32 %v2532_v58, %v808_v21  ;;  %v862_v3 = vsel %vm307_vm10, %v2182_v18, %v861_v10  ;;  %v863_v36 = vsel %vm308_vm11, %v2184_v25, %v858_v16 }
 0x222   : > { %v773_v59 = vadd.f32 %v771_v22, %v750_v4  ;;  %v774_v44 = vadd.f32 %v772_v52, %v751_v17  ;;  %v865_v47 = vmul.f32 %v863_v36, %v2444_v60 }
 0x224   : > { %v796_v23 = vadd.f32 %v794_v32, %v773_v59  ;;  %v797_v37 = vadd.f32 %v795_v15, %v774_v44  ;;  %v838_v41 = vpop.permute.xlu1 %837  ;;  %v842_v9 = vpop.permute.xlu0 %841  ;;  %v864_v15 = vmul.f32 %v862_v3, %v2441_v28  ;;  %v931_v3 = vsel %vm285_vm9, %v2418_v12, %v2416_v20 }
 0x225   : > { %v843_v35 = vsel %vm276_vm8, %v842_v9, %v838_v41  ;;  %v846_v40 = vsel %vm276_vm8, %v838_v41, %v842_v9  ;;  %v927_v9 = vsel %vm285_vm9, %v2416_v20, %v2418_v12  ;;  %v905_v12 = vmul.f32 %v2342_v8, %v2470_v7 }
 0x226   : > { %v819_v34 = vadd.f32 %v817_v50, %v796_v23  ;;  %v820_v14 = vadd.f32 %v818_v0, %v797_v37  ;;  %v847_v56 = vsel %vm307_vm10, %v2321_v38, %v846_v40  ;;  %v848_v53 = vsel %vm308_vm11, %v2326_v19, %v843_v35 }
 0x227   : > { %v849_v49 = vmul.f32 %v847_v56, %v2426_v13  ;;  %v850_v4 = vmul.f32 %v848_v53, %v2429_v5  ;;  %v896_v37 = vmul.f32 %v2321_v38, %v2432_v31  ;;  %v897_v50 = vmul.f32 %v2326_v19, %v2435_v24 }
 0x228   : > { %v2565_v17 = vsub.f32 %v2134_v48, %v819_v34  ;;  %v2568_v22 = vsub.f32 %v2136_v57, %v820_v14  ;;  %v881_v52 = vpop.permute.xlu1 %880  ;;  %v885_v32 = vpop.permute.xlu0 %884  ;;  %v900_v14 = vmul.f32 %v2421_v61, %v2182_v18  ;;  %v901_v56 = vmul.f32 %v2438_v33, %v2184_v25 }
 0x229   : > { %v886_v21 = vsel %vm276_vm8, %v885_v32, %v881_v52  ;;  %v889_v16 = vsel %vm276_vm8, %v881_v52, %v885_v32  ;;  %v866_v57 = vadd.f32 %v864_v15, %v849_v49  ;;  %v867_v59 = vadd.f32 %v865_v47, %v850_v4 }
 0x22a   : > { %v890_v10 = vsel %vm307_vm10, %v2337_v11, %v889_v16  ;;  %v891_v48 = vsel %vm308_vm11, %v2342_v8, %v886_v21  ;;  %1091 = vrot.lane.b32.xlu0 %v2568_v22, %s1732_s6  ;;  %1089 = vrot.lane.b32.xlu1 %v2565_v17, %s1732_s6  ;;  %v904_v53 = vmul.f32 %v2337_v11, %v2468_v54 }
 0x22b   : > { %v892_v44 = vmul.f32 %v890_v10, %v2463_v6  ;;  %v893_v23 = vmul.f32 %v891_v48, %v2466_v30  ;;  %v932_v20 = vsel %vm391_vm12, %v2182_v18, %v927_v9  ;;  %v933_v49 = vsel %vm392_vm13, %v2184_v25, %v931_v3 }
 0x22c   : > { %v986_v0 = vpop.permute.xlu1 %985  ;;  %v989_v41 = vpop.permute.xlu0 %988 }
 0x22d   : > { %v894_v36 = vadd.f32 %v892_v44, %v866_v57  ;;  %v895_v35 = vadd.f32 %v893_v23, %v867_v59  ;;  %v934_v23 = vmul.f32 %v932_v20, %v2498_v39 }
 0x22e   : > { %1135 = vrot.lane.b32.xlu0 %v2565_v17, %s1733_s7  ;;  %1132 = vrot.lane.b32.xlu1 %v2568_v22, %s1733_s7 }
 0x22f   : > { %v898_v40 = vadd.f32 %v896_v37, %v894_v36  ;;  %v899_v34 = vadd.f32 %v897_v50, %v895_v35  ;;  %v935_v37 = vmul.f32 %v933_v49, %v2500_v42 }
 0x230   : > { %v909_v4 = vpop.permute.xlu1 %908  ;;  %v911_v52 = vpop.permute.xlu0 %910 }
 0x231   : > { %v902_v32 = vadd.f32 %v900_v14, %v898_v40  ;;  %v903_v15 = vadd.f32 %v901_v56, %v899_v34  ;;  %v912_v47 = vsel %vm285_vm9, %v909_v4, %v911_v52  ;;  %v916_v21 = vsel %vm285_vm9, %v911_v52, %v909_v4 }
 0x232   : > { %v917_v16 = vsel %vm391_vm12, %v2321_v38, %v912_v47  ;;  %v918_v10 = vsel %vm392_vm13, %v2326_v19, %v916_v21 }
 0x233   : > { %v906_v48 = vadd.f32 %v904_v53, %v902_v32  ;;  %v907_v57 = vadd.f32 %v905_v12, %v903_v15  ;;  %v919_v59 = vmul.f32 %v917_v16, %v2502_v55  ;;  %v920_v44 = vmul.f32 %v918_v10, %v2504_v26 }
 0x234   : > { %v939_v50 = vpop.permute.xlu1 %938  ;;  %v941_v9 = vpop.permute.xlu0 %940 }
 0x235   : > { %v921_v3 = vadd.f32 %v919_v59, %v906_v48  ;;  %v922_v36 = vadd.f32 %v920_v44, %v907_v57  ;;  %v942_v38 = vsel %vm285_vm9, %v939_v50, %v941_v9  ;;  %v946_v35 = vsel %vm285_vm9, %v941_v9, %v939_v50  ;;  %v3205_v50 = vld [vmem:[#allocation36_spill] sm:$0xff] }
 0x236   : > { %v947_v19 = vsel %vm391_vm12, %v2337_v11, %v942_v38  ;;  %v948_v40 = vsel %vm392_vm13, %v2342_v8, %v946_v35  ;;  %v990_v11 = vsel %vm276_vm8, %v989_v41, %v986_v0  ;;  %v993_v8 = vsel %vm276_vm8, %v986_v0, %v989_v41 }
 0x237   : > { %v936_v34 = vadd.f32 %v934_v23, %v921_v3  ;;  %v937_v14 = vadd.f32 %v935_v37, %v922_v36  ;;  %v949_v56 = vmul.f32 %v2529_v51, %v947_v19  ;;  %v950_v53 = vmul.f32 %v2532_v58, %v948_v40 }
 0x238   : > { %v994_v15 = vsel %vm307_vm10, %v2248_v46, %v993_v8  ;;  %v995_v0 = vsel %vm308_vm11, %v2250_v29, %v990_v11  ;;  %v1029_v36 = vmul.f32 %v2370_v1, %v2435_v24  ;;  %v1037_v24 = vmul.f32 %v3205_v50, %v2470_v7 }
 0x239   : > { %v951_v12 = vadd.f32 %v949_v56, %v936_v34  ;;  %v952_v20 = vadd.f32 %v950_v53, %v937_v14  ;;  %v996_v57 = vmul.f32 %v994_v15, %v2441_v28  ;;  %v997_v59 = vmul.f32 %v995_v0, %v2444_v60 }
 0x23a   : > { %v1028_v60 = vmul.f32 %v2365_v2, %v2432_v31  ;;  %v1036_v31 = vmul.f32 %v2381_v45, %v2468_v54 }
 0x23b   : > { %v2637_v49 = vsub.f32 %v2182_v18, %v951_v12  ;;  %v2640_v4 = vsub.f32 %v2184_v25, %v952_v20 }
 0x23d   : > { %1221 = vrot.lane.b32.xlu0 %v2640_v4, %s1732_s6  ;;  %1219 = vrot.lane.b32.xlu1 %v2637_v49, %s1732_s6 }
 0x241   : > { %1265 = vrot.lane.b32.xlu0 %v2637_v49, %s1733_s7  ;;  %1262 = vrot.lane.b32.xlu1 %v2640_v4, %s1733_s7 }
 0x242   : > { %v970_v18 = vpop.permute.xlu1 %969  ;;  %v974_v52 = vpop.permute.xlu0 %973 }
 0x243   : > { %v975_v25 = vsel %vm276_vm8, %v974_v52, %v970_v18  ;;  %v978_v32 = vsel %vm276_vm8, %v970_v18, %v974_v52 }
 0x244   : > { %v979_v41 = vsel %vm307_vm10, %v2365_v2, %v978_v32  ;;  %v980_v47 = vsel %vm308_vm11, %v2370_v1, %v975_v25 }
 0x245   : > { %v981_v21 = vmul.f32 %v979_v41, %v2426_v13  ;;  %v982_v16 = vmul.f32 %v980_v47, %v2429_v5 }
 0x246   : > { %v1013_v10 = vpop.permute.xlu1 %1012  ;;  %v1017_v48 = vpop.permute.xlu0 %1016 }
 0x247   : > { %v1018_v44 = vsel %vm276_vm8, %v1017_v48, %v1013_v10  ;;  %v1021_v23 = vsel %vm276_vm8, %v1013_v10, %v1017_v48  ;;  %v998_v9 = vadd.f32 %v996_v57, %v981_v21  ;;  %v999_v5 = vadd.f32 %v997_v59, %v982_v16 }
 0x248   : > { %v1022_v37 = vsel %vm307_vm10, %v2381_v45, %v1021_v23  ;;  %v1023_v13 = vsel %vm308_vm11, %v3205_v50, %v1018_v44 }
 0x249   : > { %v1024_v3 = vmul.f32 %v1022_v37, %v2463_v6  ;;  %v1025_v28 = vmul.f32 %v1023_v13, %v2466_v30  ;;  %v1032_v6 = vmul.f32 %v2421_v61, %v2248_v46  ;;  %v1033_v30 = vmul.f32 %v2438_v33, %v2250_v29 }
 0x24a   : > { %v1056_v38 = vpop.permute.xlu1 %1055  ;;  %v1058_v35 = vpop.permute.xlu0 %1057 }
 0x24b   : > { %v1026_v19 = vadd.f32 %v1024_v3, %v998_v9  ;;  %v1027_v40 = vadd.f32 %v1025_v28, %v999_v5  ;;  %v1059_v34 = vsel %vm285_vm9, %v1056_v38, %v1058_v35  ;;  %v1063_v14 = vsel %vm285_vm9, %v1058_v35, %v1056_v38 }
 0x24c   : > { %v1064_v12 = vsel %vm391_vm12, %v2248_v46, %v1059_v34  ;;  %v1065_v20 = vsel %vm392_vm13, %v2250_v29, %v1063_v14 }
 0x24d   : > { %v1030_v56 = vadd.f32 %v1028_v60, %v1026_v19  ;;  %v1031_v53 = vadd.f32 %v1029_v36, %v1027_v40  ;;  %v1066_v41 = vmul.f32 %v1064_v12, %v2498_v39  ;;  %v1067_v47 = vmul.f32 %v1065_v20, %v2500_v42 }
 0x24e   : > { %v1041_v11 = vpop.permute.xlu1 %1040  ;;  %v1043_v8 = vpop.permute.xlu0 %1042 }
 0x24f   : > { %v1034_v61 = vadd.f32 %v1032_v6, %v1030_v56  ;;  %v1035_v18 = vadd.f32 %v1033_v30, %v1031_v53  ;;  %v1044_v33 = vsel %vm285_vm9, %v1041_v11, %v1043_v8  ;;  %v1048_v52 = vsel %vm285_vm9, %v1043_v8, %v1041_v11 }
 0x250   : > { %v1049_v54 = vsel %vm391_vm12, %v2365_v2, %v1044_v33  ;;  %v1050_v7 = vsel %vm392_vm13, %v2370_v1, %v1048_v52 }
 0x251   : > { %v1038_v25 = vadd.f32 %v1036_v31, %v1034_v61  ;;  %v1039_v32 = vadd.f32 %v1037_v24, %v1035_v18  ;;  %v1051_v15 = vmul.f32 %v1049_v54, %v2502_v55  ;;  %v1052_v0 = vmul.f32 %v1050_v7, %v2504_v26 }
 0x252   : > { %v1071_v21 = vpop.permute.xlu1 %1070  ;;  %v1073_v16 = vpop.permute.xlu0 %1072 }
 0x253   : > { %v1053_v10 = vadd.f32 %v1051_v15, %v1038_v25  ;;  %v1054_v48 = vadd.f32 %v1052_v0, %v1039_v32  ;;  %v1074_v2 = vsel %vm285_vm9, %v1071_v21, %v1073_v16  ;;  %v1078_v57 = vsel %vm285_vm9, %v1073_v16, %v1071_v21 }
 0x254   : > { %v1079_v1 = vsel %vm391_vm12, %v2381_v45, %v1074_v2  ;;  %v1080_v55 = vsel %vm392_vm13, %v3205_v50, %v1078_v57 }
 0x255   : > { %v1068_v26 = vadd.f32 %v1066_v41, %v1053_v10  ;;  %v1069_v39 = vadd.f32 %v1067_v47, %v1054_v48  ;;  %v1081_v42 = vmul.f32 %v2529_v51, %v1079_v1  ;;  %v1082_v59 = vmul.f32 %v2532_v58, %v1080_v55  ;;  %v3210_v58 = vld [vmem:[#allocation11_spill] sm:$0xff] }
 0x257   : > { %v1083_v44 = vadd.f32 %v1081_v42, %v1068_v26  ;;  %v1084_v23 = vadd.f32 %v1082_v59, %v1069_v39 }
 0x259   : > { %v2723_v37 = vsub.f32 %v2248_v46, %v1083_v44  ;;  %v2726_v13 = vsub.f32 %v2250_v29, %v1084_v23 }
 0x25b   : > { %1351 = vrot.lane.b32.xlu0 %v2726_v13, %s1732_s6  ;;  %1349 = vrot.lane.b32.xlu1 %v2723_v37, %s1732_s6  ;;  %s1572_s6 = sshll.u32 %s203_s27, 3 }
 0x25c   : > { %s205_s8 = scalar_lea.vmem [#allocation2], %s1572_s6 }
 0x25d   : > { %s1497_s9 = sshll.u32 %s205_s8, 4  ;;  %s1498_s9 = int_to_ptr.vmem [resolvable:$true] %s1497_s9 }
 0x25e   : > { %s1668_s14 = scalar_lea.vmem %s1498_s9, 128 }
 0x25f   : > { %1395 = vrot.lane.b32.xlu0 %v2723_v37, %s1733_s7  ;;  %1392 = vrot.lane.b32.xlu1 %v2726_v13, %s1733_s7  ;;  %s1586_s7 = sshll.u32 %s1790_s19, 7  ;;  %p1669_p11 = scmp.ne.s32.totalorder %s1498_s9, %s1668_s14 }
 0x260   : > { %s1495_s12 = scalar_lea.hbm %s3106_s4, %s1586_s7  ;;  %s1672_s19 = sshll.u32 %s1743_s20, 4  ;;  %s1673_s19 = int_to_ptr.vmem [resolvable:$false] %s1672_s19 }
 0x261   : > { %p1670_p12 = pnand %p1669_p11, %p1807_p5  ;;  %s1674_s22 = scalar_lea.vmem %s1673_s19, 256 }
 0x262   : > { %p1675_p0 = scmp.lt.s32.totalorder %s1498_s9, %s1673_s19  ;;  %p1676_p1 = scmp.lt.s32.totalorder %s1674_s22, %s1668_s14 }
 0x263   : > { %1119 = vrot.lane.b32.xlu0 %v2568_v22, %s1737_s11  ;;  %1117 = vrot.lane.b32.xlu1 %v2565_v17, %s1737_s11  ;;  %p1671_p13 = pneg %p1670_p12 }
 0x264   : > { %p1677_p2 = por %p1676_p1, %p1675_p0 }
 0x266   : > { %p1678_p3 = pnand %p1677_p2, %p1671_p13 }
 0x267   : > { %1190 = vrot.lane.b32.xlu0 %v2565_v17, %s1735_s10  ;;  %1187 = vrot.lane.b32.xlu1 %v2568_v22, %s1735_s10 }
 0x26b   : > { %1249 = vrot.lane.b32.xlu0 %v2640_v4, %s1737_s11  ;;  %1247 = vrot.lane.b32.xlu1 %v2637_v49, %s1737_s11 }
 0x26f   : > { %1320 = vrot.lane.b32.xlu0 %v2637_v49, %s1735_s10  ;;  %1317 = vrot.lane.b32.xlu1 %v2640_v4, %s1735_s10 }
 0x29c   : > { %v1090_v46 = vpop.permute.xlu1 %1089  ;;  %v1092_v29 = vpop.permute.xlu0 %1091 }
 0x29d   : > { %v1093_v45 = vsel %vm242_vm2, %v1090_v46, %v1092_v29  ;;  %v1097_v51 = vsel %vm242_vm2, %v1092_v29, %v1090_v46 }
 0x29e   : > { %v2756_v50 = vsel %vm349_vm7, 0.0, %v1093_v45  ;;  %v2760_v5 = vsel %vm350_vm6, 0.0, %v1097_v51 }
 0x29f   : > { %1104 = vrot.lane.b32.xlu0 %v2760_v5, %s1737_s11  ;;  %1102 = vrot.lane.b32.xlu1 %v2756_v50, %s1737_s11 }
 0x2a0   : > { %v1133_v3 = vpop.permute.xlu1 %1132  ;;  %v1136_v28 = vpop.permute.xlu0 %1135 }
 0x2a1   : > { %v1137_v60 = vsel %vm233_vm3, %v1136_v28, %v1133_v3  ;;  %v1140_v36 = vsel %vm233_vm3, %v1133_v3, %v1136_v28 }
 0x2a2   : > { %v2770_v35 = vsel %vm265_vm4, 0.0, %v1140_v36  ;;  %v2774_v40 = vsel %vm266_vm5, 0.0, %v1137_v60  ;;  %v3211_v36 = vld [vmem:[#allocation9_spill] sm:$0xff] }
 0x2a3   : > { %1145 = vrot.lane.b32.xlu1 %v2770_v35, %s1737_s11  ;;  %1147 = vrot.lane.b32.xlu0 %v2774_v40, %s1737_s11 }
 0x2a7   : > { %1172 = vrot.lane.b32.xlu1 %v2760_v5, %s1735_s10  ;;  %1175 = vrot.lane.b32.xlu0 %v2756_v50, %s1735_s10 }
 0x2ab   : > { %1202 = vrot.lane.b32.xlu1 %v2774_v40, %s1735_s10  ;;  %1205 = vrot.lane.b32.xlu0 %v2770_v35, %s1735_s10 }
 0x2af   : > { %v1220_v34 = vpop.permute.xlu1 %1219  ;;  %v1222_v14 = vpop.permute.xlu0 %1221 }
 0x2b0   : > { %v1223_v56 = vsel %vm242_vm2, %v1220_v34, %v1222_v14  ;;  %v1227_v53 = vsel %vm242_vm2, %v1222_v14, %v1220_v34 }
 0x2b1   : > { %v2792_v6 = vsel %vm349_vm7, 0.0, %v1223_v56  ;;  %v2796_v30 = vsel %vm350_vm6, 0.0, %v1227_v53 }
 0x2b2   : > { %1234 = vrot.lane.b32.xlu0 %v2796_v30, %s1737_s11  ;;  %1232 = vrot.lane.b32.xlu1 %v2792_v6, %s1737_s11 }
 0x2b3   : > { %v1263_v31 = vpop.permute.xlu1 %1262  ;;  %v1266_v24 = vpop.permute.xlu0 %1265 }
 0x2b4   : > { %v1267_v12 = vsel %vm233_vm3, %v1266_v24, %v1263_v31  ;;  %v1270_v20 = vsel %vm233_vm3, %v1263_v31, %v1266_v24 }
 0x2b5   : > { %v2806_v11 = vsel %vm265_vm4, 0.0, %v1270_v20  ;;  %v2810_v8 = vsel %vm266_vm5, 0.0, %v1267_v12  ;;  %v3212_v12 = vld [vmem:[#allocation10_spill] sm:$0xff] }
 0x2b6   : > { %1275 = vrot.lane.b32.xlu1 %v2806_v11, %s1737_s11  ;;  %1277 = vrot.lane.b32.xlu0 %v2810_v8, %s1737_s11 }
 0x2ba   : > { %1377 = vrot.lane.b32.xlu1 %v2723_v37, %s1737_s11  ;;  %1379 = vrot.lane.b32.xlu0 %v2726_v13, %s1737_s11 }
 0x2be   : > { %1302 = vrot.lane.b32.xlu1 %v2796_v30, %s1735_s10  ;;  %1305 = vrot.lane.b32.xlu0 %v2792_v6, %s1735_s10 }
 0x2c2   : > { %1332 = vrot.lane.b32.xlu1 %v2810_v8, %s1735_s10  ;;  %1335 = vrot.lane.b32.xlu0 %v2806_v11, %s1735_s10 }
 0x2cd   : > { %v1350_v61 = vpop.permute.xlu1 %1349  ;;  %v1352_v18 = vpop.permute.xlu0 %1351 }
 0x2ce   : > { %v1353_v33 = vsel %vm242_vm2, %v1350_v61, %v1352_v18  ;;  %v1357_v52 = vsel %vm242_vm2, %v1352_v18, %v1350_v61  ;;  %v3213_v18 = vld [vmem:[#allocation14_spill] sm:$0xff] }
 0x2cf   : > { %v2832_v54 = vsel %vm349_vm7, 0.0, %v1353_v33  ;;  %v2836_v7 = vsel %vm350_vm6, 0.0, %v1357_v52  ;;  %v1160_v33 = vmul.f32 %v2756_v50, %v3213_v18  ;;  %v1161_v52 = vmul.f32 %v2760_v5, %v3213_v18 }
 0x2d0   : > { %1364 = vrot.lane.b32.xlu0 %v2836_v7, %s1737_s11  ;;  %1362 = vrot.lane.b32.xlu1 %v2832_v54, %s1737_s11 }
 0x2d1   : > { %v1393_v25 = vpop.permute.xlu1 %1392  ;;  %v1396_v32 = vpop.permute.xlu0 %1395 }
 0x2d2   : > { %v1397_v15 = vsel %vm233_vm3, %v1396_v32, %v1393_v25  ;;  %v1400_v0 = vsel %vm233_vm3, %v1393_v25, %v1396_v32 }
 0x2d3   : > { %v2846_v41 = vsel %vm265_vm4, 0.0, %v1400_v0  ;;  %v2850_v47 = vsel %vm266_vm5, 0.0, %v1397_v15 }
 0x2d4   : > { %1405 = vrot.lane.b32.xlu1 %v2846_v41, %s1737_s11  ;;  %1407 = vrot.lane.b32.xlu0 %v2850_v47, %s1737_s11 }
 0x2d5   : > { %v1118_v21 = vpop.permute.xlu1 %1117  ;;  %v1120_v16 = vpop.permute.xlu0 %1119 }
 0x2d6   : > { %v1121_v26 = vsel %vm285_vm9, %v1118_v21, %v1120_v16  ;;  %v1125_v39 = vsel %vm285_vm9, %v1120_v16, %v1118_v21 }
 0x2d7   : > { %v1126_v46 = vsel %vm391_vm12, 0.0, %v1121_v26  ;;  %v1127_v29 = vsel %vm392_vm13, 0.0, %v1125_v39 }
 0x2d8   : > { %1447 = vrot.lane.b32.xlu1 %v2726_v13, %s1735_s10  ;;  %1450 = vrot.lane.b32.xlu0 %v2723_v37, %s1735_s10  ;;  %v1128_v38 = vmul.f32 %v1126_v46, %v3211_v36  ;;  %v1129_v19 = vmul.f32 %v1127_v29, %v3211_v36 }
 0x2d9   : > { %v1188_v10 = vpop.permute.xlu1 %1187  ;;  %v1191_v48 = vpop.permute.xlu0 %1190 }
 0x2da   : > { %v1192_v25 = vsel %vm276_vm8, %v1191_v48, %v1188_v10  ;;  %v1195_v32 = vsel %vm276_vm8, %v1188_v10, %v1191_v48 }
 0x2db   : > { %v1196_v46 = vsel %vm307_vm10, 0.0, %v1195_v32  ;;  %v1197_v29 = vsel %vm308_vm11, 0.0, %v1192_v25 }
 0x2dc   : > { %1432 = vrot.lane.b32.xlu1 %v2836_v7, %s1735_s10  ;;  %1435 = vrot.lane.b32.xlu0 %v2832_v54, %s1735_s10 }
 0x2dd   : > { %v2868_v2 = vpop.permute.xlu1 %1247  ;;  %v2870_v57 = vpop.permute.xlu0 %1249 }
 0x2e0   : > { %1462 = vrot.lane.b32.xlu1 %v2850_v47, %s1735_s10  ;;  %1465 = vrot.lane.b32.xlu0 %v2846_v41, %s1735_s10 }
 0x2e1   : > { %v2872_v1 = vpop.permute.xlu1 %1317  ;;  %v2874_v55 = vpop.permute.xlu0 %1320 }
 0x311   : > { %v1103_v42 = vpop.permute.xlu1 %1102  ;;  %v1105_v59 = vpop.permute.xlu0 %1104 }
 0x312   : > { %v1106_v44 = vsel %vm285_vm9, %v1103_v42, %v1105_v59  ;;  %v1110_v23 = vsel %vm285_vm9, %v1105_v59, %v1103_v42  ;;  %v3214_v42 = vld [vmem:[#allocation16_spill] sm:$0xff] }
 0x313   : > { %v1111_v45 = vsel %vm391_vm12, 0.0, %v1106_v44  ;;  %v1112_v51 = vsel %vm392_vm13, 0.0, %v1110_v23  ;;  %v1164_v59 = vmul.f32 %v2565_v17, %v3214_v42  ;;  %v1165_v50 = vmul.f32 %v2568_v22, %v3214_v42  ;;  %v3215_v44 = vld [vmem:[#allocation12_spill] sm:$0xff] }
 0x314   : > { %v1113_v9 = vmul.f32 %v1111_v45, %v3210_v58  ;;  %v1114_v3 = vmul.f32 %v1112_v51, %v3210_v58  ;;  %v1168_v5 = vmul.f32 %v2770_v35, %v3215_v44  ;;  %v1169_v10 = vmul.f32 %v2774_v40, %v3215_v44 }
 0x315   : > { %v1146_v28 = vpop.permute.xlu1 %1145  ;;  %v1148_v60 = vpop.permute.xlu0 %1147 }
 0x316   : > { %v1149_v34 = vsel %vm285_vm9, %v1146_v28, %v1148_v60  ;;  %v1153_v14 = vsel %vm285_vm9, %v1148_v60, %v1146_v28  ;;  %v1130_v31 = vadd.f32 %v1128_v38, %v1113_v9  ;;  %v1131_v24 = vadd.f32 %v1129_v19, %v1114_v3  ;;  %v3216_v60 = vld [vmem:[#allocation13_spill] sm:$0xff]  ;;  %v3217_v19 = vld [vmem:[#allocation18_spill] sm:$0xff] }
 0x317   : > { %v1154_v56 = vsel %vm391_vm12, 0.0, %v1149_v34  ;;  %v1155_v53 = vsel %vm392_vm13, 0.0, %v1153_v14  ;;  %v1198_v34 = vmul.f32 %v1196_v46, %v3217_v19  ;;  %v1199_v14 = vmul.f32 %v1197_v29, %v3217_v19 }
 0x318   : > { %v1156_v20 = vmul.f32 %v1154_v56, %v3212_v12  ;;  %v1157_v61 = vmul.f32 %v1155_v53, %v3212_v12 }
 0x319   : > { %v1173_v15 = vpop.permute.xlu1 %1172  ;;  %v1176_v0 = vpop.permute.xlu0 %1175 }
 0x31a   : > { %v1158_v21 = vadd.f32 %v1156_v20, %v1130_v31  ;;  %v1159_v16 = vadd.f32 %v1157_v61, %v1131_v24  ;;  %v1177_v26 = vsel %vm276_vm8, %v1176_v0, %v1173_v15  ;;  %v1180_v39 = vsel %vm276_vm8, %v1173_v15, %v1176_v0 }
 0x31b   : > { %v1181_v17 = vsel %vm307_vm10, 0.0, %v1180_v39  ;;  %v1182_v22 = vsel %vm308_vm11, 0.0, %v1177_v26  ;;  %v1251_v31 = vsel %vm285_vm9, %v2868_v2, %v2870_v57  ;;  %v1255_v24 = vsel %vm285_vm9, %v2870_v57, %v2868_v2 }
 0x31c   : > { %v1162_v48 = vadd.f32 %v1160_v33, %v1158_v21  ;;  %v1163_v23 = vadd.f32 %v1161_v52, %v1159_v16  ;;  %v1183_v36 = vmul.f32 %v1181_v17, %v3216_v60  ;;  %v1184_v38 = vmul.f32 %v1182_v22, %v3216_v60  ;;  %v3218_v33 = vld [vmem:[#allocation15_spill] sm:$0xff] }
 0x31d   : > { %v1203_v45 = vpop.permute.xlu1 %1202  ;;  %v1206_v51 = vpop.permute.xlu0 %1205  ;;  %v1256_v0 = vsel %vm391_vm12, 0.0, %v1251_v31  ;;  %v1257_v21 = vsel %vm392_vm13, 0.0, %v1255_v24  ;;  %v3223_v24 = vld [vmem:[#allocation22_spill] sm:$0xff] }
 0x31e   : > { %v1166_v35 = vadd.f32 %v1164_v59, %v1162_v48  ;;  %v1167_v58 = vadd.f32 %v1165_v50, %v1163_v23  ;;  %v1207_v40 = vsel %vm276_vm8, %v1206_v51, %v1203_v45  ;;  %v1210_v9 = vsel %vm276_vm8, %v1203_v45, %v1206_v51  ;;  %v3219_v59 = vld [vmem:[#allocation17_spill] sm:$0xff] }
 0x31f   : > { %v1211_v56 = vsel %vm307_vm10, 0.0, %v1210_v9  ;;  %v1212_v53 = vsel %vm308_vm11, 0.0, %v1207_v40  ;;  %v3221_v9 = vld [vmem:[#allocation20_spill] sm:$0xff] }
 0x320   : > { %v1170_v3 = vadd.f32 %v1168_v5, %v1166_v35  ;;  %v1171_v28 = vadd.f32 %v1169_v10, %v1167_v58  ;;  %v1213_v52 = vmul.f32 %v1211_v56, %v3218_v33  ;;  %v1214_v25 = vmul.f32 %v1212_v53, %v3218_v33  ;;  %v3220_v5 = vld [vmem:[#allocation19_spill] sm:$0xff] }
 0x321   : > { %v1258_v10 = vmul.f32 %v1256_v0, %v3220_v5  ;;  %v1259_v48 = vmul.f32 %v1257_v21, %v3220_v5  ;;  %v3224_v33 = vld [vmem:[#allocation23_spill] sm:$0xff] }
 0x322   : > { %v1185_v12 = vadd.f32 %v1183_v36, %v1170_v3  ;;  %v1186_v20 = vadd.f32 %v1184_v38, %v1171_v28  ;;  %v3222_v38 = vld [vmem:[#allocation21_spill] sm:$0xff] }
 0x323   : > { %v1290_v19 = vmul.f32 %v2792_v6, %v3222_v38  ;;  %v1299_v6 = vmul.f32 %v2810_v8, %v3224_v33  ;;  %v1325_v8 = vsel %vm276_vm8, %v2872_v1, %v2874_v55 }
 0x324   : > { %v1200_v61 = vadd.f32 %v1198_v34, %v1185_v12  ;;  %v1201_v18 = vadd.f32 %v1199_v14, %v1186_v20  ;;  %v1233_v32 = vpop.permute.xlu1 %1232  ;;  %v1235_v15 = vpop.permute.xlu0 %1234  ;;  %v1291_v34 = vmul.f32 %v2796_v30, %v3222_v38  ;;  %v1294_v12 = vmul.f32 %v2637_v49, %v3223_v24 }
 0x325   : > { %v1236_v16 = vsel %vm285_vm9, %v1233_v32, %v1235_v15  ;;  %v1240_v2 = vsel %vm285_vm9, %v1235_v15, %v1233_v32  ;;  %v1295_v20 = vmul.f32 %v2640_v4, %v3223_v24  ;;  %v3229_v24 = vld [vmem:[#allocation28_spill] sm:$0xff] }
 0x326   : > { %v1215_v57 = vadd.f32 %v1213_v52, %v1200_v61  ;;  %v1216_v26 = vadd.f32 %v1214_v25, %v1201_v18  ;;  %v1241_v39 = vsel %vm391_vm12, 0.0, %v1236_v16  ;;  %v1242_v42 = vsel %vm392_vm13, 0.0, %v1240_v2 }
 0x327   : > { %v1243_v50 = vmul.f32 %v1241_v39, %v3219_v59  ;;  %v1244_v44 = vmul.f32 %v1242_v42, %v3219_v59  ;;  %v1298_v52 = vmul.f32 %v2806_v11, %v3224_v33  ;;  %v1322_v11 = vsel %vm276_vm8, %v2874_v55, %v2872_v1  ;;  %v3226_v55 = vld [vmem:[#allocation24_spill] sm:$0xff] }
 0x328   : > { %v1276_v23 = vpop.permute.xlu1 %1275  ;;  %v1278_v46 = vpop.permute.xlu0 %1277 }
 0x329   : > { %v1245_v29 = vadd.f32 %v1243_v50, %v1215_v57  ;;  %v1246_v17 = vadd.f32 %v1244_v44, %v1216_v26  ;;  %v1279_v22 = vsel %vm285_vm9, %v1276_v23, %v1278_v46  ;;  %v1283_v45 = vsel %vm285_vm9, %v1278_v46, %v1276_v23  ;;  %v3225_v57 = vld [vmem:[#allocation25_spill] sm:$0xff] }
 0x32a   : > { %v1284_v51 = vsel %vm391_vm12, 0.0, %v1279_v22  ;;  %v1285_v35 = vsel %vm392_vm13, 0.0, %v1283_v45  ;;  %v1326_v50 = vsel %vm307_vm10, 0.0, %v1325_v8  ;;  %v1327_v44 = vsel %vm308_vm11, 0.0, %v1322_v11 }
 0x32b   : > { %v1260_v58 = vadd.f32 %v1258_v10, %v1245_v29  ;;  %v1261_v40 = vadd.f32 %v1259_v48, %v1246_v17  ;;  %v1286_v3 = vmul.f32 %v1284_v51, %v3221_v9  ;;  %v1287_v28 = vmul.f32 %v1285_v35, %v3221_v9  ;;  %v3227_v51 = vld [vmem:[#allocation26_spill] sm:$0xff] }
 0x32c   : > { %v1378_v60 = vpop.permute.xlu1 %1377  ;;  %v1380_v36 = vpop.permute.xlu0 %1379  ;;  %v1328_v23 = vmul.f32 %v1326_v50, %v3226_v55  ;;  %v1329_v46 = vmul.f32 %v1327_v44, %v3226_v55  ;;  %v3232_v50 = vld [vmem:[#allocation31_spill] sm:$0xff] }
 0x32d   : > { %v1288_v14 = vadd.f32 %v1286_v3, %v1260_v58  ;;  %v1289_v56 = vadd.f32 %v1287_v28, %v1261_v40  ;;  %v1381_v29 = vsel %vm285_vm9, %v1378_v60, %v1380_v36  ;;  %v1385_v17 = vsel %vm285_vm9, %v1380_v36, %v1378_v60 }
 0x32e   : > { %v1386_v3 = vsel %vm391_vm12, 0.0, %v1381_v29  ;;  %v1387_v28 = vsel %vm392_vm13, 0.0, %v1385_v17  ;;  %v1424_v44 = vmul.f32 %v2723_v37, %v3232_v50 }
 0x32f   : > { %v1292_v53 = vadd.f32 %v1290_v19, %v1288_v14  ;;  %v1293_v31 = vadd.f32 %v1291_v34, %v1289_v56  ;;  %v3228_v56 = vld [vmem:[#allocation27_spill] sm:$0xff] }
 0x330   : > { %v1303_v61 = vpop.permute.xlu1 %1302  ;;  %v1306_v18 = vpop.permute.xlu0 %1305 }
 0x331   : > { %v1296_v25 = vadd.f32 %v1294_v12, %v1292_v53  ;;  %v1297_v30 = vadd.f32 %v1295_v20, %v1293_v31  ;;  %v1307_v0 = vsel %vm276_vm8, %v1306_v18, %v1303_v61  ;;  %v1310_v21 = vsel %vm276_vm8, %v1303_v61, %v1306_v18 }
 0x332   : > { %v1311_v49 = vsel %vm307_vm10, 0.0, %v1310_v21  ;;  %v1312_v4 = vsel %vm308_vm11, 0.0, %v1307_v0  ;;  %v1388_v12 = vmul.f32 %v1386_v3, %v3229_v24  ;;  %v1389_v20 = vmul.f32 %v1387_v28, %v3229_v24  ;;  %v3230_v21 = vld [vmem:[#allocation29_spill] sm:$0xff] }
 0x333   : > { %v1300_v32 = vadd.f32 %v1298_v52, %v1296_v25  ;;  %v1301_v15 = vadd.f32 %v1299_v6, %v1297_v30  ;;  %v1313_v26 = vmul.f32 %v1311_v49, %v3225_v57  ;;  %v1314_v39 = vmul.f32 %v1312_v4, %v3225_v57 }
 0x334   : > { %v1333_v16 = vpop.permute.xlu1 %1332  ;;  %v1336_v2 = vpop.permute.xlu0 %1335 }
 0x335   : > { %v1337_v42 = vsel %vm276_vm8, %v1336_v2, %v1333_v16  ;;  %v1340_v59 = vsel %vm276_vm8, %v1333_v16, %v1336_v2  ;;  %v1315_v5 = vadd.f32 %v1313_v26, %v1300_v32  ;;  %v1316_v10 = vadd.f32 %v1314_v39, %v1301_v15  ;;  %v3231_v16 = vld [vmem:[#allocation30_spill] sm:$0xff] }
 0x336   : > { %v1341_v48 = vsel %vm307_vm10, 0.0, %v1340_v59  ;;  %v1342_v1 = vsel %vm308_vm11, 0.0, %v1337_v42  ;;  %v1420_v2 = vmul.f32 %v2832_v54, %v3231_v16  ;;  %v1421_v11 = vmul.f32 %v2836_v7, %v3231_v16 }
 0x337   : > { %v1330_v22 = vadd.f32 %v1328_v23, %v1315_v5  ;;  %v1331_v45 = vadd.f32 %v1329_v46, %v1316_v10  ;;  %v1343_v35 = vmul.f32 %v1341_v48, %v3227_v51  ;;  %v1344_v58 = vmul.f32 %v1342_v1, %v3227_v51  ;;  %v3233_v5 = vld [vmem:[#allocation32_spill] sm:$0xff] }
 0x338   : > { %v1425_v54 = vmul.f32 %v2726_v13, %v3232_v50  ;;  %v1428_v7 = vmul.f32 %v2846_v41, %v3233_v5  ;;  %v1429_v10 = vmul.f32 %v2850_v47, %v3233_v5 }
 0x339   : > { %v1345_v34 = vadd.f32 %v1343_v35, %v1330_v22  ;;  %v1346_v14 = vadd.f32 %v1344_v58, %v1331_v45  ;;  %v3234_v45 = vld [vmem:[#allocation34_spill] sm:$0xff]  ;;  %v3235_v58 = vld [vmem:[#allocation33_spill] sm:$0xff] }
 0x342   : > { %v1363_v40 = vpop.permute.xlu1 %1362  ;;  %v1365_v9 = vpop.permute.xlu0 %1364 }
 0x343   : > { %v1366_v38 = vsel %vm285_vm9, %v1363_v40, %v1365_v9  ;;  %v1370_v19 = vsel %vm285_vm9, %v1365_v9, %v1363_v40 }
 0x344   : > { %v1371_v60 = vsel %vm391_vm12, 0.0, %v1366_v38  ;;  %v1372_v36 = vsel %vm392_vm13, 0.0, %v1370_v19 }
 0x345   : > { %v1373_v53 = vmul.f32 %v1371_v60, %v3228_v56  ;;  %v1374_v31 = vmul.f32 %v1372_v36, %v3228_v56 }
 0x346   : > { %v1406_v61 = vpop.permute.xlu1 %1405  ;;  %v1408_v18 = vpop.permute.xlu0 %1407 }
 0x347   : > { %v1375_v33 = vadd.f32 %v1373_v53, %v1345_v34  ;;  %v1376_v52 = vadd.f32 %v1374_v31, %v1346_v14  ;;  %v1409_v6 = vsel %vm285_vm9, %v1406_v61, %v1408_v18  ;;  %v1413_v25 = vsel %vm285_vm9, %v1408_v18, %v1406_v61  ;;  %v3236_v31 = vld [vmem:[#allocation35_spill] sm:$0xff] }
 0x348   : > { %v1414_v30 = vsel %vm391_vm12, 0.0, %v1409_v6  ;;  %v1415_v32 = vsel %vm392_vm13, 0.0, %v1413_v25 }
 0x349   : > { %v1390_v15 = vadd.f32 %v1388_v12, %v1375_v33  ;;  %v1391_v0 = vadd.f32 %v1389_v20, %v1376_v52  ;;  %v1416_v49 = vmul.f32 %v1414_v30, %v3230_v21  ;;  %v1417_v4 = vmul.f32 %v1415_v32, %v3230_v21 }
 0x34a   : > { %v1448_v8 = vpop.permute.xlu1 %1447  ;;  %v1451_v57 = vpop.permute.xlu0 %1450 }
 0x34b   : > { %v1418_v27 = vadd.f32 %v1416_v49, %v1390_v15  ;;  %v1419_v26 = vadd.f32 %v1417_v4, %v1391_v0  ;;  %v1452_v43 = vsel %vm276_vm8, %v1451_v57, %v1448_v8  ;;  %v1455_v39 = vsel %vm276_vm8, %v1448_v8, %v1451_v57 }
 0x34c   : > { %v1456_v48 = vsel %vm307_vm10, 0.0, %v1455_v39  ;;  %v1457_v1 = vsel %vm308_vm11, 0.0, %v1452_v43 }
 0x34d   : > { %v1422_v42 = vadd.f32 %v1420_v2, %v1418_v27  ;;  %v1423_v59 = vadd.f32 %v1421_v11, %v1419_v26  ;;  %v1458_v40 = vmul.f32 %v1456_v48, %v3235_v58  ;;  %v1459_v9 = vmul.f32 %v1457_v1, %v3235_v58 }
 0x34e   : > { %v1433_v55 = vpop.permute.xlu1 %1432  ;;  %v1436_v23 = vpop.permute.xlu0 %1435 }
 0x34f   : > { %v1426_v46 = vadd.f32 %v1424_v44, %v1422_v42  ;;  %v1427_v37 = vadd.f32 %v1425_v54, %v1423_v59  ;;  %v1437_v29 = vsel %vm276_vm8, %v1436_v23, %v1433_v55  ;;  %v1440_v13 = vsel %vm276_vm8, %v1433_v55, %v1436_v23 }
 0x350   : > { %v1441_v41 = vsel %vm307_vm10, 0.0, %v1440_v13  ;;  %v1442_v47 = vsel %vm308_vm11, 0.0, %v1437_v29 }
 0x351   : > { %v1430_v17 = vadd.f32 %v1428_v7, %v1426_v46  ;;  %v1431_v22 = vadd.f32 %v1429_v10, %v1427_v37  ;;  %v1443_v51 = vmul.f32 %v1441_v41, %v3234_v45  ;;  %v1444_v35 = vmul.f32 %v1442_v47, %v3234_v45 }
 0x352   : > { %v1463_v3 = vpop.permute.xlu1 %1462  ;;  %v1466_v28 = vpop.permute.xlu0 %1465 }
 0x353   : > { %v1445_v38 = vadd.f32 %v1443_v51, %v1430_v17  ;;  %v1446_v19 = vadd.f32 %v1444_v35, %v1431_v22  ;;  %v1467_v60 = vsel %vm276_vm8, %v1466_v28, %v1463_v3  ;;  %v1470_v36 = vsel %vm276_vm8, %v1463_v3, %v1466_v28 }
 0x354   : > { %v1471_v34 = vsel %vm307_vm10, 0.0, %v1470_v36  ;;  %v1472_v14 = vsel %vm308_vm11, 0.0, %v1467_v60 }
 0x355   : > { %v1460_v56 = vadd.f32 %v1458_v40, %v1445_v38  ;;  %v1461_v53 = vadd.f32 %v1459_v9, %v1446_v19  ;;  %v1473_v24 = vmul.f32 %v1471_v34, %v3236_v31  ;;  %v1474_v12 = vmul.f32 %v1472_v14, %v3236_v31 }
 0x357   : > { %v1475_v20 = vadd.f32 %v1473_v24, %v1460_v56  ;;  %v1476_v61 = vadd.f32 %v1474_v12, %v1461_v53 }
 0x359   : > { %v1479_v18 = vcombine.low %v1475_v20, %v1476_v61 }
 0x35b   : > { %1481 = vst [vmem:[%s205_s8] sm:$0xff] %v1479_v18 }
 0x35c   : > { %1681 = shalt.err (!%p1678_p3)
}
 0x35d   : > { %s1682_s23 = scalar_lea.hbm %s1495_s12, 128  ;;  %s1686_s30 = scalar_lea.hbm %s3106_s4, 512 }
 0x35e   : > { %p1683_p4 = scmp.ne.s32.totalorder %s1495_s12, %s1682_s23  ;;  %p1687_p9 = scmp.lt.s32.totalorder %s1495_s12, %s3106_s4 }
 0x35f   : > { %p1688_p10 = scmp.lt.s32.totalorder %s1686_s30, %s1682_s23 }
 0x360   : > { %p1684_p7 = pnand %p1683_p4, %p1807_p5 }
 0x361   : > { %p1689_p11 = por %p1688_p10, %p1687_p9 }
 0x362   : > { %p1685_p8 = pneg %p1684_p7 }
 0x364   : > { %p1690_p12 = pnand %p1689_p11, %p1685_p8 }
 0x366   : > { %1693 = shalt.err (!%p1690_p12)
}
 0x367   : > { %1587 = dma.vmem_to_hbm [thread:$0]  (%p1807_p5), %s1498_s9, 128, %s1495_s12, %s1483_s13  }
 0x368 PF: > { %p1593_p13 = scmp.ge.s32.totalorder %s1728_s18, 2  ;;  %s1509_s6 = sand.u32 1, %s1716_s15  }
 0x369   : > { %s1510_s7 = scalar_lea.sflag [#allocation3], %s1509_s6 }
 0x36a   : > { %p1590_p0 = pnand %p1593_p13, %p1811_p6 }
 0x36c   : > { %p1591_p1 = pneg %p1590_p0 }
 0x36e   : > { %1711 = dma.done.wait (%p1591_p1), %s1510_s7, 128  }
 0x36f   : > { %1713 = vsyncadd (%p1591_p1), %s1510_s7, 4294967168  ;;  %p14_p2 = scmp.ge.s32.totalorder %s1794_s21, 6   ;;  %s3237_s15 = smov %s1720_s16 }
 0x370   : > { %s3238_s16 = smov %s1724_s17  ;;  %s3239_s17 = smov %s1805_s24 }
 0x371   : > { %s3240_s18 = smov %s1794_s21  ;;  %16 = sbr.rel (!%p14_p2) target bundleno = 3 (0x3), region = 74 }
 0x376   :  { %1515 = vsyncpa [#allocation3], 1 }
 0x377   :  { %1517 = vsyncpa [#allocation3 + $0x1], 1 }

</bundles_post_ra>
